<compile_context>
chip_gen: v6e
topology: v6e:2x2x1
jax: 0.10.0
libtpu: 0.0.40
codegen_flags: <defaults>
</compile_context>

<pallas_src>
import functools

import jax
import jax.numpy as jnp
import numpy as np
from jax.experimental import pallas as pl
from jax.experimental.pallas import tpu as pltpu

NUM_CLASSES = 2
BN_EPS = 1e-5
NEG_SLOPE = 0.01       # PyTorch LeakyReLU default

C1 = 8                 # block1 output channels
C2_REAL = 24           # block2 real output channels
C2 = 32                # block2 channels padded 24 -> 32 (lane group size)
HEAD_PAD = 128         # head output lane width (real classes = 2)


# -----------------------------------------------------------------------------
# Fused Pallas kernel: whole network for one batch block, one invocation
# -----------------------------------------------------------------------------
def cnn_fused_kernel(x_ref,
                     w1a_ref, w1b_ref, w1s_ref,
                     w2a_ref, w2b_ref, w2s_ref, hw_ref,
                     bias_ref,
                     out_ref,
                     p1_ref, p2_ref, p3_ref, p4_ref,
                     *, NB, H, W):
    """x_ref: (NB, H, W) single-channel input rows (W on lanes).
    w?a/w?b: (3, W*Cin, W*Cout) banded 3x3 weights (dx + W-padding folded in, BN
    scale folded in).  w?s: (W*Cin, W*Cout) expanded 1x1 shortcut.  hw: (256,128)
    avgpool+Linear head.  bias_ref: (8,256) packed lane-dense biases.
    p1..p4: VMEM scratch with 1 zero row of H-padding at top/bottom."""
    H2, W2 = H // 2, W // 2
    WC1 = W * C1            # 128: lane width of block1 activations
    WC2 = W2 * C2           # 256: lane width of block2 activations
    f32 = jnp.float32

    def leaky(v):
        return jnp.where(v > 0, v, NEG_SLOPE * v)

    def shift_eye(n, k):
        # S[r, c] = 1 where r == c + k, so (x @ S)[c] = x[c + k]  (lane shift).
        r = jax.lax.broadcasted_iota(jnp.int32, (n, n), 0)
        c = jax.lax.broadcasted_iota(jnp.int32, (n, n), 1)
        return (r == c + k).astype(f32)

    def pick_rows(rows_out, rows_in, parity):
        # S[r, c] = 1 where c == 2r + parity, so (S @ X)[r] = X[2r + parity].
        r = jax.lax.broadcasted_iota(jnp.int32, (rows_out, rows_in), 0)
        c = jax.lax.broadcasted_iota(jnp.int32, (rows_out, rows_in), 1)
        return (c == 2 * r + parity).astype(f32)

    def conv3x3(pad_ref, w_ref, bias_row, rows_out):
        # pad_ref: (NB, rows_out+2, Kin) H-padded rows; w_ref: (3, Kin, Kout).
        k_in = w_ref.shape[1]
        k_out = w_ref.shape[2]
        m = NB * rows_out
        acc = jnp.broadcast_to(bias_row.reshape(1, k_out), (m, k_out))
        for dy in range(3):                      # dx folded into the banded weight
            lhs = pad_ref[:, dy:dy + rows_out, :].reshape(m, k_in)
            acc = acc + jnp.dot(lhs, w_ref[dy],
                                preferred_element_type=jnp.float32)
        return acc

    def maxpool2x2(flat, rows_in, width, group):
        # flat: (NB*rows_in, width) lane-dense rows.  2x2 max-pool via MXU
        # selection matmuls + one lane-shift matmul (no sublane/lane relayouts).
        # Result stays uncompacted: even pixel groups carry the pooled values.
        rows_out = rows_in // 2
        ev = jnp.dot(pick_rows(NB * rows_out, NB * rows_in, 0), flat,
                     preferred_element_type=jnp.float32)
        od = jnp.dot(pick_rows(NB * rows_out, NB * rows_in, 1), flat,
                     preferred_element_type=jnp.float32)
        hm = jnp.maximum(ev, od)                               # H-direction pairs
        sh = jnp.dot(hm, shift_eye(width, group),
                     preferred_element_type=jnp.float32)       # lanes shifted by C
        return jnp.maximum(hm, sh)                             # W-direction pairs

    # ---- zero only the 1-row top/bottom H-padding borders of the scratch ----
    for pref, wc in ((p1_ref, W), (p2_ref, WC1), (p3_ref, WC1), (p4_ref, WC2)):
        hp = pref.shape[1]
        z = jnp.zeros((NB, 1, wc), f32)
        pref[:, 0:1, :] = z
        pref[:, hp - 1:hp, :] = z

    x = x_ref[...]                                             # (NB, H, W), Cin=1

    bias = bias_ref[...]                                       # (8, 256)
    b1a = bias[0, :WC1]
    b1sum = bias[1, :WC1]          # BN2 bias + shortcut BN bias (pre-added)
    b2a = bias[2, :WC2]
    b2sum = bias[3, :WC2]
    bl = bias[4, :HEAD_PAD]

    # ---------------- Residual block 1 (1 -> 8) + MaxPool ----------------
    p1_ref[:, 1:H + 1, :] = x
    o = leaky(conv3x3(p1_ref, w1a_ref, b1a, H))                # (NB*H, 128)

    p2_ref[:, 1:H + 1, :] = o.reshape(NB, H, WC1)
    o = conv3x3(p2_ref, w1b_ref, b1sum, H)                     # conv2 + BN2 (+bns)

    sc = jnp.dot(x.reshape(NB * H, W), w1s_ref[...],
                 preferred_element_type=jnp.float32)           # 1x1 shortcut + BN
    y = leaky(o + sc)                                          # (NB*H, 128)

    m1 = maxpool2x2(y, H, WC1, C1)                             # (NB*H2, 128)

    # ---------------- Residual block 2 (8 -> 24, padded 32) + MaxPool ----------------
    p3_ref[:, 1:H2 + 1, :] = m1.reshape(NB, H2, WC1)
    o = leaky(conv3x3(p3_ref, w2a_ref, b2a, H2))               # (NB*H2, 256)

    p4_ref[:, 1:H2 + 1, :] = o.reshape(NB, H2, WC2)
    o = conv3x3(p4_ref, w2b_ref, b2sum, H2)

    sc = jnp.dot(m1, w2s_ref[...], preferred_element_type=jnp.float32)
    y = leaky(o + sc)                                          # (NB*H2, 256)

    m2 = maxpool2x2(y, H2, WC2, C2)                            # (NB*H2//2, 256)

    # -------- Head: AdaptiveAvgPool(1,1) + Dropout(eval: identity) + Linear --------
    # The 1/(H/4 * W/4) average and the pooled-pixel selection are folded into hw.
    part = jnp.dot(m2, hw_ref[...], preferred_element_type=jnp.float32)
    out_ref[...] = jnp.sum(part.reshape(NB, H2 // 2, HEAD_PAD), axis=1) + bl


# -----------------------------------------------------------------------------
# Forward wrapper (single pallas_call)
# -----------------------------------------------------------------------------
def cnn_forward_pallas(x_nchw, prep, batch_block=None):
    N, cin, H, W = x_nchw.shape
    assert cin == 1, "model expects 1 input channel"
    x = x_nchw.reshape(N, H, W).astype(jnp.float32)      # drop Cin=1, rows on sublanes

    # Whole batch in one block by default (best on single-TC v5e/v6e at tiny N).
    # On v7x pass batch_block=N//2 to shard the "parallel" batch axis over both
    # TensorCores and bound VMEM as N grows.
    NB = N if batch_block is None else batch_block
    assert N % NB == 0
    grid = (N // NB,)

    H2, W2 = H // 2, W // 2
    WC1, WC2 = W * C1, W2 * C2

    kernel = functools.partial(cnn_fused_kernel, NB=NB, H=H, W=W)

    def const_spec(a):
        nd = a.ndim
        return pl.BlockSpec(a.shape, lambda i, nd=nd: (0,) * nd)

    out = pl.pallas_call(
        kernel,
        out_shape=jax.ShapeDtypeStruct((N, HEAD_PAD), jnp.float32),
        grid_spec=pltpu.PrefetchScalarGridSpec(
            num_scalar_prefetch=0,
            grid=grid,
            in_specs=[pl.BlockSpec((NB, H, W), lambda i: (i, 0, 0))]
                     + [const_spec(a) for a in prep],
            out_specs=pl.BlockSpec((NB, HEAD_PAD), lambda i: (i, 0)),
            scratch_shapes=[
                pltpu.VMEM((NB, H + 2, W), jnp.float32),        # block1 conv1 in
                pltpu.VMEM((NB, H + 2, WC1), jnp.float32),      # block1 conv2 in
                pltpu.VMEM((NB, H2 + 2, WC1), jnp.float32),     # block2 conv1 in
                pltpu.VMEM((NB, H2 + 2, WC2), jnp.float32),     # block2 conv2 in
            ]),
        compiler_params=pltpu.CompilerParams(
            dimension_semantics=("parallel",)),
    )(x, *prep)
    return out[:, :NUM_CLASSES]


# -----------------------------------------------------------------------------
# One-time parameter preprocessing: BN folding + banded lane-dense weights
# -----------------------------------------------------------------------------
def _fold_bn(gamma, beta, mean, var, eps=BN_EPS):
    g = np.asarray(gamma, np.float32)
    b = np.asarray(beta, np.float32)
    m = np.asarray(mean, np.float32)
    v = np.asarray(var, np.float32)
    scale = (g / np.sqrt(v + eps)).astype(np.float32)
    bias = (b - m * scale).astype(np.float32)
    return scale, bias


def _band3x3(w, n_pix, in_stride, in_width, cout_pad):
    """w: (3,3,cin,cout) HWIO (BN scale already folded).  Returns (3, in_width,
    n_pix*cout_pad): per-dy banded matrices mapping a lane-dense input row
    (pixel xi at lanes [xi*in_stride, xi*in_stride+cin)) to a lane-dense output
    row.  The dx taps and the W-direction zero padding are folded in."""
    w = np.asarray(w, np.float32)
    cin, cout = w.shape[2], w.shape[3]
    band = np.zeros((3, in_width, n_pix * cout_pad), np.float32)
    for dy in range(3):
        for dx in range(3):
            for xo in range(n_pix):
                xi = xo + dx - 1
                if 0 <= xi < n_pix:
                    band[dy,
                         xi * in_stride: xi * in_stride + cin,
                         xo * cout_pad: xo * cout_pad + cout] = w[dy, dx]
    return band


def _expand_1x1(w, n_pix, in_stride, in_width, cout_pad):
    """w: (cin, cout) 1x1 weight.  Block-diagonal lane-dense expansion."""
    w = np.asarray(w, np.float32)
    cin, cout = w.shape
    m = np.zeros((in_width, n_pix * cout_pad), np.float32)
    for x in range(n_pix):
        m[x * in_stride: x * in_stride + cin,
          x * cout_pad: x * cout_pad + cout] = w
    return m


def prepare_params(p1, p2, wl, bl, H=16, W=16):
    W2 = W // 2

    s1a, b1a = _fold_bn(p1['g1'], p1['b1'], p1['m1'], p1['v1'])
    s1b, b1b = _fold_bn(p1['g2'], p1['b2'], p1['m2'], p1['v2'])
    s1s, b1s = _fold_bn(p1['gs'], p1['bs'], p1['ms'], p1['vs'])
    s2a, b2a = _fold_bn(p2['g1'], p2['b1'], p2['m1'], p2['v1'])
    s2b, b2b = _fold_bn(p2['g2'], p2['b2'], p2['m2'], p2['v2'])
    s2s, b2s = _fold_bn(p2['gs'], p2['bs'], p2['ms'], p2['vs'])

    # BN scales folded into the weights (per output channel, last axis).
    w1a_f = np.asarray(p1['w1'], np.float32) * s1a            # (3,3,1,8)
    w1b_f = np.asarray(p1['w2'], np.float32) * s1b            # (3,3,8,8)
    w1s_f = np.asarray(p1['ws'], np.float32)[0, 0] * s1s      # (1,8)
    w2a_f = np.asarray(p2['w1'], np.float32) * s2a            # (3,3,8,24)
    w2b_f = np.asarray(p2['w2'], np.float32) * s2b            # (3,3,24,24)
    w2s_f = np.asarray(p2['ws'], np.float32)[0, 0] * s2s      # (8,24)

    # Banded / expanded lane-dense weights.  Block2 inputs come from the
    # *uncompacted* pooled map (pixel xi at lane group 2*xi -> stride 2*C1).
    w1a_band = _band3x3(w1a_f, W, 1, W, C1)                   # (3,  16, 128)
    w1b_band = _band3x3(w1b_f, W, C1, W * C1, C1)             # (3, 128, 128)
    w2a_band = _band3x3(w2a_f, W2, 2 * C1, W * C1, C2)        # (3, 128, 256)
    w2b_band = _band3x3(w2b_f, W2, C2, W2 * C2, C2)           # (3, 256, 256)
    w1s_m = _expand_1x1(w1s_f, W, 1, W, C1)                   # ( 16, 128)
    w2s_m = _expand_1x1(w2s_f, W2, 2 * C1, W * C1, C2)        # (128, 256)

    # Head: AdaptiveAvgPool(1,1) + Linear folded into one matrix consuming the
    # uncompacted pool2 output (pixel x at lane group 2*x, 24 real channels).
    wl_np = np.asarray(wl, np.float32)                        # (2, 24) torch layout
    bl_np = np.asarray(bl, np.float32)
    spatial = (H // 4) * (W // 4)
    hw = np.zeros((W2 * C2, HEAD_PAD), np.float32)            # (256, 128)
    for x in range(W2 // 2):
        hw[(2 * x) * C2: (2 * x) * C2 + C2_REAL, :NUM_CLASSES] = wl_np.T / spatial

    # All biases packed into one lane-dense (8, 256) array (fewer tiny DMAs).
    bias_pack = np.zeros((8, W2 * C2), np.float32)
    bias_pack[0, :W * C1] = np.tile(b1a, W)
    bias_pack[1, :W * C1] = np.tile(b1b + b1s, W)             # conv2 + shortcut bias
    bias_pack[2, :] = np.tile(np.pad(b2a, (0, C2 - C2_REAL)), W2)
    bias_pack[3, :] = np.tile(np.pad(b2b + b2s, (0, C2 - C2_REAL)), W2)
    bias_pack[4, :NUM_CLASSES] = bl_np

    return tuple(jnp.asarray(a, jnp.float32) for a in
                 (w1a_band, w1b_band, w1s_m,
                  w2a_band, w2b_band, w2s_m, hw, bias_pack))


# -----------------------------------------------------------------------------
# Parameter construction (deterministic, synthetic)
# -----------------------------------------------------------------------------
def make_resblock_params(key, cin, cout):
    ks = jax.random.split(key, 15)
    nrm = lambda k, s: 0.1 * jax.random.normal(k, s, jnp.float32)
    p = {}
    p['w1'] = nrm(ks[0], (3, 3, cin, cout))          # HWIO
    p['g1'] = 1.0 + nrm(ks[1], (cout,))
    p['b1'] = nrm(ks[2], (cout,))
    p['m1'] = nrm(ks[3], (cout,))
    p['v1'] = 1.0 + jnp.abs(nrm(ks[4], (cout,)))
    p['w2'] = nrm(ks[5], (3, 3, cout, cout))
    p['g2'] = 1.0 + nrm(ks[6], (cout,))
    p['b2'] = nrm(ks[7], (cout,))
    p['m2'] = nrm(ks[8], (cout,))
    p['v2'] = 1.0 + jnp.abs(nrm(ks[9], (cout,)))
    p['ws'] = nrm(ks[10], (1, 1, cin, cout))         # 1x1 shortcut conv
    p['gs'] = 1.0 + nrm(ks[11], (cout,))
    p['bs'] = nrm(ks[12], (cout,))
    p['ms'] = nrm(ks[13], (cout,))
    p['vs'] = 1.0 + jnp.abs(nrm(ks[14], (cout,)))
    return p


# -----------------------------------------------------------------------------
# Pure-JAX reference (for correctness check)
# -----------------------------------------------------------------------------
def cnn_forward_ref(x_nchw, p1, p2, wl, bl):
    def conv(x, w, padding):
        return jax.lax.conv_general_dilated(
            x, w, (1, 1), padding, dimension_numbers=('NHWC', 'HWIO', 'NHWC'))

    def bn(x, g, b, m, v):
        return g * (x - m) / jnp.sqrt(v + BN_EPS) + b

    def leaky(x):
        return jnp.where(x > 0, x, NEG_SLOPE * x)

    def resblock(x, p):
        idn = bn(conv(x, p['ws'], 'VALID'), p['gs'], p['bs'], p['ms'], p['vs'])
        out = leaky(bn(conv(x, p['w1'], 'SAME'), p['g1'], p['b1'], p['m1'], p['v1']))
        out = bn(conv(out, p['w2'], 'SAME'), p['g2'], p['b2'], p['m2'], p['v2'])
        return leaky(out + idn)

    def maxpool(x):
        N, H, W, C = x.shape
        return jnp.max(x.reshape(N, H // 2, 2, W // 2, 2, C), axis=(2, 4))

    x = jnp.transpose(x_nchw, (0, 2, 3, 1)).astype(jnp.float32)
    x = maxpool(resblock(x, p1))
    x = maxpool(resblock(x, p2))
    pooled = jnp.mean(x, axis=(1, 2))
    return pooled @ wl.T + bl


# -----------------------------------------------------------------------------
if __name__ == "__main__":
    key = jax.random.PRNGKey(0)
    kx, k1, k2, kw, kb = jax.random.split(key, 5)

    # input: batch=2, channels=1, spatial=16x16 (NCHW like the PyTorch module)
    x = jax.random.normal(kx, (2, 1, 16, 16), jnp.float32)

    p1 = make_resblock_params(k1, 1, 8)
    p2 = make_resblock_params(k2, 8, 24)
    wl = 0.1 * jax.random.normal(kw, (NUM_CLASSES, C2_REAL), jnp.float32)  # torch (out, in)
    bl = 0.1 * jax.random.normal(kb, (NUM_CLASSES,), jnp.float32)

    # One-time parameter preprocessing (hoisted out of the forward path).
    prep = prepare_params(p1, p2, wl, bl, H=16, W=16)
    prep = tuple(jax.block_until_ready(a) for a in prep)

    out = cnn_forward_pallas(x, prep)
    out = jax.block_until_ready(out)

    ref = cnn_forward_ref(x, p1, p2, wl, bl)
    assert out.shape == (2, NUM_CLASSES), out.shape
    assert jnp.allclose(out, ref, atol=2e-4, rtol=2e-4), (out, ref)

    print("KERNEL_OK")
</pallas_src>

<mosaic_0001>
module attributes {stable_mosaic.version = 11 : i64} {
  func.func @cnn_fused_kernel(%arg0: i32, %arg1: memref<2x16x16xf32, #tpu.memory_space<vmem>>, %arg2: memref<3x16x128xf32, #tpu.memory_space<vmem>>, %arg3: memref<3x128x128xf32, #tpu.memory_space<vmem>>, %arg4: memref<16x128xf32, #tpu.memory_space<vmem>>, %arg5: memref<3x128x256xf32, #tpu.memory_space<vmem>>, %arg6: memref<3x256x256xf32, #tpu.memory_space<vmem>>, %arg7: memref<128x256xf32, #tpu.memory_space<vmem>>, %arg8: memref<256x128xf32, #tpu.memory_space<vmem>>, %arg9: memref<8x256xf32, #tpu.memory_space<vmem>>, %arg10: memref<2x128xf32, #tpu.memory_space<vmem>>, %arg11: memref<2x18x16xf32, #tpu.memory_space<vmem>>, %arg12: memref<2x18x128xf32, #tpu.memory_space<vmem>>, %arg13: memref<2x10x128xf32, #tpu.memory_space<vmem>>, %arg14: memref<2x10x256xf32, #tpu.memory_space<vmem>>) attributes {dimension_semantics = [#tpu.dimension_semantics<parallel>], iteration_bounds = array<i64: 1>, scalar_prefetch = 0 : i64, scratch_operands = 4 : i64, tpu.core_type = #tpu.core_type<tc>, window_params = [{transform_indices = @transform_0, window_bounds = array<i64: 2, 16, 16>}, {pipeline_mode = #tpu.pipeline_mode<synchronous>, transform_indices = @transform_1, window_bounds = array<i64: 3, 16, 128>}, {pipeline_mode = #tpu.pipeline_mode<synchronous>, transform_indices = @transform_2, window_bounds = array<i64: 3, 128, 128>}, {pipeline_mode = #tpu.pipeline_mode<synchronous>, transform_indices = @transform_3, window_bounds = array<i64: 16, 128>}, {pipeline_mode = #tpu.pipeline_mode<synchronous>, transform_indices = @transform_4, window_bounds = array<i64: 3, 128, 256>}, {pipeline_mode = #tpu.pipeline_mode<synchronous>, transform_indices = @transform_5, window_bounds = array<i64: 3, 256, 256>}, {pipeline_mode = #tpu.pipeline_mode<synchronous>, transform_indices = @transform_6, window_bounds = array<i64: 128, 256>}, {pipeline_mode = #tpu.pipeline_mode<synchronous>, transform_indices = @transform_7, window_bounds = array<i64: 256, 128>}, {pipeline_mode = #tpu.pipeline_mode<synchronous>, transform_indices = @transform_8, window_bounds = array<i64: 8, 256>}, {transform_indices = @transform_9, window_bounds = array<i64: 2, 128>}]} {
    %cst = arith.constant 0.000000e+00 : f32
    %0 = vector.broadcast %cst : f32 to vector<2x1x16xf32>
    %c0 = arith.constant 0 : index
    %c0_0 = arith.constant 0 : index
    %c0_1 = arith.constant 0 : index
    %1 = vector.load %arg11[%c0, %c0_0, %c0_1] : memref<2x18x16xf32, #tpu.memory_space<vmem>>, vector<2x1x16xf32>
    tpu.vector_store %arg11[%c0, %c0_0, %c0_1], %0 {strides = array<i32>} : memref<2x18x16xf32, #tpu.memory_space<vmem>>, vector<2x1x16xf32>,
    %c0_2 = arith.constant 0 : index
    %c17 = arith.constant 17 : index
    %c0_3 = arith.constant 0 : index
    %2 = vector.load %arg11[%c0_2, %c17, %c0_3] : memref<2x18x16xf32, #tpu.memory_space<vmem>>, vector<2x1x16xf32>
    tpu.vector_store %arg11[%c0_2, %c17, %c0_3], %0 {strides = array<i32>} : memref<2x18x16xf32, #tpu.memory_space<vmem>>, vector<2x1x16xf32>,
    %cst_4 = arith.constant 0.000000e+00 : f32
    %3 = vector.broadcast %cst_4 : f32 to vector<2x1x128xf32>
    %c0_5 = arith.constant 0 : index
    %c0_6 = arith.constant 0 : index
    %c0_7 = arith.constant 0 : index
    %4 = vector.load %arg12[%c0_5, %c0_6, %c0_7] : memref<2x18x128xf32, #tpu.memory_space<vmem>>, vector<2x1x128xf32>
    tpu.vector_store %arg12[%c0_5, %c0_6, %c0_7], %3 {strides = array<i32>} : memref<2x18x128xf32, #tpu.memory_space<vmem>>, vector<2x1x128xf32>,
    %c0_8 = arith.constant 0 : index
    %c17_9 = arith.constant 17 : index
    %c0_10 = arith.constant 0 : index
    %5 = vector.load %arg12[%c0_8, %c17_9, %c0_10] : memref<2x18x128xf32, #tpu.memory_space<vmem>>, vector<2x1x128xf32>
    tpu.vector_store %arg12[%c0_8, %c17_9, %c0_10], %3 {strides = array<i32>} : memref<2x18x128xf32, #tpu.memory_space<vmem>>, vector<2x1x128xf32>,
    %cst_11 = arith.constant 0.000000e+00 : f32
    %6 = vector.broadcast %cst_11 : f32 to vector<2x1x128xf32>
    %c0_12 = arith.constant 0 : index
    %c0_13 = arith.constant 0 : index
    %c0_14 = arith.constant 0 : index
    %7 = vector.load %arg13[%c0_12, %c0_13, %c0_14] : memref<2x10x128xf32, #tpu.memory_space<vmem>>, vector<2x1x128xf32>
    tpu.vector_store %arg13[%c0_12, %c0_13, %c0_14], %6 {strides = array<i32>} : memref<2x10x128xf32, #tpu.memory_space<vmem>>, vector<2x1x128xf32>,
    %c0_15 = arith.constant 0 : index
    %c9 = arith.constant 9 : index
    %c0_16 = arith.constant 0 : index
    %8 = vector.load %arg13[%c0_15, %c9, %c0_16] : memref<2x10x128xf32, #tpu.memory_space<vmem>>, vector<2x1x128xf32>
    tpu.vector_store %arg13[%c0_15, %c9, %c0_16], %6 {strides = array<i32>} : memref<2x10x128xf32, #tpu.memory_space<vmem>>, vector<2x1x128xf32>,
    %cst_17 = arith.constant 0.000000e+00 : f32
    %9 = vector.broadcast %cst_17 : f32 to vector<2x1x256xf32>
    %c0_18 = arith.constant 0 : index
    %c0_19 = arith.constant 0 : index
    %c0_20 = arith.constant 0 : index
    %10 = vector.load %arg14[%c0_18, %c0_19, %c0_20] : memref<2x10x256xf32, #tpu.memory_space<vmem>>, vector<2x1x256xf32>
    tpu.vector_store %arg14[%c0_18, %c0_19, %c0_20], %9 {strides = array<i32>} : memref<2x10x256xf32, #tpu.memory_space<vmem>>, vector<2x1x256xf32>,
    %c0_21 = arith.constant 0 : index
    %c9_22 = arith.constant 9 : index
    %c0_23 = arith.constant 0 : index
    %11 = vector.load %arg14[%c0_21, %c9_22, %c0_23] : memref<2x10x256xf32, #tpu.memory_space<vmem>>, vector<2x1x256xf32>
    tpu.vector_store %arg14[%c0_21, %c9_22, %c0_23], %9 {strides = array<i32>} : memref<2x10x256xf32, #tpu.memory_space<vmem>>, vector<2x1x256xf32>,
    %c0_24 = arith.constant 0 : index
    %c0_25 = arith.constant 0 : index
    %c0_26 = arith.constant 0 : index
    %12 = vector.load %arg1[%c0_24, %c0_25, %c0_26] : memref<2x16x16xf32, #tpu.memory_space<vmem>>, vector<2x16x16xf32>
    %c0_27 = arith.constant 0 : index
    %c0_28 = arith.constant 0 : index
    %13 = vector.load %arg9[%c0_27, %c0_28] : memref<8x256xf32, #tpu.memory_space<vmem>>, vector<8x256xf32>
    %14 = vector.extract_strided_slice %13 {offsets = [0, 0], sizes = [1, 128], strides = [1, 1]} : vector<8x256xf32> to vector<1x128xf32>
    %15 = vector.shape_cast %14 : vector<1x128xf32> to vector<128xf32>
    %16 = vector.extract_strided_slice %13 {offsets = [1, 0], sizes = [1, 128], strides = [1, 1]} : vector<8x256xf32> to vector<1x128xf32>
    %17 = vector.shape_cast %16 : vector<1x128xf32> to vector<128xf32>
    %18 = vector.extract_strided_slice %13 {offsets = [2, 0], sizes = [1, 256], strides = [1, 1]} : vector<8x256xf32> to vector<1x256xf32>
    %19 = vector.shape_cast %18 : vector<1x256xf32> to vector<256xf32>
    %20 = vector.extract_strided_slice %13 {offsets = [3, 0], sizes = [1, 256], strides = [1, 1]} : vector<8x256xf32> to vector<1x256xf32>
    %21 = vector.shape_cast %20 : vector<1x256xf32> to vector<256xf32>
    %22 = vector.extract_strided_slice %13 {offsets = [4, 0], sizes = [1, 128], strides = [1, 1]} : vector<8x256xf32> to vector<1x128xf32>
    %23 = vector.shape_cast %22 : vector<1x128xf32> to vector<128xf32>
    %c0_29 = arith.constant 0 : index
    %c1 = arith.constant 1 : index
    %c0_30 = arith.constant 0 : index
    %24 = vector.load %arg11[%c0_29, %c1, %c0_30] : memref<2x18x16xf32, #tpu.memory_space<vmem>>, vector<2x16x16xf32>
    tpu.vector_store %arg11[%c0_29, %c1, %c0_30], %12 {strides = array<i32>} : memref<2x18x16xf32, #tpu.memory_space<vmem>>, vector<2x16x16xf32>,
    %25 = vector.shape_cast %15 : vector<128xf32> to vector<1x128xf32>
    %26 = vector.shape_cast %25 : vector<1x128xf32> to vector<1x128xf32>
    %27 = vector.broadcast %26 : vector<1x128xf32> to vector<32x128xf32>
    %c0_31 = arith.constant 0 : index
    %c0_32 = arith.constant 0 : index
    %c0_33 = arith.constant 0 : index
    %28 = vector.load %arg11[%c0_31, %c0_32, %c0_33] : memref<2x18x16xf32, #tpu.memory_space<vmem>>, vector<2x16x16xf32>
    %29 = vector.shape_cast %28 : vector<2x16x16xf32> to vector<32x16xf32>
    %c0_34 = arith.constant 0 : index
    %c0_35 = arith.constant 0 : index
    %c0_36 = arith.constant 0 : index
    %30 = vector.load %arg2[%c0_34, %c0_35, %c0_36] : memref<3x16x128xf32, #tpu.memory_space<vmem>>, vector<1x16x128xf32>
    %31 = vector.shape_cast %30 : vector<1x16x128xf32> to vector<16x128xf32>
    %cst_37 = arith.constant dense<0.000000e+00> : vector<32x128xf32>
    %32 = tpu.matmul %29, %31, %cst_37 {dimension_numbers = #tpu.dot_dimension_numbers<[1], [0], [0], [1], [0, 0, 1, 1], [], []>} : vector<32x16xf32>, vector<16x128xf32>, vector<32x128xf32> -> vector<32x128xf32>
    %33 = arith.addf %27, %32 : vector<32x128xf32>
    %c0_38 = arith.constant 0 : index
    %c1_39 = arith.constant 1 : index
    %c0_40 = arith.constant 0 : index
    %34 = vector.load %arg11[%c0_38, %c1_39, %c0_40] : memref<2x18x16xf32, #tpu.memory_space<vmem>>, vector<2x16x16xf32>
    %35 = vector.shape_cast %34 : vector<2x16x16xf32> to vector<32x16xf32>
    %c1_41 = arith.constant 1 : index
    %c0_42 = arith.constant 0 : index
    %c0_43 = arith.constant 0 : index
    %36 = vector.load %arg2[%c1_41, %c0_42, %c0_43] : memref<3x16x128xf32, #tpu.memory_space<vmem>>, vector<1x16x128xf32>
    %37 = vector.shape_cast %36 : vector<1x16x128xf32> to vector<16x128xf32>
    %cst_44 = arith.constant dense<0.000000e+00> : vector<32x128xf32>
    %38 = tpu.matmul %35, %37, %cst_44 {dimension_numbers = #tpu.dot_dimension_numbers<[1], [0], [0], [1], [0, 0, 1, 1], [], []>} : vector<32x16xf32>, vector<16x128xf32>, vector<32x128xf32> -> vector<32x128xf32>
    %39 = arith.addf %33, %38 : vector<32x128xf32>
    %c0_45 = arith.constant 0 : index
    %c2 = arith.constant 2 : index
    %c0_46 = arith.constant 0 : index
    %40 = vector.load %arg11[%c0_45, %c2, %c0_46] : memref<2x18x16xf32, #tpu.memory_space<vmem>>, vector<2x16x16xf32>
    %41 = vector.shape_cast %40 : vector<2x16x16xf32> to vector<32x16xf32>
    %c2_47 = arith.constant 2 : index
    %c0_48 = arith.constant 0 : index
    %c0_49 = arith.constant 0 : index
    %42 = vector.load %arg2[%c2_47, %c0_48, %c0_49] : memref<3x16x128xf32, #tpu.memory_space<vmem>>, vector<1x16x128xf32>
    %43 = vector.shape_cast %42 : vector<1x16x128xf32> to vector<16x128xf32>
    %cst_50 = arith.constant dense<0.000000e+00> : vector<32x128xf32>
    %44 = tpu.matmul %41, %43, %cst_50 {dimension_numbers = #tpu.dot_dimension_numbers<[1], [0], [0], [1], [0, 0, 1, 1], [], []>} : vector<32x16xf32>, vector<16x128xf32>, vector<32x128xf32> -> vector<32x128xf32>
    %45 = arith.addf %39, %44 : vector<32x128xf32>
    %cst_51 = arith.constant 0.000000e+00 : f32
    %46 = vector.broadcast %cst_51 : f32 to vector<32x128xf32>
    %47 = arith.cmpf ogt, %45, %46 : vector<32x128xf32>
    %cst_52 = arith.constant 0.00999999977 : f32
    %48 = vector.broadcast %cst_52 : f32 to vector<32x128xf32>
    %49 = arith.mulf %48, %45 : vector<32x128xf32>
    %50 = arith.select %47, %45, %49 : vector<32x128xi1>, vector<32x128xf32>
    %51 = vector.shape_cast %50 : vector<32x128xf32> to vector<2x16x128xf32>
    %c0_53 = arith.constant 0 : index
    %c1_54 = arith.constant 1 : index
    %c0_55 = arith.constant 0 : index
    %52 = vector.load %arg12[%c0_53, %c1_54, %c0_55] : memref<2x18x128xf32, #tpu.memory_space<vmem>>, vector<2x16x128xf32>
    tpu.vector_store %arg12[%c0_53, %c1_54, %c0_55], %51 {strides = array<i32>} : memref<2x18x128xf32, #tpu.memory_space<vmem>>, vector<2x16x128xf32>,
    %53 = vector.shape_cast %17 : vector<128xf32> to vector<1x128xf32>
    %54 = vector.shape_cast %53 : vector<1x128xf32> to vector<1x128xf32>
    %55 = vector.broadcast %54 : vector<1x128xf32> to vector<32x128xf32>
    %c0_56 = arith.constant 0 : index
    %c0_57 = arith.constant 0 : index
    %c0_58 = arith.constant 0 : index
    %56 = vector.load %arg12[%c0_56, %c0_57, %c0_58] : memref<2x18x128xf32, #tpu.memory_space<vmem>>, vector<2x16x128xf32>
    %57 = vector.shape_cast %56 : vector<2x16x128xf32> to vector<32x128xf32>
    %c0_59 = arith.constant 0 : index
    %c0_60 = arith.constant 0 : index
    %c0_61 = arith.constant 0 : index
    %58 = vector.load %arg3[%c0_59, %c0_60, %c0_61] : memref<3x128x128xf32, #tpu.memory_space<vmem>>, vector<1x128x128xf32>
    %59 = vector.shape_cast %58 : vector<1x128x128xf32> to vector<128x128xf32>
    %cst_62 = arith.constant dense<0.000000e+00> : vector<32x128xf32>
    %60 = tpu.matmul %57, %59, %cst_62 {dimension_numbers = #tpu.dot_dimension_numbers<[1], [0], [0], [1], [0, 0, 1, 1], [], []>} : vector<32x128xf32>, vector<128x128xf32>, vector<32x128xf32> -> vector<32x128xf32>
    %61 = arith.addf %55, %60 : vector<32x128xf32>
    %c0_63 = arith.constant 0 : index
    %c1_64 = arith.constant 1 : index
    %c0_65 = arith.constant 0 : index
    %62 = vector.load %arg12[%c0_63, %c1_64, %c0_65] : memref<2x18x128xf32, #tpu.memory_space<vmem>>, vector<2x16x128xf32>
    %63 = vector.shape_cast %62 : vector<2x16x128xf32> to vector<32x128xf32>
    %c1_66 = arith.constant 1 : index
    %c0_67 = arith.constant 0 : index
    %c0_68 = arith.constant 0 : index
    %64 = vector.load %arg3[%c1_66, %c0_67, %c0_68] : memref<3x128x128xf32, #tpu.memory_space<vmem>>, vector<1x128x128xf32>
    %65 = vector.shape_cast %64 : vector<1x128x128xf32> to vector<128x128xf32>
    %cst_69 = arith.constant dense<0.000000e+00> : vector<32x128xf32>
    %66 = tpu.matmul %63, %65, %cst_69 {dimension_numbers = #tpu.dot_dimension_numbers<[1], [0], [0], [1], [0, 0, 1, 1], [], []>} : vector<32x128xf32>, vector<128x128xf32>, vector<32x128xf32> -> vector<32x128xf32>
    %67 = arith.addf %61, %66 : vector<32x128xf32>
    %c0_70 = arith.constant 0 : index
    %c2_71 = arith.constant 2 : index
    %c0_72 = arith.constant 0 : index
    %68 = vector.load %arg12[%c0_70, %c2_71, %c0_72] : memref<2x18x128xf32, #tpu.memory_space<vmem>>, vector<2x16x128xf32>
    %69 = vector.shape_cast %68 : vector<2x16x128xf32> to vector<32x128xf32>
    %c2_73 = arith.constant 2 : index
    %c0_74 = arith.constant 0 : index
    %c0_75 = arith.constant 0 : index
    %70 = vector.load %arg3[%c2_73, %c0_74, %c0_75] : memref<3x128x128xf32, #tpu.memory_space<vmem>>, vector<1x128x128xf32>
    %71 = vector.shape_cast %70 : vector<1x128x128xf32> to vector<128x128xf32>
    %cst_76 = arith.constant dense<0.000000e+00> : vector<32x128xf32>
    %72 = tpu.matmul %69, %71, %cst_76 {dimension_numbers = #tpu.dot_dimension_numbers<[1], [0], [0], [1], [0, 0, 1, 1], [], []>} : vector<32x128xf32>, vector<128x128xf32>, vector<32x128xf32> -> vector<32x128xf32>
    %73 = arith.addf %67, %72 : vector<32x128xf32>
    %74 = vector.shape_cast %12 : vector<2x16x16xf32> to vector<32x16xf32>
    %c0_77 = arith.constant 0 : index
    %c0_78 = arith.constant 0 : index
    %75 = vector.load %arg4[%c0_77, %c0_78] : memref<16x128xf32, #tpu.memory_space<vmem>>, vector<16x128xf32>
    %cst_79 = arith.constant dense<0.000000e+00> : vector<32x128xf32>
    %76 = tpu.matmul %74, %75, %cst_79 {dimension_numbers = #tpu.dot_dimension_numbers<[1], [0], [0], [1], [0, 0, 1, 1], [], []>} : vector<32x16xf32>, vector<16x128xf32>, vector<32x128xf32> -> vector<32x128xf32>
    %77 = arith.addf %73, %76 : vector<32x128xf32>
    %cst_80 = arith.constant 0.000000e+00 : f32
    %78 = vector.broadcast %cst_80 : f32 to vector<32x128xf32>
    %79 = arith.cmpf ogt, %77, %78 : vector<32x128xf32>
    %cst_81 = arith.constant 0.00999999977 : f32
    %80 = vector.broadcast %cst_81 : f32 to vector<32x128xf32>
    %81 = arith.mulf %80, %77 : vector<32x128xf32>
    %82 = arith.select %79, %77, %81 : vector<32x128xi1>, vector<32x128xf32>
    %83 = tpu.iota {dimensions = array<i32: 0>} : vector<16x32xi32>
    %84 = tpu.iota {dimensions = array<i32: 1>} : vector<16x32xi32>
    %c2_i32 = arith.constant 2 : i32
    %85 = vector.broadcast %c2_i32 : i32 to vector<16x32xi32>
    %86 = arith.muli %85, %83 : vector<16x32xi32>
    %c0_i32 = arith.constant 0 : i32
    %87 = vector.broadcast %c0_i32 : i32 to vector<16x32xi32>
    %88 = arith.addi %86, %87 : vector<16x32xi32>
    %89 = arith.cmpi eq, %84, %88 : vector<16x32xi32>
    %90 = arith.extui %89 : vector<16x32xi1> to vector<16x32xi32>
    %91 = arith.sitofp %90 : vector<16x32xi32> to vector<16x32xf32>
    %cst_82 = arith.constant dense<0.000000e+00> : vector<16x128xf32>
    %92 = tpu.matmul %91, %82, %cst_82 {dimension_numbers = #tpu.dot_dimension_numbers<[1], [0], [0], [1], [0, 0, 1, 1], [], []>} : vector<16x32xf32>, vector<32x128xf32>, vector<16x128xf32> -> vector<16x128xf32>
    %93 = tpu.iota {dimensions = array<i32: 0>} : vector<16x32xi32>
    %94 = tpu.iota {dimensions = array<i32: 1>} : vector<16x32xi32>
    %c2_i32_83 = arith.constant 2 : i32
    %95 = vector.broadcast %c2_i32_83 : i32 to vector<16x32xi32>
    %96 = arith.muli %95, %93 : vector<16x32xi32>
    %c1_i32 = arith.constant 1 : i32
    %97 = vector.broadcast %c1_i32 : i32 to vector<16x32xi32>
    %98 = arith.addi %96, %97 : vector<16x32xi32>
    %99 = arith.cmpi eq, %94, %98 : vector<16x32xi32>
    %100 = arith.extui %99 : vector<16x32xi1> to vector<16x32xi32>
    %101 = arith.sitofp %100 : vector<16x32xi32> to vector<16x32xf32>
    %cst_84 = arith.constant dense<0.000000e+00> : vector<16x128xf32>
    %102 = tpu.matmul %101, %82, %cst_84 {dimension_numbers = #tpu.dot_dimension_numbers<[1], [0], [0], [1], [0, 0, 1, 1], [], []>} : vector<16x32xf32>, vector<32x128xf32>, vector<16x128xf32> -> vector<16x128xf32>
    %103 = arith.maximumf %92, %102 : vector<16x128xf32>
    %104 = tpu.iota {dimensions = array<i32: 0>} : vector<128x128xi32>
    %105 = tpu.iota {dimensions = array<i32: 1>} : vector<128x128xi32>
    %c8_i32 = arith.constant 8 : i32
    %106 = vector.broadcast %c8_i32 : i32 to vector<128x128xi32>
    %107 = arith.addi %105, %106 : vector<128x128xi32>
    %108 = arith.cmpi eq, %104, %107 : vector<128x128xi32>
    %109 = arith.extui %108 : vector<128x128xi1> to vector<128x128xi32>
    %110 = arith.sitofp %109 : vector<128x128xi32> to vector<128x128xf32>
    %cst_85 = arith.constant dense<0.000000e+00> : vector<16x128xf32>
    %111 = tpu.matmul %103, %110, %cst_85 {dimension_numbers = #tpu.dot_dimension_numbers<[1], [0], [0], [1], [0, 0, 1, 1], [], []>} : vector<16x128xf32>, vector<128x128xf32>, vector<16x128xf32> -> vector<16x128xf32>
    %112 = arith.maximumf %103, %111 : vector<16x128xf32>
    %113 = vector.shape_cast %112 : vector<16x128xf32> to vector<2x8x128xf32>
    %c0_86 = arith.constant 0 : index
    %c1_87 = arith.constant 1 : index
    %c0_88 = arith.constant 0 : index
    %114 = vector.load %arg13[%c0_86, %c1_87, %c0_88] : memref<2x10x128xf32, #tpu.memory_space<vmem>>, vector<2x8x128xf32>
    tpu.vector_store %arg13[%c0_86, %c1_87, %c0_88], %113 {strides = array<i32>} : memref<2x10x128xf32, #tpu.memory_space<vmem>>, vector<2x8x128xf32>,
    %115 = vector.shape_cast %19 : vector<256xf32> to vector<1x256xf32>
    %116 = vector.shape_cast %115 : vector<1x256xf32> to vector<1x256xf32>
    %117 = vector.broadcast %116 : vector<1x256xf32> to vector<16x256xf32>
    %c0_89 = arith.constant 0 : index
    %c0_90 = arith.constant 0 : index
    %c0_91 = arith.constant 0 : index
    %118 = vector.load %arg13[%c0_89, %c0_90, %c0_91] : memref<2x10x128xf32, #tpu.memory_space<vmem>>, vector<2x8x128xf32>
    %119 = vector.shape_cast %118 : vector<2x8x128xf32> to vector<16x128xf32>
    %c0_92 = arith.constant 0 : index
    %c0_93 = arith.constant 0 : index
    %c0_94 = arith.constant 0 : index
    %120 = vector.load %arg5[%c0_92, %c0_93, %c0_94] : memref<3x128x256xf32, #tpu.memory_space<vmem>>, vector<1x128x256xf32>
    %121 = vector.shape_cast %120 : vector<1x128x256xf32> to vector<128x256xf32>
    %cst_95 = arith.constant dense<0.000000e+00> : vector<16x256xf32>
    %122 = tpu.matmul %119, %121, %cst_95 {dimension_numbers = #tpu.dot_dimension_numbers<[1], [0], [0], [1], [0, 0, 1, 1], [], []>} : vector<16x128xf32>, vector<128x256xf32>, vector<16x256xf32> -> vector<16x256xf32>
    %123 = arith.addf %117, %122 : vector<16x256xf32>
    %c0_96 = arith.constant 0 : index
    %c1_97 = arith.constant 1 : index
    %c0_98 = arith.constant 0 : index
    %124 = vector.load %arg13[%c0_96, %c1_97, %c0_98] : memref<2x10x128xf32, #tpu.memory_space<vmem>>, vector<2x8x128xf32>
    %125 = vector.shape_cast %124 : vector<2x8x128xf32> to vector<16x128xf32>
    %c1_99 = arith.constant 1 : index
    %c0_100 = arith.constant 0 : index
    %c0_101 = arith.constant 0 : index
    %126 = vector.load %arg5[%c1_99, %c0_100, %c0_101] : memref<3x128x256xf32, #tpu.memory_space<vmem>>, vector<1x128x256xf32>
    %127 = vector.shape_cast %126 : vector<1x128x256xf32> to vector<128x256xf32>
    %cst_102 = arith.constant dense<0.000000e+00> : vector<16x256xf32>
    %128 = tpu.matmul %125, %127, %cst_102 {dimension_numbers = #tpu.dot_dimension_numbers<[1], [0], [0], [1], [0, 0, 1, 1], [], []>} : vector<16x128xf32>, vector<128x256xf32>, vector<16x256xf32> -> vector<16x256xf32>
    %129 = arith.addf %123, %128 : vector<16x256xf32>
    %c0_103 = arith.constant 0 : index
    %c2_104 = arith.constant 2 : index
    %c0_105 = arith.constant 0 : index
    %130 = vector.load %arg13[%c0_103, %c2_104, %c0_105] : memref<2x10x128xf32, #tpu.memory_space<vmem>>, vector<2x8x128xf32>
    %131 = vector.shape_cast %130 : vector<2x8x128xf32> to vector<16x128xf32>
    %c2_106 = arith.constant 2 : index
    %c0_107 = arith.constant 0 : index
    %c0_108 = arith.constant 0 : index
    %132 = vector.load %arg5[%c2_106, %c0_107, %c0_108] : memref<3x128x256xf32, #tpu.memory_space<vmem>>, vector<1x128x256xf32>
    %133 = vector.shape_cast %132 : vector<1x128x256xf32> to vector<128x256xf32>
    %cst_109 = arith.constant dense<0.000000e+00> : vector<16x256xf32>
    %134 = tpu.matmul %131, %133, %cst_109 {dimension_numbers = #tpu.dot_dimension_numbers<[1], [0], [0], [1], [0, 0, 1, 1], [], []>} : vector<16x128xf32>, vector<128x256xf32>, vector<16x256xf32> -> vector<16x256xf32>
    %135 = arith.addf %129, %134 : vector<16x256xf32>
    %cst_110 = arith.constant 0.000000e+00 : f32
    %136 = vector.broadcast %cst_110 : f32 to vector<16x256xf32>
    %137 = arith.cmpf ogt, %135, %136 : vector<16x256xf32>
    %cst_111 = arith.constant 0.00999999977 : f32
    %138 = vector.broadcast %cst_111 : f32 to vector<16x256xf32>
    %139 = arith.mulf %138, %135 : vector<16x256xf32>
    %140 = arith.select %137, %135, %139 : vector<16x256xi1>, vector<16x256xf32>
    %141 = vector.shape_cast %140 : vector<16x256xf32> to vector<2x8x256xf32>
    %c0_112 = arith.constant 0 : index
    %c1_113 = arith.constant 1 : index
    %c0_114 = arith.constant 0 : index
    %142 = vector.load %arg14[%c0_112, %c1_113, %c0_114] : memref<2x10x256xf32, #tpu.memory_space<vmem>>, vector<2x8x256xf32>
    tpu.vector_store %arg14[%c0_112, %c1_113, %c0_114], %141 {strides = array<i32>} : memref<2x10x256xf32, #tpu.memory_space<vmem>>, vector<2x8x256xf32>,
    %143 = vector.shape_cast %21 : vector<256xf32> to vector<1x256xf32>
    %144 = vector.shape_cast %143 : vector<1x256xf32> to vector<1x256xf32>
    %145 = vector.broadcast %144 : vector<1x256xf32> to vector<16x256xf32>
    %c0_115 = arith.constant 0 : index
    %c0_116 = arith.constant 0 : index
    %c0_117 = arith.constant 0 : index
    %146 = vector.load %arg14[%c0_115, %c0_116, %c0_117] : memref<2x10x256xf32, #tpu.memory_space<vmem>>, vector<2x8x256xf32>
    %147 = vector.shape_cast %146 : vector<2x8x256xf32> to vector<16x256xf32>
    %c0_118 = arith.constant 0 : index
    %c0_119 = arith.constant 0 : index
    %c0_120 = arith.constant 0 : index
    %148 = vector.load %arg6[%c0_118, %c0_119, %c0_120] : memref<3x256x256xf32, #tpu.memory_space<vmem>>, vector<1x256x256xf32>
    %149 = vector.shape_cast %148 : vector<1x256x256xf32> to vector<256x256xf32>
    %cst_121 = arith.constant dense<0.000000e+00> : vector<16x256xf32>
    %150 = tpu.matmul %147, %149, %cst_121 {dimension_numbers = #tpu.dot_dimension_numbers<[1], [0], [0], [1], [0, 0, 1, 1], [], []>} : vector<16x256xf32>, vector<256x256xf32>, vector<16x256xf32> -> vector<16x256xf32>
    %151 = arith.addf %145, %150 : vector<16x256xf32>
    %c0_122 = arith.constant 0 : index
    %c1_123 = arith.constant 1 : index
    %c0_124 = arith.constant 0 : index
    %152 = vector.load %arg14[%c0_122, %c1_123, %c0_124] : memref<2x10x256xf32, #tpu.memory_space<vmem>>, vector<2x8x256xf32>
    %153 = vector.shape_cast %152 : vector<2x8x256xf32> to vector<16x256xf32>
    %c1_125 = arith.constant 1 : index
    %c0_126 = arith.constant 0 : index
    %c0_127 = arith.constant 0 : index
    %154 = vector.load %arg6[%c1_125, %c0_126, %c0_127] : memref<3x256x256xf32, #tpu.memory_space<vmem>>, vector<1x256x256xf32>
    %155 = vector.shape_cast %154 : vector<1x256x256xf32> to vector<256x256xf32>
    %cst_128 = arith.constant dense<0.000000e+00> : vector<16x256xf32>
    %156 = tpu.matmul %153, %155, %cst_128 {dimension_numbers = #tpu.dot_dimension_numbers<[1], [0], [0], [1], [0, 0, 1, 1], [], []>} : vector<16x256xf32>, vector<256x256xf32>, vector<16x256xf32> -> vector<16x256xf32>
    %157 = arith.addf %151, %156 : vector<16x256xf32>
    %c0_129 = arith.constant 0 : index
    %c2_130 = arith.constant 2 : index
    %c0_131 = arith.constant 0 : index
    %158 = vector.load %arg14[%c0_129, %c2_130, %c0_131] : memref<2x10x256xf32, #tpu.memory_space<vmem>>, vector<2x8x256xf32>
    %159 = vector.shape_cast %158 : vector<2x8x256xf32> to vector<16x256xf32>
    %c2_132 = arith.constant 2 : index
    %c0_133 = arith.constant 0 : index
    %c0_134 = arith.constant 0 : index
    %160 = vector.load %arg6[%c2_132, %c0_133, %c0_134] : memref<3x256x256xf32, #tpu.memory_space<vmem>>, vector<1x256x256xf32>
    %161 = vector.shape_cast %160 : vector<1x256x256xf32> to vector<256x256xf32>
    %cst_135 = arith.constant dense<0.000000e+00> : vector<16x256xf32>
    %162 = tpu.matmul %159, %161, %cst_135 {dimension_numbers = #tpu.dot_dimension_numbers<[1], [0], [0], [1], [0, 0, 1, 1], [], []>} : vector<16x256xf32>, vector<256x256xf32>, vector<16x256xf32> -> vector<16x256xf32>
    %163 = arith.addf %157, %162 : vector<16x256xf32>
    %c0_136 = arith.constant 0 : index
    %c0_137 = arith.constant 0 : index
    %164 = vector.load %arg7[%c0_136, %c0_137] : memref<128x256xf32, #tpu.memory_space<vmem>>, vector<128x256xf32>
    %cst_138 = arith.constant dense<0.000000e+00> : vector<16x256xf32>
    %165 = tpu.matmul %112, %164, %cst_138 {dimension_numbers = #tpu.dot_dimension_numbers<[1], [0], [0], [1], [0, 0, 1, 1], [], []>} : vector<16x128xf32>, vector<128x256xf32>, vector<16x256xf32> -> vector<16x256xf32>
    %166 = arith.addf %163, %165 : vector<16x256xf32>
    %cst_139 = arith.constant 0.000000e+00 : f32
    %167 = vector.broadcast %cst_139 : f32 to vector<16x256xf32>
    %168 = arith.cmpf ogt, %166, %167 : vector<16x256xf32>
    %cst_140 = arith.constant 0.00999999977 : f32
    %169 = vector.broadcast %cst_140 : f32 to vector<16x256xf32>
    %170 = arith.mulf %169, %166 : vector<16x256xf32>
    %171 = arith.select %168, %166, %170 : vector<16x256xi1>, vector<16x256xf32>
    %172 = tpu.iota {dimensions = array<i32: 0>} : vector<8x16xi32>
    %173 = tpu.iota {dimensions = array<i32: 1>} : vector<8x16xi32>
    %c2_i32_141 = arith.constant 2 : i32
    %174 = vector.broadcast %c2_i32_141 : i32 to vector<8x16xi32>
    %175 = arith.muli %174, %172 : vector<8x16xi32>
    %c0_i32_142 = arith.constant 0 : i32
    %176 = vector.broadcast %c0_i32_142 : i32 to vector<8x16xi32>
    %177 = arith.addi %175, %176 : vector<8x16xi32>
    %178 = arith.cmpi eq, %173, %177 : vector<8x16xi32>
    %179 = arith.extui %178 : vector<8x16xi1> to vector<8x16xi32>
    %180 = arith.sitofp %179 : vector<8x16xi32> to vector<8x16xf32>
    %cst_143 = arith.constant dense<0.000000e+00> : vector<8x256xf32>
    %181 = tpu.matmul %180, %171, %cst_143 {dimension_numbers = #tpu.dot_dimension_numbers<[1], [0], [0], [1], [0, 0, 1, 1], [], []>} : vector<8x16xf32>, vector<16x256xf32>, vector<8x256xf32> -> vector<8x256xf32>
    %182 = tpu.iota {dimensions = array<i32: 0>} : vector<8x16xi32>
    %183 = tpu.iota {dimensions = array<i32: 1>} : vector<8x16xi32>
    %c2_i32_144 = arith.constant 2 : i32
    %184 = vector.broadcast %c2_i32_144 : i32 to vector<8x16xi32>
    %185 = arith.muli %184, %182 : vector<8x16xi32>
    %c1_i32_145 = arith.constant 1 : i32
    %186 = vector.broadcast %c1_i32_145 : i32 to vector<8x16xi32>
    %187 = arith.addi %185, %186 : vector<8x16xi32>
    %188 = arith.cmpi eq, %183, %187 : vector<8x16xi32>
    %189 = arith.extui %188 : vector<8x16xi1> to vector<8x16xi32>
    %190 = arith.sitofp %189 : vector<8x16xi32> to vector<8x16xf32>
    %cst_146 = arith.constant dense<0.000000e+00> : vector<8x256xf32>
    %191 = tpu.matmul %190, %171, %cst_146 {dimension_numbers = #tpu.dot_dimension_numbers<[1], [0], [0], [1], [0, 0, 1, 1], [], []>} : vector<8x16xf32>, vector<16x256xf32>, vector<8x256xf32> -> vector<8x256xf32>
    %192 = arith.maximumf %181, %191 : vector<8x256xf32>
    %193 = tpu.iota {dimensions = array<i32: 0>} : vector<256x256xi32>
    %194 = tpu.iota {dimensions = array<i32: 1>} : vector<256x256xi32>
    %c32_i32 = arith.constant 32 : i32
    %195 = vector.broadcast %c32_i32 : i32 to vector<256x256xi32>
    %196 = arith.addi %194, %195 : vector<256x256xi32>
    %197 = arith.cmpi eq, %193, %196 : vector<256x256xi32>
    %198 = arith.extui %197 : vector<256x256xi1> to vector<256x256xi32>
    %199 = arith.sitofp %198 : vector<256x256xi32> to vector<256x256xf32>
    %cst_147 = arith.constant dense<0.000000e+00> : vector<8x256xf32>
    %200 = tpu.matmul %192, %199, %cst_147 {dimension_numbers = #tpu.dot_dimension_numbers<[1], [0], [0], [1], [0, 0, 1, 1], [], []>} : vector<8x256xf32>, vector<256x256xf32>, vector<8x256xf32> -> vector<8x256xf32>
    %201 = arith.maximumf %192, %200 : vector<8x256xf32>
    %c0_148 = arith.constant 0 : index
    %c0_149 = arith.constant 0 : index
    %202 = vector.load %arg8[%c0_148, %c0_149] : memref<256x128xf32, #tpu.memory_space<vmem>>, vector<256x128xf32>
    %cst_150 = arith.constant dense<0.000000e+00> : vector<8x128xf32>
    %203 = tpu.matmul %201, %202, %cst_150 {dimension_numbers = #tpu.dot_dimension_numbers<[1], [0], [0], [1], [0, 0, 1, 1], [], []>} : vector<8x256xf32>, vector<256x128xf32>, vector<8x128xf32> -> vector<8x128xf32>
    %204 = vector.shape_cast %203 : vector<8x128xf32> to vector<2x4x128xf32>
    %cst_151 = arith.constant dense<0.000000e+00> : vector<2x128xf32>
    %205 = vector.multi_reduction <add>, %204, %cst_151 [1] : vector<2x4x128xf32> to vector<2x128xf32>
    %206 = vector.shape_cast %23 : vector<128xf32> to vector<1x128xf32>
    %207 = vector.broadcast %206 : vector<1x128xf32> to vector<2x128xf32>
    %208 = arith.addf %205, %207 : vector<2x128xf32>
    %c0_152 = arith.constant 0 : index
    %c0_153 = arith.constant 0 : index
    %209 = vector.load %arg10[%c0_152, %c0_153] : memref<2x128xf32, #tpu.memory_space<vmem>>, vector<2x128xf32>
    tpu.vector_store %arg10[%c0_152, %c0_153], %208 {strides = array<i32>} : memref<2x128xf32, #tpu.memory_space<vmem>>, vector<2x128xf32>,
    return
  }
  func.func @transform_0(%arg0: i32) -> (i32, i32, i32) {
    %c0_i32 = arith.constant 0 : i32
    %c0_i32_0 = arith.constant 0 : i32
    %c0_i32_1 = arith.constant 0 : i32
    return %arg0, %c0_i32, %c0_i32_0 : i32, i32, i32
  }
  func.func @transform_1(%arg0: i32) -> (i32, i32, i32) {
    %c0_i32 = arith.constant 0 : i32
    %c0_i32_0 = arith.constant 0 : i32
    %c0_i32_1 = arith.constant 0 : i32
    %c0_i32_2 = arith.constant 0 : i32
    return %c0_i32, %c0_i32_0, %c0_i32_1 : i32, i32, i32
  }
  func.func @transform_2(%arg0: i32) -> (i32, i32, i32) {
    %c0_i32 = arith.constant 0 : i32
    %c0_i32_0 = arith.constant 0 : i32
    %c0_i32_1 = arith.constant 0 : i32
    %c0_i32_2 = arith.constant 0 : i32
    return %c0_i32, %c0_i32_0, %c0_i32_1 : i32, i32, i32
  }
  func.func @transform_3(%arg0: i32) -> (i32, i32) {
    %c0_i32 = arith.constant 0 : i32
    %c0_i32_0 = arith.constant 0 : i32
    %c0_i32_1 = arith.constant 0 : i32
    return %c0_i32, %c0_i32_0 : i32, i32
  }
  func.func @transform_4(%arg0: i32) -> (i32, i32, i32) {
    %c0_i32 = arith.constant 0 : i32
    %c0_i32_0 = arith.constant 0 : i32
    %c0_i32_1 = arith.constant 0 : i32
    %c0_i32_2 = arith.constant 0 : i32
    return %c0_i32, %c0_i32_0, %c0_i32_1 : i32, i32, i32
  }
  func.func @transform_5(%arg0: i32) -> (i32, i32, i32) {
    %c0_i32 = arith.constant 0 : i32
    %c0_i32_0 = arith.constant 0 : i32
    %c0_i32_1 = arith.constant 0 : i32
    %c0_i32_2 = arith.constant 0 : i32
    return %c0_i32, %c0_i32_0, %c0_i32_1 : i32, i32, i32
  }
  func.func @transform_6(%arg0: i32) -> (i32, i32) {
    %c0_i32 = arith.constant 0 : i32
    %c0_i32_0 = arith.constant 0 : i32
    %c0_i32_1 = arith.constant 0 : i32
    return %c0_i32, %c0_i32_0 : i32, i32
  }
  func.func @transform_7(%arg0: i32) -> (i32, i32) {
    %c0_i32 = arith.constant 0 : i32
    %c0_i32_0 = arith.constant 0 : i32
    %c0_i32_1 = arith.constant 0 : i32
    return %c0_i32, %c0_i32_0 : i32, i32
  }
  func.func @transform_8(%arg0: i32) -> (i32, i32) {
    %c0_i32 = arith.constant 0 : i32
    %c0_i32_0 = arith.constant 0 : i32
    %c0_i32_1 = arith.constant 0 : i32
    return %c0_i32, %c0_i32_0 : i32, i32
  }
  func.func @transform_9(%arg0: i32) -> (i32, i32) {
    %c0_i32 = arith.constant 0 : i32
    %c0_i32_0 = arith.constant 0 : i32
    return %arg0, %c0_i32 : i32, i32
  }
}

</mosaic_0001>

<bundles_post_ra>
// kernel: tpu_custom_call.1
= control target key start
LH: loop header
LB: loop body
LE: loop exit
PB: predicated region body
PF: predicated region fallthrough
CT: control target
= control target key end

     0   :  { %14 = vsyncpa [#allocation7], 0  ;;  %s4094_s0 = inlined_call_operand.hbm [shape: f32[2,16,16], index: 0, kind: input, shape index: {}]   ;;  %s4095_s1 = inlined_call_operand.hbm [shape: f32[3,16,128], index: 1, kind: input, shape index: {}]   ;;  %s4096_s2 = inlined_call_operand.hbm [shape: f32[3,128,128], index: 2, kind: input, shape index: {}]   ;;  %s4097_s3 = inlined_call_operand.hbm [shape: f32[16,128], index: 3, kind: input, shape index: {}]   ;;  %s4098_s4 = inlined_call_operand.hbm [shape: f32[3,128,256], index: 4, kind: input, shape index: {}]   ;;  %s4099_s5 = inlined_call_operand.hbm [shape: f32[3,256,256], index: 5, kind: input, shape index: {}]   ;;  %s4100_s6 = inlined_call_operand.hbm [shape: f32[128,256], index: 6, kind: input, shape index: {}]   ;;  %s4101_s7 = inlined_call_operand.hbm [shape: f32[256,128], index: 7, kind: input, shape index: {}]   ;;  %s4102_s8 = inlined_call_operand.hbm [shape: f32[8,256], index: 8, kind: input, shape index: {}]   ;;  %s4103_s9 = inlined_call_operand.hbm [shape: f32[2,128], index: 9, kind: output, shape index: {}]  }
   0x1   :  { %15 = vsyncpa [#allocation10], 0 }
   0x2   :  { %16 = vsyncpa [#allocation13], 0 }
   0x3   :  { %17 = vsyncpa [#allocation16], 0 }
   0x4   :  { %18 = vsyncpa [#allocation19], 0 }
   0x5   :  { %19 = vsyncpa [#allocation8], 0  ;;  %s3626_s30 = smov [#allocation9]   ;;  %s3627_s11 = smov [#allocation12]  }
   0x6   :  { %s37_s10 = sshll.u32 %s3626_s30, 4  ;;  %s61_s12 = sshll.u32 %s3627_s11, 4  ;;  %s38_s10 = int_to_ptr.vmem [resolvable:$true] %s37_s10  ;;  %s62_s12 = int_to_ptr.vmem [resolvable:$true] %s61_s12 }
   0x7   :  { %s3422_s13 = scalar_lea.vmem %s38_s10, 768  ;;  %p3427_p1 = scmp.lt.s32.totalorder %s38_s10, %s38_s10 }
   0x8   :  { %p3423_p0 = scmp.ne.s32.totalorder %s38_s10, %s3422_s13  ;;  %p3428_p2 = scmp.lt.s32.totalorder %s3422_s13, %s3422_s13 }
   0xa   :  { %p3429_p3 = por %p3428_p2, %p3427_p1 }
   0xc   :  { %p3430_p4 = pnand %p3429_p3, %p3423_p0 }
   0xe   :  { %3433 = shalt.err (!%p3430_p4)
}
   0xf   :  { %s3628_s14 = smov 128   ;;  %s3629_s15 = smov 8  }
  0x10   :  { %43 = dma.hbm_to_vmem [thread:$0]  %s4095_s1, 768, %s38_s10, [#allocation10], %s3628_s14, %s3628_s14, %s3629_s15  }
  0x11   :  { %s3442_s18 = scalar_lea.vmem %s62_s12, 256  ;;  %p3447_p6 = scmp.lt.s32.totalorder %s62_s12, %s62_s12 }
  0x12   :  { %p3443_p5 = scmp.ne.s32.totalorder %s62_s12, %s3442_s18  ;;  %p3448_p7 = scmp.lt.s32.totalorder %s3442_s18, %s3442_s18 }
  0x14   :  { %p3449_p8 = por %p3448_p7, %p3447_p6 }
  0x16   :  { %p3450_p9 = pnand %p3449_p8, %p3443_p5 }
  0x18   :  { %3453 = shalt.err (!%p3450_p9)
}
  0x19   :  { %67 = dma.hbm_to_vmem [thread:$0]  %s4097_s3, 256, %s62_s12, [#allocation13], %s3628_s14, %s3628_s14, %s3629_s15  }
  0x1a   :  { %s3630_s21 = smov [#allocation15]   ;;  %s3631_s23 = smov [#allocation18]  }
  0x1b   :  { %s85_s22 = sshll.u32 %s3630_s21, 4  ;;  %s109_s24 = sshll.u32 %s3631_s23, 4  ;;  %s86_s22 = int_to_ptr.vmem [resolvable:$true] %s85_s22  ;;  %s110_s24 = int_to_ptr.vmem [resolvable:$true] %s109_s24 }
  0x1c   :  { %s3462_s1 = scalar_lea.vmem %s86_s22, 24576  ;;  %p3467_p11 = scmp.lt.s32.totalorder %s86_s22, %s86_s22 }
  0x1d   :  { %p3463_p10 = scmp.ne.s32.totalorder %s86_s22, %s3462_s1  ;;  %p3468_p12 = scmp.lt.s32.totalorder %s3462_s1, %s3462_s1 }
  0x1f   :  { %p3469_p13 = por %p3468_p12, %p3467_p11 }
  0x21   :  { %p3470_p0 = pnand %p3469_p13, %p3463_p10 }
  0x23   :  { %3473 = shalt.err (!%p3470_p0)
}
  0x24   :  { %s3632_s25 = smov 256   ;;  %s3633_s26 = smov 16  }
  0x25   :  { %91 = dma.hbm_to_vmem [thread:$0]  %s4099_s5, 24576, %s86_s22, [#allocation16], %s3632_s25, %s3632_s25, %s3633_s26  }
  0x26   :  { %s3482_s28 = scalar_lea.vmem %s110_s24, 4096  ;;  %p3487_p2 = scmp.lt.s32.totalorder %s110_s24, %s110_s24 }
  0x27   :  { %p3483_p1 = scmp.ne.s32.totalorder %s110_s24, %s3482_s28  ;;  %p3488_p3 = scmp.lt.s32.totalorder %s3482_s28, %s3482_s28 }
  0x29   :  { %p3489_p4 = por %p3488_p3, %p3487_p2 }
  0x2b   :  { %p3490_p5 = pnand %p3489_p4, %p3483_p1 }
  0x2d   :  { %3493 = shalt.err (!%p3490_p5)
}
  0x2e   :  { %115 = dma.hbm_to_vmem [thread:$0]  %s4101_s7, 4096, %s110_s24, [#allocation19], %s3628_s14, %s3628_s14, %s3629_s15  }
  0x2f   :  { %s3634_s10 = smov [#allocation6]   ;;  %s3635_s12 = smov [#allocation11]  }
  0x30   :  { %s25_s11 = sshll.u32 %s3634_s10, 4  ;;  %s49_s13 = sshll.u32 %s3635_s12, 4  ;;  %s26_s11 = int_to_ptr.vmem [resolvable:$true] %s25_s11  ;;  %s50_s13 = int_to_ptr.vmem [resolvable:$true] %s49_s13 }
  0x31   :  { %s3502_s5 = scalar_lea.vmem %s26_s11, 512  ;;  %p3507_p7 = scmp.lt.s32.totalorder %s26_s11, %s26_s11 }
  0x32   :  { %p3503_p6 = scmp.ne.s32.totalorder %s26_s11, %s3502_s5  ;;  %p3508_p8 = scmp.lt.s32.totalorder %s3502_s5, %s3502_s5 }
  0x34   :  { %p3509_p9 = por %p3508_p8, %p3507_p7 }
  0x36   :  { %p3510_p10 = pnand %p3509_p9, %p3503_p6 }
  0x38   :  { %3513 = shalt.err (!%p3510_p10)
}
  0x39   :  { %31 = dma.hbm_to_vmem [thread:$0]  %s4094_s0, 512, %s26_s11, [#allocation7], %s3628_s14, %s3628_s14, %s3629_s15  }
  0x3a   :  { %s3522_s7 = scalar_lea.vmem %s50_s13, 6144  ;;  %p3527_p12 = scmp.lt.s32.totalorder %s50_s13, %s50_s13 }
  0x3b   :  { %p3523_p11 = scmp.ne.s32.totalorder %s50_s13, %s3522_s7  ;;  %p3528_p13 = scmp.lt.s32.totalorder %s3522_s7, %s3522_s7 }
  0x3d   :  { %p3529_p0 = por %p3528_p13, %p3527_p12 }
  0x3f   :  { %p3530_p1 = pnand %p3529_p0, %p3523_p11 }
  0x41   :  { %3533 = shalt.err (!%p3530_p1)
}
  0x42   :  { %55 = dma.hbm_to_vmem [thread:$0]  %s4096_s2, 6144, %s50_s13, [#allocation10], %s3628_s14, %s3628_s14, %s3629_s15  }
  0x43   :  { %s3636_s20 = smov [#allocation14]   ;;  %s3637_s22 = smov [#allocation17]  }
  0x44   :  { %s73_s21 = sshll.u32 %s3636_s20, 4  ;;  %s97_s23 = sshll.u32 %s3637_s22, 4  ;;  %s74_s21 = int_to_ptr.vmem [resolvable:$true] %s73_s21  ;;  %s98_s23 = int_to_ptr.vmem [resolvable:$true] %s97_s23 }
  0x45   :  { %s3542_s0 = scalar_lea.vmem %s74_s21, 12288  ;;  %p3547_p3 = scmp.lt.s32.totalorder %s74_s21, %s74_s21 }
  0x46   :  { %p3543_p2 = scmp.ne.s32.totalorder %s74_s21, %s3542_s0  ;;  %p3548_p4 = scmp.lt.s32.totalorder %s3542_s0, %s3542_s0 }
  0x48   :  { %p3549_p5 = por %p3548_p4, %p3547_p3 }
  0x4a   :  { %p3550_p6 = pnand %p3549_p5, %p3543_p2 }
  0x4c   :  { %3553 = shalt.err (!%p3550_p6)
}
  0x4d   :  { %79 = dma.hbm_to_vmem [thread:$0]  %s4098_s4, 12288, %s74_s21, [#allocation13], %s3632_s25, %s3632_s25, %s3633_s26  }
  0x4e   :  { %s3562_s2 = scalar_lea.vmem %s98_s23, 4096  ;;  %p3567_p8 = scmp.lt.s32.totalorder %s98_s23, %s98_s23 }
  0x4f   :  { %p3563_p7 = scmp.ne.s32.totalorder %s98_s23, %s3562_s2  ;;  %p3568_p9 = scmp.lt.s32.totalorder %s3562_s2, %s3562_s2 }
  0x51   :  { %p3569_p10 = por %p3568_p9, %p3567_p8 }
  0x53   :  { %p3570_p11 = pnand %p3569_p10, %p3563_p7 }
  0x55   :  { %3573 = shalt.err (!%p3570_p11)
}
  0x56   :  { %103 = dma.hbm_to_vmem [thread:$0]  %s4100_s6, 4096, %s98_s23, [#allocation16], %s3632_s25, %s3632_s25, %s3633_s26  }
  0x57   :  { %s3638_s27 = smov [#allocation20]  }
  0x58   :  { %s122_s3 = sshll.u32 %s3638_s27, 4  ;;  %s123_s3 = int_to_ptr.vmem [resolvable:$true] %s122_s3 }
  0x59   :  { %s3582_s28 = scalar_lea.vmem %s123_s3, 256  ;;  %p3587_p13 = scmp.lt.s32.totalorder %s123_s3, %s123_s3 }
  0x5a   :  { %p3583_p12 = scmp.ne.s32.totalorder %s123_s3, %s3582_s28  ;;  %p3588_p0 = scmp.lt.s32.totalorder %s3582_s28, %s3582_s28 }
  0x5c   :  { %p3589_p1 = por %p3588_p0, %p3587_p13 }
  0x5e   :  { %p3590_p2 = pnand %p3589_p1, %p3583_p12 }
  0x60   :  { %3593 = shalt.err (!%p3590_p2)
}
  0x61   :  { %125 = dma.hbm_to_vmem [thread:$0]  %s4102_s8, 256, %s123_s3, [#allocation19]  }
  0x62   :  { %3614 = dma.done.wait [#allocation7], 512  }
  0x63   :  { %3615 = vsyncadd [#allocation7], 4294966784 }
  0x64   :  { %3616 = dma.done.wait [#allocation10], 6912  }
  0x65   :  { %3617 = vsyncadd [#allocation10], 4294960384 }
  0x66   :  { %3618 = dma.done.wait [#allocation13], 12544  }
  0x67   :  { %3619 = vsyncadd [#allocation13], 4294954752 }
  0x68   :  { %3620 = dma.done.wait [#allocation16], 28672  }
  0x69   :  { %3621 = vsyncadd [#allocation16], 4294938624 }
  0x6a   :  { %3622 = dma.done.wait [#allocation19], 4352  }
  0x6b   :  { %3623 = vsyncadd [#allocation19], 4294962944  ;;  %vm153_vm0 = vcmask 122880   ;;  %v3639_v0 = vmov 0.0   ;;  %vm187_vm1 = vcmask 130048   ;;  %v201_v1 = vld [vmem:[#allocation9 + $0x8] sm:$0xff]  ;;  %v166_v57 = vlaneseq }
  0x6c   :  { %154 = vst.msk [vmem:[#allocation2] sm:$0x1] %vm153_vm0, %v3639_v0  ;;  %155 = vst.msk [vmem:[#allocation2 + $0x18] sm:$0x1] %vm153_vm0, %v3639_v0  ;;  %v200_v2 = vld [vmem:[#allocation9] sm:$0xff]  ;;  %3183 = vmatprep.subr.mxu0 %v201_v1  ;;  %v3759_v4 = vld [vmem:[#allocation6 + $0x8] sm:$0xff] }
  0x6d   :  { %156 = vst.msk [vmem:[#allocation2 + $0x11] sm:$0x1] %vm153_vm0, %v3639_v0  ;;  %157 = vst.msk [vmem:[#allocation2 + $0x29] sm:$0x1] %vm153_vm0, %v3639_v0  ;;  %v3755_v3 = vld [vmem:[#allocation6] sm:$0xff]  ;;  %v3761_v5 = vld [vmem:[#allocation6 + $0x10] sm:$0xff]  ;;  %3184 = vmatpush3.msra.mxu0 %v201_v1 }
  0x6e   :  { %158 = vst [vmem:[#allocation3] sm:$0x1] %v3639_v0  ;;  %159 = vst [vmem:[#allocation3 + $0x18] sm:$0x1] %v3639_v0  ;;  %v3763_v6 = vld [vmem:[#allocation6 + $0x18] sm:$0xff]  ;;  %3185 = vmatprep.subr.mxu0 %v200_v2  ;;  %v308_v11 = vld [vmem:[#allocation9 + $0x10] sm:$0xff] }
  0x6f   :  { %160 = vst [vmem:[#allocation3 + $0x11] sm:$0x1] %v3639_v0  ;;  %161 = vst [vmem:[#allocation3 + $0x29] sm:$0x1] %v3639_v0  ;;  %v309_v7 = vld [vmem:[#allocation9 + $0x18] sm:$0xff]  ;;  %3186 = vmatpush3.msra.mxu0 %v200_v2  ;;  %v417_v13 = vld [vmem:[#allocation9 + $0x28] sm:$0xff] }
  0x70   :  { %162 = vst [vmem:[#allocation4] sm:$0x1] %v3639_v0  ;;  %163 = vst [vmem:[#allocation4 + $0x10] sm:$0x1] %v3639_v0  ;;  %3193 = vmatprep.subr.mxu0 %v309_v7  ;;  %v416_v17 = vld [vmem:[#allocation9 + $0x20] sm:$0xff]  ;;  %v668_v23 = vld [vmem:[#allocation11 + $0xf8] sm:$0xff] }
  0x71   :  { %164 = vst [vmem:[#allocation4 + $0x9] sm:$0x1] %v3639_v0  ;;  %165 = vst [vmem:[#allocation4 + $0x19] sm:$0x1] %v3639_v0  ;;  %v667_v24 = vld [vmem:[#allocation11 + $0xf0] sm:$0xff]  ;;  %v666_v25 = vld [vmem:[#allocation11 + $0xe8] sm:$0xff] }
  0x72   :  { %188 = vst.msk [vmem:[#allocation2 + $0x1] sm:$0xff] %vm187_vm1, %v3755_v3  ;;  %189 = vst.msk [vmem:[#allocation2 + $0x9] sm:$0xff] %vm187_vm1, %v3759_v4  ;;  %v665_v26 = vld [vmem:[#allocation11 + $0xe0] sm:$0xff]  ;;  %v558_v27 = vld [vmem:[#allocation11 + $0x78] sm:$0xff]  ;;  %v3787_v59 = vshrl.u32 %v166_v57, 7  ;;  %vm996_vm7 = vcmask 261120  }
  0x73   :  { %190 = vst.msk [vmem:[#allocation2 + $0x19] sm:$0xff] %vm187_vm1, %v3761_v5  ;;  %191 = vst.msk [vmem:[#allocation2 + $0x21] sm:$0xff] %vm187_vm1, %v3763_v6  ;;  %3213 = vmatprep.subr.mxu1 %v558_v27  ;;  %v664_v28 = vld [vmem:[#allocation11 + $0xd8] sm:$0xff]  ;;  %v557_v29 = vld [vmem:[#allocation11 + $0x70] sm:$0xff]  ;;  %s3641_s6 = smov [#allocation21]  }
  0x74   :  { %3214 = vmatpush3.msra.mxu1 %v558_v27  ;;  %v663_v30 = vld [vmem:[#allocation11 + $0xd0] sm:$0xff]  ;;  %v556_v31 = vld [vmem:[#allocation11 + $0x68] sm:$0xff]  ;;  %v555_v33 = vld [vmem:[#allocation11 + $0x60] sm:$0xff]  ;;  %v194_v62 = vsub.s32 0, %v3787_v59  ;;  %s2909_s8 = sshll.u32 %s3641_s6, 4  ;;  %s2910_s8 = int_to_ptr.vmem [resolvable:$true] %s2909_s8 }
  0x75   :  { %3215 = vmatprep.subr.mxu1 %v557_v29  ;;  %v662_v32 = vld [vmem:[#allocation11 + $0xc8] sm:$0xff]  ;;  %v661_v34 = vld [vmem:[#allocation11 + $0xc0] sm:$0xff]  ;;  %v554_v35 = vld [vmem:[#allocation11 + $0x58] sm:$0xff]  ;;  %s3594_s25 = scalar_lea.vmem %s2910_s8, 32  ;;  %p3599_p4 = scmp.lt.s32.totalorder %s2910_s8, %s2910_s8 }
  0x76   :  { %3216 = vmatpush3.msra.mxu1 %v557_v29  ;;  %v660_v36 = vld [vmem:[#allocation11 + $0xb8] sm:$0xff]  ;;  %v553_v37 = vld [vmem:[#allocation11 + $0x50] sm:$0xff]  ;;  %v552_v39 = vld [vmem:[#allocation11 + $0x48] sm:$0xff]  ;;  %p3595_p3 = scmp.ne.s32.totalorder %s2910_s8, %s3594_s25  ;;  %p3600_p5 = scmp.lt.s32.totalorder %s3594_s25, %s3594_s25 }
  0x77   :  { %3217 = vmatprep.subr.mxu1 %v556_v31  ;;  %v659_v38 = vld [vmem:[#allocation11 + $0xb0] sm:$0xff]  ;;  %v658_v40 = vld [vmem:[#allocation11 + $0xa8] sm:$0xff]  ;;  %v551_v41 = vld [vmem:[#allocation11 + $0x40] sm:$0xff] }
  0x78   :  { %3218 = vmatpush3.msra.mxu1 %v556_v31  ;;  %v657_v42 = vld [vmem:[#allocation11 + $0xa0] sm:$0xff]  ;;  %v550_v43 = vld [vmem:[#allocation11 + $0x38] sm:$0xff]  ;;  %v549_v45 = vld [vmem:[#allocation11 + $0x30] sm:$0xff]  ;;  %p3601_p6 = por %p3600_p5, %p3599_p4 }
  0x79   :  { %v196_v8 = vld [vmem:[#allocation2] sm:$0xff]  ;;  %v197_v9 = vld [vmem:[#allocation2 + $0x8] sm:$0xff]  ;;  %3219 = vmatprep.subr.mxu1 %v555_v33  ;;  %v548_v47 = vld [vmem:[#allocation11 + $0x28] sm:$0xff] }
  0x7a   :  { %3187 = vmatprep.mubr.msk.f32.mxu0 %vm187_vm1, %v196_v8  ;;  %v198_v10 = vld [vmem:[#allocation2 + $0x18] sm:$0xff]  ;;  %v199_v12 = vld [vmem:[#allocation2 + $0x20] sm:$0xff]  ;;  %v304_v15 = vld [vmem:[#allocation2 + $0x9] sm:$0xff]  ;;  %3220 = vmatpush3.msra.mxu1 %v555_v33  ;;  %p3602_p7 = pnand %p3601_p6, %p3595_p3 }
  0x7b   :  { %3188 = vmatmul.mubr.msk.f32.vlgmr.msra.gmra.mxu0 %vm187_vm1, %v197_v9  ;;  %v303_v14 = vld [vmem:[#allocation2 + $0x1] sm:$0xff]  ;;  %v305_v16 = vld [vmem:[#allocation2 + $0x19] sm:$0xff]  ;;  %v412_v20 = vld [vmem:[#allocation2 + $0xa] sm:$0xff]  ;;  %3221 = vmatprep.subr.mxu1 %v554_v35 }
  0x7c   :  { %3190 = vmatprep.mubr.msk.f32.mxu0 %vm187_vm1, %v198_v10  ;;  %3194 = vmatpush3.msra.mxu0 %v309_v7  ;;  %v306_v18 = vld [vmem:[#allocation2 + $0x21] sm:$0xff]  ;;  %v654_v48 = vld [vmem:[#allocation11 + $0x88] sm:$0xff]  ;;  %v547_v49 = vld [vmem:[#allocation11 + $0x20] sm:$0xff] }
  0x7d   :  { %3195 = vmatprep.subr.mxu0 %v308_v11  ;;  %v411_v19 = vld [vmem:[#allocation2 + $0x2] sm:$0xff]  ;;  %v413_v21 = vld [vmem:[#allocation2 + $0x1a] sm:$0xff]  ;;  %3222 = vmatpush3.msra.mxu1 %v554_v35  ;;  %v653_v50 = vld [vmem:[#allocation11 + $0x80] sm:$0xff] }
  0x7e   :  { %3196 = vmatpush3.msra.mxu0 %v308_v11  ;;  %v414_v22 = vld [vmem:[#allocation2 + $0x22] sm:$0xff]  ;;  %3223 = vmatprep.subr.mxu1 %v553_v37  ;;  %v544_v53 = vld [vmem:[#allocation11 + $0x8] sm:$0xff]  ;;  %v543_v54 = vld [vmem:[#allocation11] sm:$0xff] }
  0x7f   :  { %3191 = vmatmul.mubr.msk.f32.gmra.mxu0 %vm187_vm1, %v199_v12  ;;  %3203 = vmatprep.subr.mxu0 %v417_v13  ;;  %v656_v44 = vld [vmem:[#allocation11 + $0x98] sm:$0xff]  ;;  %v655_v46 = vld [vmem:[#allocation11 + $0x90] sm:$0xff]  ;;  %v869_v56 = vld [vmem:[#allocation12 + $0x8] sm:$0xff] }
  0x80   :  { %3197 = vmatprep.mubr.msk.f32.mxu0 %vm187_vm1, %v303_v14  ;;  %3224 = vmatpush3.msra.mxu1 %v553_v37  ;;  %v546_v51 = vld [vmem:[#allocation11 + $0x18] sm:$0xff]  ;;  %v545_v52 = vld [vmem:[#allocation11 + $0x10] sm:$0xff] }
  0x81   :  { %3225 = vmatprep.subr.mxu1 %v552_v39  ;;  %v3783_v55 = vld [vmem:[#allocation11 + $0x178] sm:$0xff]  ;;  %v3790_v63 = vld [vmem:[#allocation20] sm:$0xff] }
  0x82   :  { %3226 = vmatpush3.msra.mxu1 %v552_v39  ;;  %v195_v7 = vrot.slane %v3790_v63, %v194_v62  ;;  %v776_v39 = vld [vmem:[#allocation11 + $0x168] sm:$0xff] }
  0x83   :  { %3198 = vmatmul.mubr.msk.f32.vlgmr.msra.gmra.mxu0 %vm187_vm1, %v304_v15  ;;  %3227 = vmatprep.subr.mxu1 %v551_v41 }
  0x84   :  { %3200 = vmatprep.mubr.msk.f32.mxu0 %vm187_vm1, %v305_v16  ;;  %3204 = vmatpush3.msra.mxu0 %v417_v13 }
  0x85   :  { %3205 = vmatprep.subr.mxu0 %v416_v17  ;;  %3228 = vmatpush3.msra.mxu1 %v551_v41 }
  0x86   :  { %3206 = vmatpush3.msra.mxu0 %v416_v17  ;;  %3229 = vmatprep.subr.mxu1 %v550_v43 }
  0x87   :  { %3201 = vmatmul.mubr.msk.f32.gmra.mxu0 %vm187_vm1, %v306_v18  ;;  %3251 = vmatprep.subr.mxu0 %v668_v23 }
  0x88   :  { %3207 = vmatprep.mubr.msk.f32.mxu0 %vm187_vm1, %v411_v19  ;;  %3230 = vmatpush3.msra.mxu1 %v550_v43  ;;  %v774_v43 = vld [vmem:[#allocation11 + $0x158] sm:$0xff] }
  0x89   :  { %3231 = vmatprep.subr.mxu1 %v549_v45 }
  0x8a   :  { %3232 = vmatpush3.msra.mxu1 %v549_v45  ;;  %v770_v45 = vld [vmem:[#allocation11 + $0x138] sm:$0xff] }
  0x8b   :  { %3208 = vmatmul.mubr.msk.f32.vlgmr.msra.gmra.mxu0 %vm187_vm1, %v412_v20  ;;  %3233 = vmatprep.subr.mxu1 %v548_v47 }
  0x8c   :  { %3210 = vmatprep.mubr.msk.f32.mxu0 %vm187_vm1, %v413_v21  ;;  %3252 = vmatpush3.msra.mxu0 %v668_v23 }
  0x8d   :  { %3253 = vmatprep.subr.mxu0 %v667_v24  ;;  %3234 = vmatpush3.msra.mxu1 %v548_v47  ;;  %v768_v47 = vld [vmem:[#allocation11 + $0x128] sm:$0xff] }
  0x8e   :  { %3254 = vmatpush3.msra.mxu0 %v667_v24  ;;  %3235 = vmatprep.subr.mxu1 %v547_v49 }
  0x8f   :  { %3211 = vmatmul.mubr.msk.f32.gmra.mxu0 %vm187_vm1, %v414_v22  ;;  %3255 = vmatprep.subr.mxu0 %v666_v25 }
  0x90   :  { %3256 = vmatpush3.msra.mxu0 %v666_v25  ;;  %3236 = vmatpush3.msra.mxu1 %v547_v49  ;;  %v765_v49 = vld [vmem:[#allocation11 + $0x110] sm:$0xff] }
  0x91   :  { %3257 = vmatprep.subr.mxu0 %v665_v26  ;;  %3237 = vmatprep.subr.mxu1 %v546_v51 }
  0x92   :  { %3258 = vmatpush3.msra.mxu0 %v665_v26  ;;  %3238 = vmatpush3.msra.mxu1 %v546_v51  ;;  %v763_v51 = vld [vmem:[#allocation11 + $0x100] sm:$0xff] }
  0x93   :  { %3259 = vmatprep.subr.mxu0 %v664_v28  ;;  %3239 = vmatprep.subr.mxu1 %v545_v52 }
  0x94   :  { %3260 = vmatpush3.msra.mxu0 %v664_v28  ;;  %3240 = vmatpush3.msra.mxu1 %v545_v52 }
  0x95   :  { %3261 = vmatprep.subr.mxu0 %v663_v30  ;;  %3241 = vmatprep.subr.mxu1 %v544_v53 }
  0x96   :  { %3262 = vmatpush3.msra.mxu0 %v663_v30  ;;  %3242 = vmatpush3.msra.mxu1 %v544_v53 }
  0x97   :  { %3263 = vmatprep.subr.mxu0 %v662_v32  ;;  %3243 = vmatprep.subr.mxu1 %v543_v54 }
  0x98   :  { %3264 = vmatpush3.msra.mxu0 %v662_v32  ;;  %3244 = vmatpush3.msra.mxu1 %v543_v54  ;;  %v868_v32 = vld [vmem:[#allocation12] sm:$0xff] }
  0x99   :  { %3265 = vmatprep.subr.mxu0 %v661_v34  ;;  %3289 = vmatprep.subr.mxu1 %v3783_v55 }
  0x9a   :  { %3266 = vmatpush3.msra.mxu0 %v661_v34 }
  0x9b   :  { %3267 = vmatprep.subr.mxu0 %v660_v36 }
  0x9c   :  { %3268 = vmatpush3.msra.mxu0 %v660_v36 }
  0x9d   :  { %3269 = vmatprep.subr.mxu0 %v659_v38 }
  0x9e   :  { %3270 = vmatpush3.msra.mxu0 %v659_v38  ;;  %v777_v38 = vld [vmem:[#allocation11 + $0x170] sm:$0xff] }
  0x9f   :  { %3271 = vmatprep.subr.mxu0 %v658_v40 }
  0xa0   :  { %3272 = vmatpush3.msra.mxu0 %v658_v40 }
  0xa1   :  { %3273 = vmatprep.subr.mxu0 %v657_v42 }
  0xa2   :  { %3274 = vmatpush3.msra.mxu0 %v657_v42 }
  0xa3   :  { %3275 = vmatprep.subr.mxu0 %v656_v44 }
  0xa4   :  { %3276 = vmatpush3.msra.mxu0 %v656_v44  ;;  %v771_v44 = vld [vmem:[#allocation11 + $0x140] sm:$0xff] }
  0xa5   :  { %3277 = vmatprep.subr.mxu0 %v655_v46 }
  0xa6   :  { %3278 = vmatpush3.msra.mxu0 %v655_v46  ;;  %v769_v46 = vld [vmem:[#allocation11 + $0x130] sm:$0xff] }
  0xa7   :  { %3279 = vmatprep.subr.mxu0 %v654_v48 }
  0xa8   :  { %3280 = vmatpush3.msra.mxu0 %v654_v48  ;;  %v766_v48 = vld [vmem:[#allocation11 + $0x118] sm:$0xff] }
  0xa9   :  { %3281 = vmatprep.subr.mxu0 %v653_v50 }
  0xaa   :  { %3282 = vmatpush3.msra.mxu0 %v653_v50  ;;  %v764_v50 = vld [vmem:[#allocation11 + $0x108] sm:$0xff] }
  0xab   :  { %3327 = vmatprep.subr.mxu0 %v869_v56 }
 0x13b   :  { %v3189_v58 = vpop.f32.mrf.mxu0 }
 0x13c   :  { %v300_v10 = vadd.f32 %v3189_v58, %v195_v7 }
 0x13d   :  { %v280_v60 = vpop.f32.mrf.mxu0 }
 0x13e   :  { %v299_v12 = vadd.f32 %v280_v60, %v195_v7 }
 0x13f   :  { %v3192_v61 = vpop.f32.mrf.mxu0 }
 0x140   :  { %v302_v15 = vadd.f32 %v3192_v61, %v195_v7 }
 0x141   :  { %v290_v1 = vpop.f32.mrf.mxu0 }
 0x142   :  { %v301_v18 = vadd.f32 %v290_v1, %v195_v7 }
 0x143   :  { %v3199_v2 = vpop.f32.mrf.mxu0 }
 0x144   :  { %v408_v13 = vadd.f32 %v3199_v2, %v300_v10  ;;  %v537_v2 = vsub.s32 1, %v3787_v59 }
 0x145   :  { %v388_v8 = vpop.f32.mrf.mxu0 }
 0x146   :  { %v407_v16 = vadd.f32 %v388_v8, %v299_v12 }
 0x147   :  { %v3202_v9 = vpop.f32.mrf.mxu0 }
 0x148   :  { %v410_v20 = vadd.f32 %v3202_v9, %v302_v15  ;;  %v538_v9 = vrot.slane %v3790_v63, %v537_v2  ;;  %v1170_v2 = vadd.s32 24, %v3787_v59 }
 0x149   :  { %v398_v11 = vpop.f32.mrf.mxu0 }
 0x14a   :  { %v409_v23 = vadd.f32 %v398_v11, %v301_v18 }
 0x14b   :  { %v3209_v14 = vpop.f32.mrf.mxu0 }
 0x14c   :  { %v516_v17 = vadd.f32 %v3209_v14, %v408_v13 }
 0x14d   :  { %v496_v19 = vpop.f32.mrf.mxu0 }
 0x14e   :  { %vm520_vm2 = vcmp.gt.f32.partialorder %v516_v17, 0.0  ;;  %v524_v21 = vmul.f32 0.01, %v516_v17  ;;  %v515_v22 = vadd.f32 %v496_v19, %v407_v16 }
 0x14f   :  { %v3212_v24 = vpop.f32.mrf.mxu0 }
 0x150   :  { %v528_v25 = vsel %vm520_vm2, %v516_v17, %v524_v21  ;;  %vm519_vm3 = vcmp.gt.f32.partialorder %v515_v22, 0.0  ;;  %v523_v26 = vmul.f32 0.01, %v515_v22  ;;  %v518_v27 = vadd.f32 %v3212_v24, %v410_v20 }
 0x151   :  { %532 = vst [vmem:[#allocation3 + $0x9] sm:$0xff] %v528_v25  ;;  %v506_v28 = vpop.f32.mrf.mxu0 }
 0x152   :  { %v527_v29 = vsel %vm519_vm3, %v515_v22, %v523_v26  ;;  %vm522_vm4 = vcmp.gt.f32.partialorder %v518_v27, 0.0  ;;  %v526_v30 = vmul.f32 0.01, %v518_v27  ;;  %v517_v31 = vadd.f32 %v506_v28, %v409_v23 }
 0x153   :  { %531 = vst [vmem:[#allocation3 + $0x1] sm:$0xff] %v527_v29  ;;  %3283 = vmatprep.mubr.f32.mxu0 %v527_v29 }
 0x154   :  { %v530_v33 = vsel %vm522_vm4, %v518_v27, %v526_v30  ;;  %vm521_vm5 = vcmp.gt.f32.partialorder %v517_v31, 0.0  ;;  %v525_v34 = vmul.f32 0.01, %v517_v31  ;;  %3284 = vmatmul.mubr.f32.vlgmr.msra.gmra.mxu0 %v528_v25  ;;  %v3817_v30 = vadd.s32 8, %v3787_v59 }
 0x155   :  { %534 = vst [vmem:[#allocation3 + $0x21] sm:$0xff] %v530_v33  ;;  %3328 = vmatpush3.msra.mxu0 %v869_v56  ;;  %v988_v56 = vmul.u32 2, %v3787_v59 }
 0x156   :  { %v529_v35 = vsel %vm521_vm5, %v517_v31, %v525_v34  ;;  %3329 = vmatprep.subr.mxu0 %v868_v32 }
 0x157   :  { %533 = vst [vmem:[#allocation3 + $0x19] sm:$0xff] %v529_v35  ;;  %3286 = vmatprep.mubr.f32.mxu0 %v529_v35  ;;  %3330 = vmatpush3.msra.mxu0 %v868_v32  ;;  %v1078_v60 = vadd.s32 1, %v988_v56 }
 0x158   :  { %3287 = vmatmul.mubr.f32.gmra.mxu0 %v530_v33  ;;  %v759_v52 = vld [vmem:[#allocation3 + $0xa] sm:$0xff] }
 0x159   :  { %3331 = vmatprep.mubr.msk.f32.mxu0 %vm187_vm1, %v3755_v3  ;;  %v775_v3 = vld [vmem:[#allocation11 + $0x160] sm:$0xff] }
 0x15a   :  { %v539_v36 = vld [vmem:[#allocation3] sm:$0xff]  ;;  %v540_v37 = vld [vmem:[#allocation3 + $0x8] sm:$0xff] }
 0x15b   :  { %3245 = vmatprep.mubr.f32.mxu1 %v539_v36  ;;  %v758_v42 = vld [vmem:[#allocation3 + $0x2] sm:$0xff] }
 0x15c   :  { %3246 = vmatmul.mubr.f32.vlgmr.msra.gmra.mxu1 %v540_v37  ;;  %3332 = vmatmul.mubr.msk.f32.vlgmr.msra.gmra.mxu0 %vm187_vm1, %v3759_v4  ;;  %v773_v4 = vld [vmem:[#allocation11 + $0x150] sm:$0xff]  ;;  %v761_v54 = vld [vmem:[#allocation3 + $0x22] sm:$0xff] }
 0x15d   :  { %3290 = vmatpush3.msra.mxu1 %v3783_v55  ;;  %3334 = vmatprep.mubr.msk.f32.mxu0 %vm187_vm1, %v3761_v5  ;;  %v772_v5 = vld [vmem:[#allocation11 + $0x148] sm:$0xff]  ;;  %v3804_v55 = vand.u32 127, %v166_v57 }
 0x15e   :  { %3291 = vmatprep.subr.mxu1 %v777_v38  ;;  %v541_v40 = vld [vmem:[#allocation3 + $0x18] sm:$0xff]  ;;  %v542_v41 = vld [vmem:[#allocation3 + $0x20] sm:$0xff] }
 0x15f   :  { %3292 = vmatpush3.msra.mxu1 %v777_v38  ;;  %3248 = vmatprep.mubr.f32.mxu1 %v541_v40  ;;  %v760_v53 = vld [vmem:[#allocation3 + $0x1a] sm:$0xff]  ;;  %vm990_vm6 = vcmp.eq.s32.totalorder %v3804_v55, %v988_v56  ;;  %vm1080_vm8 = vcmp.eq.s32.totalorder %v3804_v55, %v1078_v60  ;;  %v989_v38 = vmul.u32 2, %v3817_v30  ;;  %v3878_v56 = vadd.s32 64, %v3787_v59 }
 0x160   :  { %3293 = vmatprep.subr.mxu1 %v776_v39  ;;  %3249 = vmatmul.mubr.f32.gmra.mxu1 %v542_v41  ;;  %v3809_v58 = vsel %vm990_vm6, 1.0, %v3639_v0  ;;  %v3885_v60 = vadd.s32 56, %v3787_v59 }
 0x161   :  { %3294 = vmatpush3.msra.mxu1 %v776_v39  ;;  %3321 = vmatprep.mubr.f32.mxu1 %v758_v42  ;;  %vm991_vm13 = vcmp.eq.s32.totalorder %v3804_v55, %v989_v38 }
 0x162   :  { %3295 = vmatprep.subr.mxu1 %v775_v3  ;;  %3335 = vmatmul.mubr.msk.f32.gmra.mxu0 %vm187_vm1, %v3763_v6  ;;  %v767_v6 = vld [vmem:[#allocation11 + $0x120] sm:$0xff] }
 0x163   :  { %3296 = vmatpush3.msra.mxu1 %v775_v3  ;;  %3345 = vmatprep.mubr.msk.f32.mxu0 %vm996_vm7, %v3809_v58 }
 0x164   :  { %3297 = vmatprep.subr.mxu1 %v774_v43 }
 0x165   :  { %3298 = vmatpush3.msra.mxu1 %v774_v43 }
 0x166   :  { %3299 = vmatprep.subr.mxu1 %v773_v4 }
 0x167   :  { %3300 = vmatpush3.msra.mxu1 %v773_v4 }
 0x168   :  { %3301 = vmatprep.subr.mxu1 %v772_v5 }
 0x169   :  { %3302 = vmatpush3.msra.mxu1 %v772_v5  ;;  %v2939_v5 = vsel %vm991_vm13, 1.0, %v3639_v0 }
 0x16a   :  { %3303 = vmatprep.subr.mxu1 %v771_v44 }
 0x16b   :  { %3304 = vmatpush3.msra.mxu1 %v771_v44  ;;  %v3825_v44 = vsel %vm1080_vm8, 1.0, %v3639_v0 }
 0x16c   :  { %3305 = vmatprep.subr.mxu1 %v770_v45 }
 0x16d   :  { %3306 = vmatpush3.msra.mxu1 %v770_v45  ;;  %v1079_v45 = vadd.s32 1, %v989_v38  ;;  %v1463_v38 = vld [vmem:[#allocation14 + $0x1d0] sm:$0xff] }
 0x16e   :  { %3307 = vmatprep.subr.mxu1 %v769_v46 }
 0x16f   :  { %3308 = vmatpush3.msra.mxu1 %v769_v46  ;;  %v3829_v46 = vadd.s32 8, %v3804_v55  ;;  %vm1081_vm14 = vcmp.eq.s32.totalorder %v3804_v55, %v1079_v45  ;;  %v1454_v45 = vld [vmem:[#allocation14 + $0x188] sm:$0xff] }
 0x170   :  { %3309 = vmatprep.subr.mxu1 %v768_v47 }
 0x171   :  { %3310 = vmatpush3.msra.mxu1 %v768_v47  ;;  %v3834_v47 = vadd.s32 120, %v3787_v59  ;;  %vm1191_vm8 = vcmp.eq.s32.totalorder %v3885_v60, %v3829_v46 }
 0x172   :  { %3311 = vmatprep.subr.mxu1 %v767_v6 }
 0x173   :  { %3312 = vmatpush3.msra.mxu1 %v767_v6  ;;  %v3838_v6 = vadd.s32 112, %v3787_v59  ;;  %vm1199_vm15 = vcmp.eq.s32.totalorder %v3834_v47, %v3829_v46 }
 0x174   :  { %3313 = vmatprep.subr.mxu1 %v766_v48 }
 0x175   :  { %3314 = vmatpush3.msra.mxu1 %v766_v48  ;;  %v2943_v48 = vsel %vm1081_vm14, 1.0, %v3639_v0  ;;  %vm1198_vm0 = vcmp.eq.s32.totalorder %v3838_v6, %v3829_v46  ;;  %vm1185_vm14 = vcmp.eq.s32.totalorder %v3817_v30, %v3829_v46 }
 0x176   :  { %3315 = vmatprep.subr.mxu1 %v765_v49 }
 0x177   :  { %3316 = vmatpush3.msra.mxu1 %v765_v49  ;;  %v3844_v49 = vadd.s32 104, %v3787_v59 }
 0x178   :  { %3317 = vmatprep.subr.mxu1 %v764_v50 }
 0x179   :  { %3318 = vmatpush3.msra.mxu1 %v764_v50  ;;  %v3849_v50 = vadd.s32 96, %v3787_v59  ;;  %vm1197_vm2 = vcmp.eq.s32.totalorder %v3844_v49, %v3829_v46 }
 0x17a   :  { %3319 = vmatprep.subr.mxu1 %v763_v51 }
 0x17b   :  { %3320 = vmatpush3.msra.mxu1 %v763_v51  ;;  %v3640_v51 = vmov 1.0   ;;  %vm1196_vm3 = vcmp.eq.s32.totalorder %v3849_v50, %v3829_v46 }
 0x17c   :  { %3322 = vmatmul.mubr.f32.vlgmr.msra.gmra.mxu1 %v759_v52  ;;  %v3857_v52 = vadd.s32 88, %v3787_v59 }
 0x17d   :  { %3324 = vmatprep.mubr.f32.mxu1 %v760_v53  ;;  %v3864_v53 = vadd.s32 80, %v3787_v59 }
 0x17e   :  { %vm1195_vm4 = vcmp.eq.s32.totalorder %v3857_v52, %v3829_v46 }
 0x17f   :  { %vm1194_vm5 = vcmp.eq.s32.totalorder %v3864_v53, %v3829_v46 }
 0x180   :  { %3325 = vmatmul.mubr.f32.gmra.mxu1 %v761_v54  ;;  %v3871_v54 = vadd.s32 72, %v3787_v59 }
 0x181   :  { %1417 = vmatprep.mubr.f32.mxu1 %v3639_v0 }
 0x182   :  { %vm1193_vm6 = vcmp.eq.s32.totalorder %v3871_v54, %v3829_v46 }
 0x214   :  { %v3285_v61 = vpop.f32.mrf.mxu0 }
 0x216   :  { %v735_v1 = vpop.f32.mrf.mxu0 }
 0x218   :  { %v3288_v8 = vpop.f32.mrf.mxu0 }
 0x21a   :  { %v745_v11 = vpop.f32.mrf.mxu0 }
 0x21c   :  { %v3247_v62 = vpop.f32.mrf.mxu1  ;;  %v3333_v12 = vpop.f32.mrf.mxu0 }
 0x21d   :  { %v645_v13 = vadd.f32 %v3247_v62, %v538_v9  ;;  %v3905_v62 = vadd.s32 40, %v3787_v59 }
 0x21e   :  { %v625_v7 = vpop.f32.mrf.mxu1  ;;  %v948_v18 = vpop.f32.mrf.mxu0 }
 0x21f   :  { %v644_v15 = vadd.f32 %v625_v7, %v538_v9  ;;  %v755_v19 = vadd.f32 %v3285_v61, %v645_v13  ;;  %v3900_v61 = vadd.s32 48, %v3787_v59  ;;  %v1169_v7 = vadd.s32 16, %v3787_v59  ;;  %v1348_v13 = vld [vmem:[#allocation14 + $0xd8] sm:$0xff] }
 0x220   :  { %v3250_v10 = vpop.f32.mrf.mxu1 }
 0x221   :  { %v647_v16 = vadd.f32 %v3250_v10, %v538_v9  ;;  %v754_v22 = vadd.f32 %v735_v1, %v644_v15  ;;  %v3912_v1 = vadd.s32 32, %v3787_v59  ;;  %vm1186_vm13 = vcmp.eq.s32.totalorder %v1169_v7, %v3829_v46  ;;  %v1468_v10 = vld [vmem:[#allocation14 + $0x1f8] sm:$0xff]  ;;  %v1346_v15 = vld [vmem:[#allocation14 + $0xc8] sm:$0xff] }
 0x222   :  { %v635_v14 = vpop.f32.mrf.mxu1  ;;  %v3336_v26 = vpop.f32.mrf.mxu0  ;;  %v1450_v7 = vld [vmem:[#allocation14 + $0x168] sm:$0xff] }
 0x223   :  { %v646_v20 = vadd.f32 %v635_v14, %v538_v9  ;;  %v757_v23 = vadd.f32 %v3288_v8, %v647_v16  ;;  %v1352_v8 = vld [vmem:[#allocation14 + $0xf8] sm:$0xff]  ;;  %v1351_v9 = vld [vmem:[#allocation14 + $0xf0] sm:$0xff]  ;;  %v1345_v16 = vld [vmem:[#allocation14 + $0xc0] sm:$0xff] }
 0x224   :  { %v958_v34 = vpop.f32.mrf.mxu0  ;;  %1353 = vmatprep.subr.mxu1 %v1352_v8  ;;  %v1347_v14 = vld [vmem:[#allocation14 + $0xd0] sm:$0xff]  ;;  %v1449_v8 = vld [vmem:[#allocation14 + $0x160] sm:$0xff] }
 0x225   :  { %v756_v27 = vadd.f32 %v745_v11, %v646_v20  ;;  %v1350_v11 = vld [vmem:[#allocation14 + $0xe8] sm:$0xff]  ;;  %1354 = vmatpush1.msra.mxu1 %v1351_v9  ;;  %v1341_v20 = vld [vmem:[#allocation14 + $0xa0] sm:$0xff]  ;;  %v1448_v9 = vld [vmem:[#allocation14 + $0x158] sm:$0xff] }
 0x226   :  { %1355 = vmatprep.subr.mxu1 %v1350_v11  ;;  %v1446_v11 = vld [vmem:[#allocation14 + $0x148] sm:$0xff] }
 0x23c   :  { %v3323_v17 = vpop.f32.mrf.mxu1 }
 0x23d   :  { %v865_v24 = vadd.f32 %v3323_v17, %v755_v19  ;;  %v1344_v17 = vld [vmem:[#allocation14 + $0xb8] sm:$0xff]  ;;  %v1342_v19 = vld [vmem:[#allocation14 + $0xa8] sm:$0xff] }
 0x23e   :  { %v845_v21 = vpop.f32.mrf.mxu1 }
 0x23f   :  { %v864_v28 = vadd.f32 %v845_v21, %v754_v22  ;;  %v968_v31 = vadd.f32 %v3333_v12, %v865_v24  ;;  %v1349_v12 = vld [vmem:[#allocation14 + $0xe0] sm:$0xff]  ;;  %v1340_v21 = vld [vmem:[#allocation14 + $0x98] sm:$0xff]  ;;  %v1339_v22 = vld [vmem:[#allocation14 + $0x90] sm:$0xff] }
 0x240   :  { %v3326_v25 = vpop.f32.mrf.mxu1  ;;  %1356 = vmatpush1.msra.mxu1 %v1349_v12  ;;  %v1337_v24 = vld [vmem:[#allocation14 + $0x80] sm:$0xff] }
 0x241   :  { %v867_v63 = vadd.f32 %v3326_v25, %v757_v23  ;;  %v967_v35 = vadd.f32 %v948_v18, %v864_v28  ;;  %v976_v39 = vmul.f32 0.01, %v968_v31  ;;  %vm972_vm11 = vcmp.gt.f32.partialorder %v968_v31, 0.0  ;;  %1357 = vmatprep.subr.mxu1 %v1348_v13  ;;  %v1343_v18 = vld [vmem:[#allocation14 + $0xb0] sm:$0xff]  ;;  %v1338_v23 = vld [vmem:[#allocation14 + $0x88] sm:$0xff]  ;;  %v1336_v25 = vld [vmem:[#allocation14 + $0x78] sm:$0xff] }
 0x242   :  { %v855_v29 = vpop.f32.mrf.mxu1  ;;  %1358 = vmatpush1.msra.mxu1 %v1347_v14  ;;  %v1333_v28 = vld [vmem:[#allocation14 + $0x60] sm:$0xff]  ;;  %v1444_v13 = vld [vmem:[#allocation14 + $0x138] sm:$0xff]  ;;  %v1443_v14 = vld [vmem:[#allocation14 + $0x130] sm:$0xff] }
 0x243   :  { %v970_v32 = vadd.f32 %v3336_v26, %v867_v63  ;;  %v866_v33 = vadd.f32 %v855_v29, %v756_v27  ;;  %v975_v3 = vmul.f32 0.01, %v967_v35  ;;  %vm971_vm12 = vcmp.gt.f32.partialorder %v967_v35, 0.0  ;;  %1359 = vmatprep.subr.mxu1 %v1346_v15  ;;  %v1335_v26 = vld [vmem:[#allocation14 + $0x70] sm:$0xff]  ;;  %v1334_v27 = vld [vmem:[#allocation14 + $0x68] sm:$0xff]  ;;  %v1445_v12 = vld [vmem:[#allocation14 + $0x140] sm:$0xff] }
 0x244   :  { %v980_v43 = vsel %vm972_vm11, %v968_v31, %v976_v39  ;;  %vm1188_vm11 = vcmp.eq.s32.totalorder %v3912_v1, %v3829_v46  ;;  %1360 = vmatpush1.msra.mxu1 %v1345_v16  ;;  %v1462_v39 = vld [vmem:[#allocation14 + $0x1c8] sm:$0xff]  ;;  %v1332_v16 = vld [vmem:[#allocation14 + $0x58] sm:$0xff] }
 0x245   :  { %vm974_vm9 = vcmp.gt.f32.partialorder %v970_v32, 0.0  ;;  %v978_v36 = vmul.f32 0.01, %v970_v32  ;;  %v969_v37 = vadd.f32 %v958_v34, %v866_v33  ;;  %v979_v4 = vsel %vm971_vm12, %v967_v35, %v975_v3  ;;  %1361 = vmatprep.subr.mxu1 %v1344_v17  ;;  %v1467_v34 = vld [vmem:[#allocation14 + $0x1f0] sm:$0xff]  ;;  %v1466_v35 = vld [vmem:[#allocation14 + $0x1e8] sm:$0xff]  ;;  %v1441_v17 = vld [vmem:[#allocation14 + $0x120] sm:$0xff] }
 0x246   :  { %vm1187_vm12 = vcmp.eq.s32.totalorder %v1170_v2, %v3829_v46  ;;  %1362 = vmatpush1.msra.mxu1 %v1343_v18  ;;  %v1459_v3 = vld [vmem:[#allocation14 + $0x1b0] sm:$0xff]  ;;  %v1442_v15 = vld [vmem:[#allocation14 + $0x128] sm:$0xff] }
 0x247   :  { %vm973_vm10 = vcmp.gt.f32.partialorder %v969_v37, 0.0  ;;  %v977_v40 = vmul.f32 0.01, %v969_v37  ;;  %v982_v41 = vsel %vm974_vm9, %v970_v32, %v978_v36  ;;  %vm1190_vm9 = vcmp.eq.s32.totalorder %v3900_v61, %v3829_v46  ;;  %1363 = vmatprep.subr.mxu1 %v1342_v19  ;;  %v1465_v36 = vld [vmem:[#allocation14 + $0x1e0] sm:$0xff]  ;;  %v1451_v2 = vld [vmem:[#allocation14 + $0x170] sm:$0xff]  ;;  %v1440_v19 = vld [vmem:[#allocation14 + $0x118] sm:$0xff] }
 0x248   :  { %3337 = vmatprep.subr.mxu0 %v982_v41  ;;  %1364 = vmatpush1.msra.mxu1 %v1341_v20  ;;  %v1331_v18 = vld [vmem:[#allocation14 + $0x50] sm:$0xff]  ;;  %v1330_v20 = vld [vmem:[#allocation14 + $0x48] sm:$0xff] }
 0x249   :  { %3338 = vmatpush3.msra.mxu0 %v982_v41  ;;  %v981_v42 = vsel %vm973_vm10, %v969_v37, %v977_v40  ;;  %vm1189_vm10 = vcmp.eq.s32.totalorder %v3905_v62, %v3829_v46  ;;  %1365 = vmatprep.subr.mxu1 %v1340_v21  ;;  %v1464_v37 = vld [vmem:[#allocation14 + $0x1d8] sm:$0xff]  ;;  %v1461_v40 = vld [vmem:[#allocation14 + $0x1c0] sm:$0xff]  ;;  %v1439_v21 = vld [vmem:[#allocation14 + $0x110] sm:$0xff] }
 0x24a   :  { %3339 = vmatprep.subr.mxu0 %v981_v42  ;;  %1366 = vmatpush1.msra.mxu1 %v1339_v22  ;;  %v1329_v22 = vld [vmem:[#allocation14 + $0x40] sm:$0xff] }
 0x24b   :  { %3340 = vmatpush3.msra.mxu0 %v981_v42  ;;  %1367 = vmatprep.subr.mxu1 %v1338_v23  ;;  %v1438_v23 = vld [vmem:[#allocation14 + $0x108] sm:$0xff] }
 0x24c   :  { %3341 = vmatprep.subr.mxu0 %v980_v43  ;;  %1368 = vmatpush1.msra.mxu1 %v1337_v24  ;;  %v1328_v24 = vld [vmem:[#allocation14 + $0x38] sm:$0xff] }
 0x24d   :  { %3342 = vmatpush3.msra.mxu0 %v980_v43  ;;  %1369 = vmatprep.subr.mxu1 %v1336_v25  ;;  %v1437_v25 = vld [vmem:[#allocation14 + $0x100] sm:$0xff] }
 0x24e   :  { %3343 = vmatprep.subr.mxu0 %v979_v4  ;;  %1370 = vmatpush1.msra.mxu1 %v1335_v26  ;;  %v1327_v26 = vld [vmem:[#allocation14 + $0x30] sm:$0xff] }
 0x24f   :  { %3344 = vmatpush3.msra.mxu0 %v979_v4  ;;  %1371 = vmatprep.subr.mxu1 %v1334_v27  ;;  %v1326_v27 = vld [vmem:[#allocation14 + $0x28] sm:$0xff] }
 0x250   :  { %3346 = vmatmul.mubr.msk.f32.vlgmr.msra.gmra.mxu0 %vm996_vm7, %v2939_v5  ;;  %3348 = vmatprep.subr.mxu0 %v982_v41  ;;  %v1455_v5 = vld [vmem:[#allocation14 + $0x190] sm:$0xff] }
 0x251   :  { %3349 = vmatpush3.msra.mxu0 %v982_v41  ;;  %3356 = vmatprep.mubr.msk.f32.mxu0 %vm996_vm7, %v3825_v44  ;;  %v1460_v41 = vld [vmem:[#allocation14 + $0x1b8] sm:$0xff] }
 0x252   :  { %3350 = vmatprep.subr.mxu0 %v981_v42  ;;  %1372 = vmatpush1.msra.mxu1 %v1333_v28  ;;  %v1325_v28 = vld [vmem:[#allocation14 + $0x20] sm:$0xff] }
 0x253   :  { %3351 = vmatpush3.msra.mxu0 %v981_v42  ;;  %v1458_v42 = vld [vmem:[#allocation14 + $0x1a8] sm:$0xff]  ;;  %1373 = vmatprep.subr.mxu1 %v1332_v16  ;;  %v1728_v16 = vld [vmem:[#allocation15 + $0x90] sm:$0xff] }
 0x254   :  { %3352 = vmatprep.subr.mxu0 %v980_v43  ;;  %1374 = vmatpush1.msra.mxu1 %v1331_v18  ;;  %v1727_v18 = vld [vmem:[#allocation15 + $0x88] sm:$0xff] }
 0x255   :  { %3353 = vmatpush3.msra.mxu0 %v980_v43  ;;  %v1457_v43 = vld [vmem:[#allocation14 + $0x1a0] sm:$0xff]  ;;  %1375 = vmatprep.subr.mxu1 %v1330_v20 }
 0x256   :  { %3354 = vmatprep.subr.mxu0 %v979_v4  ;;  %1376 = vmatpush1.msra.mxu1 %v1329_v22  ;;  %v1573_v20 = vld [vmem:[#allocation14 + $0x2a0] sm:$0xff]  ;;  %v1571_v22 = vld [vmem:[#allocation14 + $0x290] sm:$0xff] }
 0x257   :  { %3355 = vmatpush3.msra.mxu0 %v979_v4  ;;  %v1456_v4 = vld [vmem:[#allocation14 + $0x198] sm:$0xff]  ;;  %1377 = vmatprep.subr.mxu1 %v1328_v24  ;;  %v1569_v24 = vld [vmem:[#allocation14 + $0x280] sm:$0xff] }
 0x258   :  { %3357 = vmatmul.mubr.msk.f32.vlgmr.msra.gmra.mxu0 %vm996_vm7, %v2943_v48  ;;  %3359 = vmatprep.subr.msk.mxu0 %vm1199_vm15, %v3640_v51  ;;  %vm1192_vm7 = vcmp.eq.s32.totalorder %v3878_v56, %v3829_v46  ;;  %v1453_v46 = vld [vmem:[#allocation14 + $0x180] sm:$0xff]  ;;  %v1452_v48 = vld [vmem:[#allocation14 + $0x178] sm:$0xff] }
 0x259   :  { %3360 = vmatpush3.msk.msra.mxu0 %vm1199_vm15, %v3640_v51  ;;  %1378 = vmatpush1.msra.mxu1 %v1327_v26  ;;  %v1567_v26 = vld [vmem:[#allocation14 + $0x270] sm:$0xff]  ;;  %vm168_vm15 = vcmp.lt.s32.totalorder %v166_v57, 256  ;;  %v1930_v57 = vld [vmem:[#allocation15 + $0x348] sm:$0xff] }
 0x25a   :  { %3361 = vmatprep.subr.msk.mxu0 %vm1198_vm0, %v3640_v51  ;;  %1379 = vmatprep.subr.mxu1 %v1326_v27  ;;  %v1566_v27 = vld [vmem:[#allocation14 + $0x268] sm:$0xff]  ;;  %170 = vst.msk [vmem:[#allocation5] ss:$8 sm:$0x3] %vm168_vm15, %v3639_v0 }
 0x25b   :  { %3362 = vmatpush3.msk.msra.mxu0 %vm1198_vm0, %v3640_v51  ;;  %1380 = vmatpush1.msra.mxu1 %v1325_v28  ;;  %v1565_v28 = vld [vmem:[#allocation14 + $0x260] sm:$0xff]  ;;  %173 = vst.msk [vmem:[#allocation5 + $0x20] ss:$8 sm:$0x3] %vm168_vm15, %v3639_v0 }
 0x25c   :  { %3363 = vmatprep.subr.msk.mxu0 %vm1197_vm2, %v3640_v51  ;;  %176 = vst.msk [vmem:[#allocation5 + $0x11] ss:$8 sm:$0x3] %vm168_vm15, %v3639_v0  ;;  %179 = vst.msk [vmem:[#allocation5 + $0x31] ss:$8 sm:$0x3] %vm168_vm15, %v3639_v0 }
 0x25d   :  { %3364 = vmatpush3.msk.msra.mxu0 %vm1197_vm2, %v3640_v51 }
 0x25e   :  { %3365 = vmatprep.subr.msk.mxu0 %vm1196_vm3, %v3640_v51 }
 0x25f   :  { %3366 = vmatpush3.msk.msra.mxu0 %vm1196_vm3, %v3640_v51 }
 0x260   :  { %3367 = vmatprep.subr.msk.mxu0 %vm1195_vm4, %v3640_v51 }
 0x261   :  { %3368 = vmatpush3.msk.msra.mxu0 %vm1195_vm4, %v3640_v51 }
 0x262   :  { %3369 = vmatprep.subr.msk.mxu0 %vm1194_vm5, %v3640_v51 }
 0x263   :  { %3370 = vmatpush3.msk.msra.mxu0 %vm1194_vm5, %v3640_v51  ;;  %vm1871_vm5 = vcmask 1046528  }
 0x264   :  { %3371 = vmatprep.subr.msk.mxu0 %vm1193_vm6, %v3640_v51 }
 0x265   :  { %3372 = vmatpush3.msk.msra.mxu0 %vm1193_vm6, %v3640_v51  ;;  %vm2050_vm6 = vcmask 1045504  }
 0x266   :  { %3373 = vmatprep.subr.msk.mxu0 %vm1192_vm7, %v3640_v51 }
 0x267   :  { %3374 = vmatpush3.msk.msra.mxu0 %vm1192_vm7, %v3640_v51 }
 0x268   :  { %3375 = vmatprep.subr.msk.mxu0 %vm1191_vm8, %v3640_v51 }
 0x269   :  { %3376 = vmatpush3.msk.msra.mxu0 %vm1191_vm8, %v3640_v51 }
 0x26a   :  { %3377 = vmatprep.subr.msk.mxu0 %vm1190_vm9, %v3640_v51 }
 0x26b   :  { %3378 = vmatpush3.msk.msra.mxu0 %vm1190_vm9, %v3640_v51 }
 0x26c   :  { %3379 = vmatprep.subr.msk.mxu0 %vm1189_vm10, %v3640_v51 }
 0x26d   :  { %3380 = vmatpush3.msk.msra.mxu0 %vm1189_vm10, %v3640_v51 }
 0x26e   :  { %3381 = vmatprep.subr.msk.mxu0 %vm1188_vm11, %v3640_v51 }
 0x26f   :  { %3382 = vmatpush3.msk.msra.mxu0 %vm1188_vm11, %v3640_v51 }
 0x270   :  { %3383 = vmatprep.subr.msk.mxu0 %vm1187_vm12, %v3640_v51 }
 0x271   :  { %3384 = vmatpush3.msk.msra.mxu0 %vm1187_vm12, %v3640_v51 }
 0x272   :  { %3385 = vmatprep.subr.msk.mxu0 %vm1186_vm13, %v3640_v51 }
 0x273   :  { %3386 = vmatpush3.msk.msra.mxu0 %vm1186_vm13, %v3640_v51 }
 0x274   :  { %3387 = vmatprep.subr.msk.mxu0 %vm1185_vm14, %v3640_v51 }
 0x275   :  { %3388 = vmatpush3.msk.msra.mxu0 %vm1185_vm14, %v3640_v51 }
 0x276   :  { %3389 = vmatprep.subr.mxu0 %v3639_v0 }
 0x277   :  { %3390 = vmatpush3.msra.mxu0 %v3639_v0 }
 0x278   :  { %1469 = vmatprep.subr.mxu0 %v1468_v10  ;;  %v1447_v10 = vld [vmem:[#allocation14 + $0x150] sm:$0xff] }
 0x310   :  { %v3347_v63 = vpop.f32.mrf.mxu0 }
 0x312   :  { %v1069_v29 = vpop.f32.mrf.mxu0 }
 0x318   :  { %v3358_v30 = vpop.f32.mrf.mxu0 }
 0x319   :  { %v3936_v33 = vmax.f32 %v3347_v63, %v3358_v30  ;;  %v1324_v63 = vld [vmem:[#allocation14 + $0x18] sm:$0xff]  ;;  %v1322_v30 = vld [vmem:[#allocation14 + $0x8] sm:$0xff] }
 0x31a   :  { %v1158_v31 = vpop.f32.mrf.mxu0  ;;  %1381 = vmatprep.subr.mxu1 %v1324_v63  ;;  %v1564_v63 = vld [vmem:[#allocation14 + $0x258] sm:$0xff] }
 0x31b   :  { %v3934_v32 = vmax.f32 %v1069_v29, %v1158_v31  ;;  %v1323_v29 = vld [vmem:[#allocation14 + $0x10] sm:$0xff]  ;;  %v1321_v31 = vld [vmem:[#allocation14] sm:$0xff] }
 0x31c   :  { %1382 = vmatpush1.msra.mxu1 %v1323_v29  ;;  %v1563_v29 = vld [vmem:[#allocation14 + $0x250] sm:$0xff] }
 0x31d   :  { %3391 = vmatprep.mubr.f32.mxu0 %v3934_v32  ;;  %1383 = vmatprep.subr.mxu1 %v1322_v30  ;;  %v1562_v30 = vld [vmem:[#allocation14 + $0x248] sm:$0xff] }
 0x31e   :  { %3392 = vmatmul.mubr.f32.vlgmr.msra.gmra.mxu0 %v3936_v33  ;;  %1384 = vmatpush1.msra.mxu1 %v1321_v31  ;;  %v1561_v31 = vld [vmem:[#allocation14 + $0x240] sm:$0xff] }
 0x31f   :  { %1470 = vmatpush1.msra.mxu0 %v1467_v34  ;;  %1533 = vmatprep.mubr.f32.mxu0 %v3639_v0  ;;  %v1584_v34 = vld [vmem:[#allocation14 + $0x2f8] sm:$0xff] }
 0x320   :  { %1471 = vmatprep.subr.mxu0 %v1466_v35  ;;  %1585 = vmatprep.subr.mxu1 %v1584_v34  ;;  %v1741_v35 = vld [vmem:[#allocation15 + $0xf8] sm:$0xff] }
 0x321   :  { %1472 = vmatpush1.msra.mxu0 %v1465_v36  ;;  %v1560_v34 = vld [vmem:[#allocation14 + $0x238] sm:$0xff] }
 0x322   :  { %1473 = vmatprep.subr.mxu0 %v1464_v37 }
 0x323   :  { %1474 = vmatpush1.msra.mxu0 %v1463_v38 }
 0x324   :  { %1475 = vmatprep.subr.mxu0 %v1462_v39 }
 0x325   :  { %1476 = vmatpush1.msra.mxu0 %v1461_v40  ;;  %v1740_v40 = vld [vmem:[#allocation15 + $0xf0] sm:$0xff] }
 0x326   :  { %1477 = vmatprep.subr.mxu0 %v1460_v41  ;;  %v1739_v41 = vld [vmem:[#allocation15 + $0xe8] sm:$0xff] }
 0x327   :  { %1478 = vmatpush1.msra.mxu0 %v1459_v3  ;;  %v1738_v3 = vld [vmem:[#allocation15 + $0xe0] sm:$0xff] }
 0x328   :  { %1479 = vmatprep.subr.mxu0 %v1458_v42  ;;  %v1737_v42 = vld [vmem:[#allocation15 + $0xd8] sm:$0xff] }
 0x329   :  { %1480 = vmatpush1.msra.mxu0 %v1457_v43  ;;  %v1736_v43 = vld [vmem:[#allocation15 + $0xd0] sm:$0xff] }
 0x32a   :  { %1481 = vmatprep.subr.mxu0 %v1456_v4  ;;  %v1735_v4 = vld [vmem:[#allocation15 + $0xc8] sm:$0xff] }
 0x32b   :  { %1482 = vmatpush1.msra.mxu0 %v1455_v5  ;;  %v1733_v5 = vld [vmem:[#allocation15 + $0xb8] sm:$0xff] }
 0x32c   :  { %1483 = vmatprep.subr.mxu0 %v1454_v45  ;;  %v1583_v45 = vld [vmem:[#allocation14 + $0x2f0] sm:$0xff] }
 0x32d   :  { %1484 = vmatpush1.msra.mxu0 %v1453_v46  ;;  %v1582_v46 = vld [vmem:[#allocation14 + $0x2e8] sm:$0xff] }
 0x32e   :  { %1485 = vmatprep.subr.mxu0 %v1452_v48  ;;  %v1732_v48 = vld [vmem:[#allocation15 + $0xb0] sm:$0xff] }
 0x32f   :  { %1486 = vmatpush1.msra.mxu0 %v1451_v2  ;;  %v1581_v2 = vld [vmem:[#allocation14 + $0x2e0] sm:$0xff] }
 0x330   :  { %1487 = vmatprep.subr.mxu0 %v1450_v7  ;;  %v1731_v7 = vld [vmem:[#allocation15 + $0xa8] sm:$0xff] }
 0x331   :  { %1488 = vmatpush1.msra.mxu0 %v1449_v8  ;;  %v1580_v8 = vld [vmem:[#allocation14 + $0x2d8] sm:$0xff] }
 0x332   :  { %1489 = vmatprep.subr.mxu0 %v1448_v9  ;;  %v1579_v9 = vld [vmem:[#allocation14 + $0x2d0] sm:$0xff] }
 0x333   :  { %1490 = vmatpush1.msra.mxu0 %v1447_v10 }
 0x334   :  { %1491 = vmatprep.subr.mxu0 %v1446_v11  ;;  %v1578_v11 = vld [vmem:[#allocation14 + $0x2c8] sm:$0xff] }
 0x335   :  { %1492 = vmatpush1.msra.mxu0 %v1445_v12  ;;  %v1730_v12 = vld [vmem:[#allocation15 + $0xa0] sm:$0xff] }
 0x336   :  { %1493 = vmatprep.subr.mxu0 %v1444_v13  ;;  %v1577_v13 = vld [vmem:[#allocation14 + $0x2c0] sm:$0xff] }
 0x337   :  { %1494 = vmatpush1.msra.mxu0 %v1443_v14  ;;  %v1729_v14 = vld [vmem:[#allocation15 + $0x98] sm:$0xff] }
 0x338   :  { %1495 = vmatprep.subr.mxu0 %v1442_v15  ;;  %v1576_v15 = vld [vmem:[#allocation14 + $0x2b8] sm:$0xff] }
 0x339   :  { %1496 = vmatpush1.msra.mxu0 %v1441_v17  ;;  %v1575_v17 = vld [vmem:[#allocation14 + $0x2b0] sm:$0xff] }
 0x33a   :  { %1497 = vmatprep.subr.mxu0 %v1440_v19  ;;  %v1574_v19 = vld [vmem:[#allocation14 + $0x2a8] sm:$0xff] }
 0x33b   :  { %1498 = vmatpush1.msra.mxu0 %v1439_v21  ;;  %v1572_v21 = vld [vmem:[#allocation14 + $0x298] sm:$0xff] }
 0x33c   :  { %1499 = vmatprep.subr.mxu0 %v1438_v23  ;;  %v1570_v23 = vld [vmem:[#allocation14 + $0x288] sm:$0xff] }
 0x33d   :  { %1500 = vmatpush1.msra.mxu0 %v1437_v25  ;;  %v1568_v25 = vld [vmem:[#allocation14 + $0x278] sm:$0xff] }
 0x33e   :  { %1774 = vmatprep.subr.mxu0 %v1741_v35  ;;  %v1559_v35 = vld [vmem:[#allocation14 + $0x230] sm:$0xff] }
 0x3de   :  { %v3393_v36 = vpop.f32.mrf.mxu0 }
 0x3df   :  { %v1308_v37 = vmax.f32 %v3936_v33, %v3393_v36  ;;  %v1734_v33 = vld [vmem:[#allocation15 + $0xc0] sm:$0xff]  ;;  %v1558_v36 = vld [vmem:[#allocation14 + $0x228] sm:$0xff] }
 0x3e0   :  { %v1298_v38 = vpop.f32.mrf.mxu0 }
 0x3e1   :  { %1310 = vst [vmem:[#allocation4 + $0x11] sm:$0xff] %v1308_v37  ;;  %v1307_v39 = vmax.f32 %v3934_v32, %v1298_v38  ;;  %v1556_v38 = vld [vmem:[#allocation14 + $0x218] sm:$0xff] }
 0x3e3   :  { %1309 = vst [vmem:[#allocation4 + $0x1] sm:$0xff] %v1307_v39  ;;  %1534 = vmatmul.mubr.f32.vlgmr.msra.gmra.mxu0 %v1307_v39  ;;  %v1555_v39 = vld [vmem:[#allocation14 + $0x210] sm:$0xff] }
 0x3e4   :  { %1539 = vmatprep.mubr.f32.mxu0 %v3639_v0  ;;  %1775 = vmatpush1.msra.mxu0 %v1740_v40  ;;  %v1554_v40 = vld [vmem:[#allocation14 + $0x208] sm:$0xff] }
 0x3e5   :  { %1776 = vmatprep.subr.mxu0 %v1739_v41  ;;  %v1553_v41 = vld [vmem:[#allocation14 + $0x200] sm:$0xff] }
 0x3e6   :  { %1777 = vmatpush1.msra.mxu0 %v1738_v3  ;;  %v1920_v3 = vld [vmem:[#allocation15 + $0x2f8] sm:$0xff] }
 0x3e7   :  { %1540 = vmatmul.mubr.f32.gmra.mxu0 %v1308_v37  ;;  %1778 = vmatprep.subr.mxu0 %v1737_v42  ;;  %v1557_v37 = vld [vmem:[#allocation14 + $0x220] sm:$0xff]  ;;  %v1919_v42 = vld [vmem:[#allocation15 + $0x2f0] sm:$0xff] }
 0x3e8   :  { %1779 = vmatpush1.msra.mxu0 %v1736_v43  ;;  %v1320_v10 = vld [vmem:[#allocation4 + $0x10] sm:$0xff] }
 0x3e9   :  { %1780 = vmatprep.subr.mxu0 %v1735_v4  ;;  %v1918_v4 = vld [vmem:[#allocation15 + $0x2e8] sm:$0xff] }
 0x3ea   :  { %v1319_v32 = vld [vmem:[#allocation4] sm:$0xff]  ;;  %1781 = vmatpush1.msra.mxu0 %v1734_v33 }
 0x3eb   :  { %1418 = vmatmul.mubr.f32.vlgmr.msra.gmra.mxu1 %v1319_v32  ;;  %1782 = vmatprep.subr.mxu0 %v1733_v5  ;;  %v1550_v43 = vld [vmem:[#allocation4 + $0x2] sm:$0xff]  ;;  %v1916_v5 = vld [vmem:[#allocation15 + $0x2d8] sm:$0xff] }
 0x3ec   :  { %1586 = vmatpush1.msra.mxu1 %v1583_v45  ;;  %1423 = vmatprep.mubr.f32.mxu1 %v3639_v0  ;;  %v1917_v33 = vld [vmem:[#allocation15 + $0x2e0] sm:$0xff]  ;;  %v1915_v45 = vld [vmem:[#allocation15 + $0x2d0] sm:$0xff] }
 0x3ed   :  { %1587 = vmatprep.subr.mxu1 %v1582_v46  ;;  %1783 = vmatpush1.msra.mxu0 %v1732_v48  ;;  %v1551_v32 = vld [vmem:[#allocation4 + $0x12] sm:$0xff]  ;;  %v1914_v46 = vld [vmem:[#allocation15 + $0x2c8] sm:$0xff]  ;;  %v1913_v48 = vld [vmem:[#allocation15 + $0x2c0] sm:$0xff] }
 0x3ee   :  { %1588 = vmatpush1.msra.mxu1 %v1581_v2  ;;  %1784 = vmatprep.subr.mxu0 %v1731_v7  ;;  %v1912_v2 = vld [vmem:[#allocation15 + $0x2b8] sm:$0xff]  ;;  %v1911_v7 = vld [vmem:[#allocation15 + $0x2b0] sm:$0xff] }
 0x3ef   :  { %1589 = vmatprep.subr.mxu1 %v1580_v8  ;;  %1424 = vmatmul.mubr.f32.gmra.mxu1 %v1320_v10  ;;  %v1910_v8 = vld [vmem:[#allocation15 + $0x2a8] sm:$0xff]  ;;  %v1726_v10 = vld [vmem:[#allocation15 + $0x80] sm:$0xff] }
 0x3f0   :  { %1590 = vmatpush1.msra.mxu1 %v1579_v9  ;;  %1649 = vmatprep.mubr.f32.mxu1 %v3639_v0  ;;  %v1909_v9 = vld [vmem:[#allocation15 + $0x2a0] sm:$0xff] }
 0x3f1   :  { %1591 = vmatprep.subr.mxu1 %v1578_v11  ;;  %1785 = vmatpush1.msra.mxu0 %v1730_v12  ;;  %v1908_v11 = vld [vmem:[#allocation15 + $0x298] sm:$0xff] }
 0x3f2   :  { %1592 = vmatpush1.msra.mxu1 %v1577_v13  ;;  %1786 = vmatprep.subr.mxu0 %v1729_v14  ;;  %v1725_v12 = vld [vmem:[#allocation15 + $0x78] sm:$0xff]  ;;  %v1907_v13 = vld [vmem:[#allocation15 + $0x290] sm:$0xff] }
 0x3f3   :  { %1593 = vmatprep.subr.mxu1 %v1576_v15  ;;  %1787 = vmatpush1.msra.mxu0 %v1728_v16  ;;  %v1724_v14 = vld [vmem:[#allocation15 + $0x70] sm:$0xff]  ;;  %v1906_v15 = vld [vmem:[#allocation15 + $0x288] sm:$0xff] }
 0x3f4   :  { %1594 = vmatpush1.msra.mxu1 %v1575_v17  ;;  %1788 = vmatprep.subr.mxu0 %v1727_v18  ;;  %v1723_v16 = vld [vmem:[#allocation15 + $0x68] sm:$0xff]  ;;  %v1905_v17 = vld [vmem:[#allocation15 + $0x280] sm:$0xff] }
 0x3f5   :  { %1595 = vmatprep.subr.mxu1 %v1574_v19  ;;  %1789 = vmatpush1.msra.mxu0 %v1726_v10  ;;  %v1722_v18 = vld [vmem:[#allocation15 + $0x60] sm:$0xff]  ;;  %v1904_v19 = vld [vmem:[#allocation15 + $0x278] sm:$0xff]  ;;  %v1950_v10 = vld [vmem:[#allocation15 + $0x3e8] sm:$0xff] }
 0x3f6   :  { %1596 = vmatpush1.msra.mxu1 %v1573_v20  ;;  %1790 = vmatprep.subr.mxu0 %v1725_v12  ;;  %v1721_v20 = vld [vmem:[#allocation15 + $0x58] sm:$0xff]  ;;  %v1949_v12 = vld [vmem:[#allocation15 + $0x3e0] sm:$0xff] }
 0x3f7   :  { %1597 = vmatprep.subr.mxu1 %v1572_v21  ;;  %1791 = vmatpush1.msra.mxu0 %v1724_v14  ;;  %v1903_v21 = vld [vmem:[#allocation15 + $0x270] sm:$0xff]  ;;  %v1948_v14 = vld [vmem:[#allocation15 + $0x3d8] sm:$0xff] }
 0x3f8   :  { %1598 = vmatpush1.msra.mxu1 %v1571_v22  ;;  %1792 = vmatprep.subr.mxu0 %v1723_v16  ;;  %v1720_v22 = vld [vmem:[#allocation15 + $0x50] sm:$0xff] }
 0x3f9   :  { %1599 = vmatprep.subr.mxu1 %v1570_v23  ;;  %1793 = vmatpush1.msra.mxu0 %v1722_v18  ;;  %v1902_v23 = vld [vmem:[#allocation15 + $0x268] sm:$0xff]  ;;  %v1947_v16 = vld [vmem:[#allocation15 + $0x3d0] sm:$0xff] }
 0x3fa   :  { %1600 = vmatpush1.msra.mxu1 %v1569_v24  ;;  %1794 = vmatprep.subr.mxu0 %v1721_v20  ;;  %v1719_v24 = vld [vmem:[#allocation15 + $0x48] sm:$0xff]  ;;  %v1945_v20 = vld [vmem:[#allocation15 + $0x3c0] sm:$0xff] }
 0x3fb   :  { %1601 = vmatprep.subr.mxu1 %v1568_v25  ;;  %1795 = vmatpush1.msra.mxu0 %v1720_v22  ;;  %v1901_v25 = vld [vmem:[#allocation15 + $0x260] sm:$0xff]  ;;  %v1946_v18 = vld [vmem:[#allocation15 + $0x3c8] sm:$0xff]  ;;  %v1944_v22 = vld [vmem:[#allocation15 + $0x3b8] sm:$0xff] }
 0x3fc   :  { %1602 = vmatpush1.msra.mxu1 %v1567_v26  ;;  %1796 = vmatprep.subr.mxu0 %v1719_v24  ;;  %v1718_v26 = vld [vmem:[#allocation15 + $0x40] sm:$0xff]  ;;  %v1943_v24 = vld [vmem:[#allocation15 + $0x3b0] sm:$0xff] }
 0x3fd   :  { %1603 = vmatprep.subr.mxu1 %v1566_v27  ;;  %v1900_v27 = vld [vmem:[#allocation15 + $0x258] sm:$0xff]  ;;  %1797 = vmatpush1.msra.mxu0 %v1718_v26  ;;  %v1942_v26 = vld [vmem:[#allocation15 + $0x3a8] sm:$0xff] }
 0x3fe   :  { %1604 = vmatpush1.msra.mxu1 %v1565_v28  ;;  %v1717_v28 = vld [vmem:[#allocation15 + $0x38] sm:$0xff] }
 0x3ff   :  { %1605 = vmatprep.subr.mxu1 %v1564_v63  ;;  %v1899_v63 = vld [vmem:[#allocation15 + $0x250] sm:$0xff]  ;;  %1798 = vmatprep.subr.mxu0 %v1717_v28  ;;  %v1941_v28 = vld [vmem:[#allocation15 + $0x3a0] sm:$0xff] }
 0x400   :  { %1606 = vmatpush1.msra.mxu1 %v1563_v29  ;;  %v1716_v29 = vld [vmem:[#allocation15 + $0x30] sm:$0xff] }
 0x401   :  { %1607 = vmatprep.subr.mxu1 %v1562_v30  ;;  %v1898_v30 = vld [vmem:[#allocation15 + $0x248] sm:$0xff]  ;;  %1799 = vmatpush1.msra.mxu0 %v1716_v29  ;;  %v1940_v29 = vld [vmem:[#allocation15 + $0x398] sm:$0xff] }
 0x402   :  { %1608 = vmatpush1.msra.mxu1 %v1561_v31  ;;  %v1715_v31 = vld [vmem:[#allocation15 + $0x28] sm:$0xff] }
 0x403   :  { %1609 = vmatprep.subr.mxu1 %v1560_v34  ;;  %v1897_v34 = vld [vmem:[#allocation15 + $0x240] sm:$0xff]  ;;  %1800 = vmatprep.subr.mxu0 %v1715_v31  ;;  %v1939_v31 = vld [vmem:[#allocation15 + $0x390] sm:$0xff] }
 0x404   :  { %1610 = vmatpush1.msra.mxu1 %v1559_v35  ;;  %v1714_v35 = vld [vmem:[#allocation15 + $0x20] sm:$0xff] }
 0x405   :  { %1611 = vmatprep.subr.mxu1 %v1558_v36  ;;  %v1896_v36 = vld [vmem:[#allocation15 + $0x238] sm:$0xff]  ;;  %1801 = vmatpush1.msra.mxu0 %v1714_v35  ;;  %v1938_v35 = vld [vmem:[#allocation15 + $0x388] sm:$0xff] }
 0x406   :  { %1612 = vmatpush1.msra.mxu1 %v1557_v37  ;;  %v1713_v37 = vld [vmem:[#allocation15 + $0x18] sm:$0xff] }
 0x407   :  { %1613 = vmatprep.subr.mxu1 %v1556_v38  ;;  %v1895_v38 = vld [vmem:[#allocation15 + $0x230] sm:$0xff]  ;;  %1802 = vmatprep.subr.mxu0 %v1713_v37  ;;  %v1937_v37 = vld [vmem:[#allocation15 + $0x380] sm:$0xff] }
 0x408   :  { %1614 = vmatpush1.msra.mxu1 %v1555_v39  ;;  %v1712_v39 = vld [vmem:[#allocation15 + $0x10] sm:$0xff] }
 0x409   :  { %1615 = vmatprep.subr.mxu1 %v1554_v40  ;;  %v1894_v40 = vld [vmem:[#allocation15 + $0x228] sm:$0xff]  ;;  %1803 = vmatpush1.msra.mxu0 %v1712_v39  ;;  %v1936_v39 = vld [vmem:[#allocation15 + $0x378] sm:$0xff] }
 0x40a   :  { %1616 = vmatpush1.msra.mxu1 %v1553_v41  ;;  %v1711_v41 = vld [vmem:[#allocation15 + $0x8] sm:$0xff] }
 0x40b   :  { %1650 = vmatmul.mubr.f32.vlgmr.msra.gmra.mxu1 %v1550_v43  ;;  %1953 = vmatprep.subr.mxu1 %v1920_v3  ;;  %v1893_v3 = vld [vmem:[#allocation15 + $0x220] sm:$0xff]  ;;  %v1892_v43 = vld [vmem:[#allocation15 + $0x218] sm:$0xff] }
 0x40c   :  { %1655 = vmatprep.mubr.f32.mxu1 %v3639_v0  ;;  %1954 = vmatpush1.msra.mxu1 %v1919_v42  ;;  %v1710_v42 = vld [vmem:[#allocation15] sm:$0xff] }
 0x40d   :  { %1955 = vmatprep.subr.mxu1 %v1918_v4  ;;  %v1773_v4 = vld [vmem:[#allocation15 + $0x1f8] sm:$0xff]  ;;  %1804 = vmatprep.subr.mxu0 %v1711_v41  ;;  %v1935_v41 = vld [vmem:[#allocation15 + $0x370] sm:$0xff] }
 0x40e   :  { %1956 = vmatpush1.msra.mxu1 %v1917_v33  ;;  %v1891_v33 = vld [vmem:[#allocation15 + $0x210] sm:$0xff]  ;;  %1805 = vmatpush1.msra.mxu0 %v1710_v42  ;;  %v1934_v42 = vld [vmem:[#allocation15 + $0x368] sm:$0xff] }
 0x40f   :  { %1656 = vmatmul.mubr.f32.gmra.mxu1 %v1551_v32  ;;  %1957 = vmatprep.subr.mxu1 %v1916_v5  ;;  %v1772_v5 = vld [vmem:[#allocation15 + $0x1f0] sm:$0xff]  ;;  %v1771_v32 = vld [vmem:[#allocation15 + $0x1e8] sm:$0xff] }
 0x410   :  { %1958 = vmatpush1.msra.mxu1 %v1915_v45  ;;  %v1890_v45 = vld [vmem:[#allocation15 + $0x208] sm:$0xff]  ;;  %1806 = vmatprep.subr.mxu0 %v1773_v4  ;;  %v1933_v4 = vld [vmem:[#allocation15 + $0x360] sm:$0xff] }
 0x411   :  { %1959 = vmatprep.subr.mxu1 %v1914_v46  ;;  %v1889_v46 = vld [vmem:[#allocation15 + $0x200] sm:$0xff]  ;;  %1807 = vmatpush2.msra.mxu0 %v1772_v5  ;;  %v1932_v5 = vld [vmem:[#allocation15 + $0x358] sm:$0xff] }
 0x412   :  { %1960 = vmatpush1.msra.mxu1 %v1913_v48  ;;  %v1770_v48 = vld [vmem:[#allocation15 + $0x1e0] sm:$0xff]  ;;  %1808 = vmatprep.subr.mxu0 %v1771_v32  ;;  %v1931_v32 = vld [vmem:[#allocation15 + $0x350] sm:$0xff] }
 0x413   :  { %1961 = vmatprep.subr.mxu1 %v1912_v2  ;;  %v1952_v2 = vld [vmem:[#allocation15 + $0x3f8] sm:$0xff]  ;;  %1809 = vmatpush2.msra.mxu0 %v1770_v48  ;;  %v1747_v48 = vld [vmem:[#allocation15 + $0x128] sm:$0xff] }
 0x414   :  { %1962 = vmatpush1.msra.mxu1 %v1911_v7  ;;  %v1769_v7 = vld [vmem:[#allocation15 + $0x1d8] sm:$0xff] }
 0x415   :  { %1963 = vmatprep.subr.mxu1 %v1910_v8  ;;  %v1951_v8 = vld [vmem:[#allocation15 + $0x3f0] sm:$0xff]  ;;  %1810 = vmatprep.subr.mxu0 %v1769_v7  ;;  %v1746_v7 = vld [vmem:[#allocation15 + $0x120] sm:$0xff] }
 0x416   :  { %1964 = vmatpush1.msra.mxu1 %v1909_v9  ;;  %v1768_v9 = vld [vmem:[#allocation15 + $0x1d0] sm:$0xff] }
 0x417   :  { %1965 = vmatprep.subr.mxu1 %v1908_v11  ;;  %v1767_v11 = vld [vmem:[#allocation15 + $0x1c8] sm:$0xff]  ;;  %1811 = vmatpush2.msra.mxu0 %v1768_v9  ;;  %v1745_v9 = vld [vmem:[#allocation15 + $0x118] sm:$0xff] }
 0x418   :  { %1966 = vmatpush1.msra.mxu1 %v1907_v13  ;;  %v1766_v13 = vld [vmem:[#allocation15 + $0x1c0] sm:$0xff]  ;;  %1812 = vmatprep.subr.mxu0 %v1767_v11  ;;  %v1744_v11 = vld [vmem:[#allocation15 + $0x110] sm:$0xff] }
 0x419   :  { %1967 = vmatprep.subr.mxu1 %v1906_v15  ;;  %v1765_v15 = vld [vmem:[#allocation15 + $0x1b8] sm:$0xff]  ;;  %1813 = vmatpush2.msra.mxu0 %v1766_v13  ;;  %v1743_v13 = vld [vmem:[#allocation15 + $0x108] sm:$0xff] }
 0x41a   :  { %1968 = vmatpush1.msra.mxu1 %v1905_v17  ;;  %v1764_v17 = vld [vmem:[#allocation15 + $0x1b0] sm:$0xff]  ;;  %1814 = vmatprep.subr.mxu0 %v1765_v15  ;;  %v1742_v15 = vld [vmem:[#allocation15 + $0x100] sm:$0xff] }
 0x41b   :  { %1969 = vmatprep.subr.mxu1 %v1904_v19  ;;  %v1763_v19 = vld [vmem:[#allocation15 + $0x1a8] sm:$0xff]  ;;  %1815 = vmatpush2.msra.mxu0 %v1764_v17  ;;  %v1923_v17 = vld [vmem:[#allocation15 + $0x310] sm:$0xff] }
 0x41c   :  { %1970 = vmatpush1.msra.mxu1 %v1903_v21  ;;  %v1762_v21 = vld [vmem:[#allocation15 + $0x1a0] sm:$0xff]  ;;  %1816 = vmatprep.subr.mxu0 %v1763_v19  ;;  %v1922_v19 = vld [vmem:[#allocation15 + $0x308] sm:$0xff] }
 0x41d   :  { %1971 = vmatprep.subr.mxu1 %v1902_v23  ;;  %v1761_v23 = vld [vmem:[#allocation15 + $0x198] sm:$0xff]  ;;  %1817 = vmatpush2.msra.mxu0 %v1762_v21 }
 0x41e   :  { %1972 = vmatpush1.msra.mxu1 %v1901_v25  ;;  %v1760_v25 = vld [vmem:[#allocation15 + $0x190] sm:$0xff]  ;;  %1818 = vmatprep.subr.mxu0 %v1761_v23  ;;  %v2244_v21 = vld [vmem:[#allocation17 + $0xf8] sm:$0xff]  ;;  %v1313_v23 = vsub.s32 2, %v3787_v59 }
 0x41f   :  { %1973 = vmatprep.subr.mxu1 %v1900_v27  ;;  %1819 = vmatpush2.msra.mxu0 %v1760_v25  ;;  %v1759_v27 = vld [vmem:[#allocation15 + $0x188] sm:$0xff] }
 0x420   :  { %1974 = vmatpush1.msra.mxu1 %v1899_v63  ;;  %1820 = vmatprep.subr.mxu0 %v1759_v27  ;;  %v1758_v63 = vld [vmem:[#allocation15 + $0x180] sm:$0xff]  ;;  %v3953_v25 = vld [vmem:[#allocation20 + $0x8] sm:$0xff] }
 0x421   :  { %1975 = vmatprep.subr.mxu1 %v1898_v30  ;;  %1821 = vmatpush2.msra.mxu0 %v1758_v63  ;;  %v1757_v30 = vld [vmem:[#allocation15 + $0x178] sm:$0xff]  ;;  %v1318_v63 = vrot.slane %v3953_v25, %v1313_v23 }
 0x422   :  { %1976 = vmatpush1.msra.mxu1 %v1897_v34  ;;  %1822 = vmatprep.subr.mxu0 %v1757_v30  ;;  %v1756_v34 = vld [vmem:[#allocation15 + $0x170] sm:$0xff] }
 0x423   :  { %1977 = vmatprep.subr.mxu1 %v1896_v36  ;;  %1823 = vmatpush2.msra.mxu0 %v1756_v34  ;;  %v1755_v36 = vld [vmem:[#allocation15 + $0x168] sm:$0xff] }
 0x424   :  { %1978 = vmatpush1.msra.mxu1 %v1895_v38  ;;  %1824 = vmatprep.subr.mxu0 %v1755_v36  ;;  %v1754_v38 = vld [vmem:[#allocation15 + $0x160] sm:$0xff] }
 0x425   :  { %1979 = vmatprep.subr.mxu1 %v1894_v40  ;;  %1825 = vmatpush2.msra.mxu0 %v1754_v38  ;;  %v1753_v40 = vld [vmem:[#allocation15 + $0x158] sm:$0xff] }
 0x426   :  { %1980 = vmatpush1.msra.mxu1 %v1893_v3  ;;  %1826 = vmatprep.subr.mxu0 %v1753_v40  ;;  %v1752_v3 = vld [vmem:[#allocation15 + $0x150] sm:$0xff] }
 0x427   :  { %1981 = vmatprep.subr.mxu1 %v1892_v43  ;;  %1827 = vmatpush2.msra.mxu0 %v1752_v3  ;;  %v1751_v43 = vld [vmem:[#allocation15 + $0x148] sm:$0xff] }
 0x428   :  { %1982 = vmatpush1.msra.mxu1 %v1891_v33  ;;  %1828 = vmatprep.subr.mxu0 %v1751_v43  ;;  %v1750_v33 = vld [vmem:[#allocation15 + $0x140] sm:$0xff] }
 0x429   :  { %1983 = vmatprep.subr.mxu1 %v1890_v45  ;;  %1829 = vmatpush2.msra.mxu0 %v1750_v33  ;;  %v1749_v45 = vld [vmem:[#allocation15 + $0x138] sm:$0xff] }
 0x42a   :  { %1984 = vmatpush1.msra.mxu1 %v1889_v46  ;;  %1830 = vmatprep.subr.mxu0 %v1749_v45  ;;  %v1748_v46 = vld [vmem:[#allocation15 + $0x130] sm:$0xff] }
 0x42b   :  { %1985 = vmatprep.subr.mxu1 %v1952_v2  ;;  %1831 = vmatpush2.msra.mxu0 %v1748_v46  ;;  %v1929_v2 = vld [vmem:[#allocation15 + $0x340] sm:$0xff] }
 0x42c   :  { %1986 = vmatpush2.msra.mxu1 %v1951_v8  ;;  %1832 = vmatprep.subr.mxu0 %v1747_v48  ;;  %v1928_v8 = vld [vmem:[#allocation15 + $0x338] sm:$0xff] }
 0x42d   :  { %1987 = vmatprep.subr.mxu1 %v1950_v10  ;;  %1833 = vmatpush2.msra.mxu0 %v1746_v7  ;;  %v1927_v10 = vld [vmem:[#allocation15 + $0x330] sm:$0xff] }
 0x42e   :  { %1988 = vmatpush2.msra.mxu1 %v1949_v12  ;;  %1834 = vmatprep.subr.mxu0 %v1745_v9  ;;  %v1926_v12 = vld [vmem:[#allocation15 + $0x328] sm:$0xff] }
 0x42f   :  { %1989 = vmatprep.subr.mxu1 %v1948_v14  ;;  %1835 = vmatpush2.msra.mxu0 %v1744_v11  ;;  %v1925_v14 = vld [vmem:[#allocation15 + $0x320] sm:$0xff] }
 0x430   :  { %1990 = vmatpush2.msra.mxu1 %v1947_v16  ;;  %v1924_v16 = vld [vmem:[#allocation15 + $0x318] sm:$0xff]  ;;  %1836 = vmatprep.subr.mxu0 %v1743_v13 }
 0x431   :  { %1991 = vmatprep.subr.mxu1 %v1946_v18  ;;  %1837 = vmatpush2.msra.mxu0 %v1742_v15  ;;  %v2099_v18 = vld [vmem:[#allocation15 + $0x4f8] sm:$0xff] }
 0x432   :  { %1992 = vmatpush2.msra.mxu1 %v1945_v20  ;;  %2132 = vmatprep.subr.mxu0 %v2099_v18  ;;  %v1921_v20 = vld [vmem:[#allocation15 + $0x300] sm:$0xff] }
 0x433   :  { %1993 = vmatprep.subr.mxu1 %v1944_v22 }
 0x434   :  { %1994 = vmatpush2.msra.mxu1 %v1943_v24 }
 0x435   :  { %1995 = vmatprep.subr.mxu1 %v1942_v26  ;;  %v3955_v26 = vld [vmem:[#allocation20] sm:$0xff] }
 0x436   :  { %1996 = vmatpush2.msra.mxu1 %v1941_v28  ;;  %v1314_v27 = vrot.slane %v3955_v26, %v1313_v23 }
 0x437   :  { %1997 = vmatprep.subr.mxu1 %v1940_v29 }
 0x438   :  { %1998 = vmatpush2.msra.mxu1 %v1939_v31 }
 0x439   :  { %1999 = vmatprep.subr.mxu1 %v1938_v35 }
 0x43a   :  { %2000 = vmatpush2.msra.mxu1 %v1937_v37 }
 0x43b   :  { %2001 = vmatprep.subr.mxu1 %v1936_v39 }
 0x43c   :  { %2002 = vmatpush2.msra.mxu1 %v1935_v41 }
 0x43d   :  { %2003 = vmatprep.subr.mxu1 %v1934_v42 }
 0x43e   :  { %2004 = vmatpush2.msra.mxu1 %v1933_v4 }
 0x43f   :  { %2005 = vmatprep.subr.mxu1 %v1932_v5 }
 0x440   :  { %2006 = vmatpush2.msra.mxu1 %v1931_v32 }
 0x441   :  { %2007 = vmatprep.subr.mxu1 %v1930_v57 }
 0x442   :  { %2008 = vmatpush2.msra.mxu1 %v1929_v2 }
 0x443   :  { %2009 = vmatprep.subr.mxu1 %v1928_v8 }
 0x444   :  { %2010 = vmatpush2.msra.mxu1 %v1927_v10 }
 0x445   :  { %2011 = vmatprep.subr.mxu1 %v1926_v12 }
 0x446   :  { %2012 = vmatpush2.msra.mxu1 %v1925_v14 }
 0x447   :  { %2013 = vmatprep.subr.mxu1 %v1924_v16 }
 0x448   :  { %2014 = vmatpush2.msra.mxu1 %v1923_v17 }
 0x449   :  { %2015 = vmatprep.subr.mxu1 %v1922_v19 }
 0x44a   :  { %2016 = vmatpush2.msra.mxu1 %v1921_v20  ;;  %v2098_v20 = vld [vmem:[#allocation15 + $0x4f0] sm:$0xff] }
 0x44b   :  { %2245 = vmatprep.subr.mxu1 %v2244_v21  ;;  %v2097_v21 = vld [vmem:[#allocation15 + $0x4e8] sm:$0xff] }
 0x4a3   :  { %v1535_v28 = vpop.f32.mrf.mxu0 }
 0x4a5   :  { %v1537_v31 = vpop.f32.mrf.mxu0 }
 0x4a7   :  { %v1541_v38 = vpop.f32.mrf.mxu0 }
 0x4a9   :  { %v1543_v4 = vpop.f32.mrf.mxu0 }
 0x4ab   :  { %v1419_v22 = vpop.f32.mrf.mxu1 }
 0x4ac   :  { %v1430_v30 = vadd.f32 %v1419_v22, %v1314_v27 }
 0x4ad   :  { %v1421_v24 = vpop.f32.mrf.mxu1 }
 0x4ae   :  { %v1431_v34 = vadd.f32 %v1421_v24, %v1318_v63  ;;  %v1546_v36 = vadd.f32 %v1535_v28, %v1430_v30 }
 0x4af   :  { %v1425_v29 = vpop.f32.mrf.mxu1 }
 0x4b0   :  { %v1432_v37 = vadd.f32 %v1425_v29, %v1314_v27  ;;  %v1547_v41 = vadd.f32 %v1537_v31, %v1431_v34  ;;  %v2096_v34 = vld [vmem:[#allocation15 + $0x4e0] sm:$0xff] }
 0x4b1   :  { %v1427_v35 = vpop.f32.mrf.mxu1 }
 0x4b2   :  { %v1433_v39 = vadd.f32 %v1427_v35, %v1318_v63  ;;  %v1548_v43 = vadd.f32 %v1541_v38, %v1432_v37  ;;  %v2095_v35 = vld [vmem:[#allocation15 + $0x4d8] sm:$0xff]  ;;  %v2243_v37 = vld [vmem:[#allocation17 + $0xf0] sm:$0xff] }
 0x4b4   :  { %v1549_v45 = vadd.f32 %v1543_v4, %v1433_v39 }
 0x4cb   :  { %v1651_v40 = vpop.f32.mrf.mxu1 }
 0x4cc   :  { %v1662_v3 = vadd.f32 %v1651_v40, %v1546_v36 }
 0x4cd   :  { %v1653_v42 = vpop.f32.mrf.mxu1 }
 0x4ce   :  { %vm1666_vm0 = vcmp.gt.f32.partialorder %v1662_v3, 0.0  ;;  %v1670_v33 = vmul.f32 0.01, %v1662_v3  ;;  %v1663_v5 = vadd.f32 %v1653_v42, %v1547_v41 }
 0x4cf   :  { %v1657_v32 = vpop.f32.mrf.mxu1 }
 0x4d0   :  { %v1674_v46 = vsel %vm1666_vm0, %v1662_v3, %v1670_v33  ;;  %vm1667_vm2 = vcmp.gt.f32.partialorder %v1663_v5, 0.0  ;;  %v1671_v57 = vmul.f32 0.01, %v1663_v5  ;;  %v1664_v48 = vadd.f32 %v1657_v32, %v1548_v43  ;;  %v2094_v33 = vld [vmem:[#allocation15 + $0x4d0] sm:$0xff] }
 0x4d1   :  { %v1682_v2 = vrot.slane %v1674_v46, 7  ;;  %v1659_v7 = vpop.f32.mrf.mxu1 }
 0x4d2   :  { %v1675_v8 = vsel %vm1667_vm2, %v1663_v5, %v1671_v57  ;;  %vm1668_vm3 = vcmp.gt.f32.partialorder %v1664_v48, 0.0  ;;  %v1672_v9 = vmul.f32 0.01, %v1664_v48  ;;  %v1665_v10 = vadd.f32 %v1659_v7, %v1549_v45  ;;  %v2242_v5 = vld [vmem:[#allocation17 + $0xe8] sm:$0xff] }
 0x4d3   :  { %1690 = vst [vmem:[#allocation5] sm:$0xfe] %v1682_v2  ;;  %1692 = vst [vmem:[#allocation5 + $0x10] sm:$0x1] %v1682_v2  ;;  %v1683_v11 = vrot.slane %v1675_v8, 7  ;;  %v2093_v57 = vld [vmem:[#allocation15 + $0x4c8] sm:$0xff] }
 0x4d4   :  { %v1676_v12 = vsel %vm1668_vm3, %v1664_v48, %v1672_v9  ;;  %vm1669_vm4 = vcmp.gt.f32.partialorder %v1665_v10, 0.0  ;;  %v1673_v13 = vmul.f32 0.01, %v1665_v10  ;;  %v2241_v48 = vld [vmem:[#allocation17 + $0xe0] sm:$0xff] }
 0x4d5   :  { %1691 = vst [vmem:[#allocation5 + $0x8] sm:$0xfe] %v1683_v11  ;;  %1693 = vst [vmem:[#allocation5 + $0x18] sm:$0x1] %v1683_v11  ;;  %v1684_v14 = vrot.slane %v1676_v12, 7  ;;  %v2240_v11 = vld [vmem:[#allocation17 + $0xd8] sm:$0xff] }
 0x4d6   :  { %v1677_v15 = vsel %vm1669_vm4, %v1665_v10, %v1673_v13  ;;  %v2092_v10 = vld [vmem:[#allocation15 + $0x4c0] sm:$0xff]  ;;  %v2091_v12 = vld [vmem:[#allocation15 + $0x4b8] sm:$0xff]  ;;  %v2239_v13 = vld [vmem:[#allocation17 + $0xd0] sm:$0xff] }
 0x4d7   :  { %1694 = vst [vmem:[#allocation5 + $0x20] sm:$0xfe] %v1684_v14  ;;  %1696 = vst [vmem:[#allocation5 + $0x30] sm:$0x1] %v1684_v14  ;;  %v1685_v16 = vrot.slane %v1677_v15, 7  ;;  %v2090_v14 = vld [vmem:[#allocation15 + $0x4b0] sm:$0xff] }
 0x4d9   :  { %1695 = vst [vmem:[#allocation5 + $0x28] sm:$0xfe] %v1685_v16  ;;  %1697 = vst [vmem:[#allocation5 + $0x38] sm:$0x1] %v1685_v16  ;;  %v2238_v16 = vld [vmem:[#allocation17 + $0xc8] sm:$0xff] }
 0x4da   :  { %v1855_v17 = vld [vmem:[#allocation5] sm:$0xfe]  ;;  %v1857_v18 = vld [vmem:[#allocation5 + $0x10] sm:$0x1] }
 0x4db   :  { %v1706_v19 = vld [vmem:[#allocation5] sm:$0xff]  ;;  %v1872_v22 = vrot.slane %v1855_v17, 1  ;;  %v1873_v28 = vrot.slane %v1857_v18, 1  ;;  %v2089_v17 = vld [vmem:[#allocation15 + $0x4a8] sm:$0xff] }
 0x4dc   :  { %v1707_v23 = vld [vmem:[#allocation5 + $0x8] sm:$0xff]  ;;  %v1858_v27 = vld [vmem:[#allocation5 + $0x18] sm:$0x1]  ;;  %v2237_v18 = vld [vmem:[#allocation17 + $0xc0] sm:$0xff] }
 0x4dd   :  { %v1856_v24 = vld [vmem:[#allocation5 + $0x8] sm:$0xfe]  ;;  %1838 = vmatprep.mubr.f32.mxu0 %v1707_v23  ;;  %v1876_v29 = vrot.slane %v1858_v27, 1  ;;  %v2037_v31 = vld [vmem:[#allocation5 + $0x18] sm:$0x3]  ;;  %v1874_v4 = vsel %vm1871_vm5, %v1872_v22, %v1873_v28  ;;  %v2235_v22 = vld [vmem:[#allocation17 + $0xb0] sm:$0xff] }
 0x4de   :  { %v1875_v63 = vrot.slane %v1856_v24, 1  ;;  %v2035_v30 = vld [vmem:[#allocation5 + $0x8] sm:$0xfc]  ;;  %1839 = vmatmul.mubr.f32.vlgmr.msra.gmra.mxu0 %v1706_v19  ;;  %v1859_v39 = vld [vmem:[#allocation5 + $0x20] sm:$0xfe]  ;;  %v2055_v3 = vrot.slane %v2037_v31, 2 }
 0x4df   :  { %2133 = vmatpush1.msra.mxu0 %v2098_v20  ;;  %v2054_v38 = vrot.slane %v2035_v30, 2  ;;  %v1861_v40 = vld [vmem:[#allocation5 + $0x30] sm:$0x1]  ;;  %v1708_v46 = vld [vmem:[#allocation5 + $0x20] sm:$0xff]  ;;  %v1878_v7 = vrot.slane %v1859_v39, 1  ;;  %v2236_v20 = vld [vmem:[#allocation17 + $0xb8] sm:$0xff] }
 0x4e0   :  { %v1877_v36 = vsel %vm1871_vm5, %v1875_v63, %v1876_v29  ;;  %2134 = vmatprep.subr.mxu0 %v2097_v21  ;;  %v1709_v41 = vld [vmem:[#allocation5 + $0x28] sm:$0xff]  ;;  %v1862_v43 = vld [vmem:[#allocation5 + $0x38] sm:$0x1]  ;;  %v1879_v8 = vrot.slane %v1861_v40, 1  ;;  %v2088_v19 = vld [vmem:[#allocation15 + $0x4a0] sm:$0xff] }
 0x4e1   :  { %2017 = vmatprep.mubr.f32.mxu1 %v1877_v36  ;;  %v1860_v42 = vld [vmem:[#allocation5 + $0x28] sm:$0xfe]  ;;  %2135 = vmatpush1.msra.mxu0 %v2096_v34  ;;  %v1882_v32 = vrot.slane %v1862_v43, 1  ;;  %v2056_v9 = vsel %vm2050_vm6, %v2054_v38, %v2055_v3  ;;  %v2087_v21 = vld [vmem:[#allocation15 + $0x498] sm:$0xff]  ;;  %v2086_v23 = vld [vmem:[#allocation15 + $0x490] sm:$0xff] }
 0x4e2   :  { %1844 = vmatprep.mubr.f32.mxu0 %v1709_v41  ;;  %v1881_v45 = vrot.slane %v1860_v42, 1  ;;  %2018 = vmatmul.mubr.f32.vlgmr.msra.gmra.mxu1 %v1874_v4  ;;  %v1880_v15 = vsel %vm1871_vm5, %v1878_v7, %v1879_v8  ;;  %v2234_v24 = vld [vmem:[#allocation17 + $0xa8] sm:$0xff]  ;;  %v2233_v28 = vld [vmem:[#allocation17 + $0xa0] sm:$0xff]  ;;  %v2232_v29 = vld [vmem:[#allocation17 + $0x98] sm:$0xff] }
 0x4e3   :  { %2136 = vmatprep.subr.mxu0 %v2095_v35  ;;  %2246 = vmatpush1.msra.mxu1 %v2243_v37  ;;  %v2085_v27 = vld [vmem:[#allocation15 + $0x488] sm:$0xff]  ;;  %v2084_v63 = vld [vmem:[#allocation15 + $0x480] sm:$0xff]  ;;  %v2083_v30 = vld [vmem:[#allocation15 + $0x478] sm:$0xff] }
 0x4e4   :  { %1845 = vmatmul.mubr.f32.gmra.mxu0 %v1708_v46  ;;  %v1883_v2 = vsel %vm1871_vm5, %v1881_v45, %v1882_v32  ;;  %2247 = vmatprep.subr.mxu1 %v2242_v5  ;;  %v2231_v31 = vld [vmem:[#allocation17 + $0x90] sm:$0xff]  ;;  %v2230_v35 = vld [vmem:[#allocation17 + $0x88] sm:$0xff]  ;;  %v2229_v37 = vld [vmem:[#allocation17 + $0x80] sm:$0xff] }
 0x4e5   :  { %2137 = vmatpush1.msra.mxu0 %v2094_v33  ;;  %2196 = vmatprep.mubr.f32.mxu0 %v2056_v9  ;;  %v2082_v34 = vld [vmem:[#allocation15 + $0x470] sm:$0xff]  ;;  %v2081_v36 = vld [vmem:[#allocation15 + $0x468] sm:$0xff]  ;;  %v2080_v38 = vld [vmem:[#allocation15 + $0x460] sm:$0xff] }
 0x4e6   :  { %2138 = vmatprep.subr.mxu0 %v2093_v57  ;;  %2248 = vmatpush1.msra.mxu1 %v2241_v48  ;;  %v2228_v39 = vld [vmem:[#allocation17 + $0x78] sm:$0xff]  ;;  %v2227_v41 = vld [vmem:[#allocation17 + $0x70] sm:$0xff]  ;;  %v2226_v42 = vld [vmem:[#allocation17 + $0x68] sm:$0xff] }
 0x4e7   :  { %2023 = vmatprep.mubr.f32.mxu1 %v1883_v2  ;;  %2139 = vmatpush1.msra.mxu0 %v2092_v10  ;;  %v2079_v40 = vld [vmem:[#allocation15 + $0x458] sm:$0xff]  ;;  %v2078_v3 = vld [vmem:[#allocation15 + $0x450] sm:$0xff]  ;;  %v2077_v43 = vld [vmem:[#allocation15 + $0x448] sm:$0xff] }
 0x4e8   :  { %2249 = vmatprep.subr.mxu1 %v2240_v11  ;;  %2024 = vmatmul.mubr.f32.gmra.mxu1 %v1880_v15  ;;  %v2225_v4 = vld [vmem:[#allocation17 + $0x60] sm:$0xff]  ;;  %v2224_v5 = vld [vmem:[#allocation17 + $0x58] sm:$0xff]  ;;  %v2223_v32 = vld [vmem:[#allocation17 + $0x50] sm:$0xff] }
 0x4e9   :  { %2140 = vmatprep.subr.mxu0 %v2091_v12  ;;  %2250 = vmatpush1.msra.mxu1 %v2239_v13  ;;  %v2076_v33 = vld [vmem:[#allocation15 + $0x440] sm:$0xff]  ;;  %v2075_v45 = vld [vmem:[#allocation15 + $0x438] sm:$0xff]  ;;  %v2074_v46 = vld [vmem:[#allocation15 + $0x430] sm:$0xff] }
 0x4ea   :  { %2141 = vmatpush1.msra.mxu0 %v2090_v14  ;;  %2251 = vmatprep.subr.mxu1 %v2238_v16  ;;  %v2222_v57 = vld [vmem:[#allocation17 + $0x48] sm:$0xff]  ;;  %v2221_v2 = vld [vmem:[#allocation17 + $0x40] sm:$0xff]  ;;  %v2220_v8 = vld [vmem:[#allocation17 + $0x38] sm:$0xff] }
 0x4eb   :  { %2142 = vmatprep.subr.mxu0 %v2089_v17  ;;  %2252 = vmatpush1.msra.mxu1 %v2237_v18  ;;  %v2073_v48 = vld [vmem:[#allocation15 + $0x428] sm:$0xff]  ;;  %v2072_v7 = vld [vmem:[#allocation15 + $0x420] sm:$0xff]  ;;  %v2071_v9 = vld [vmem:[#allocation15 + $0x418] sm:$0xff] }
 0x4ec   :  { %2143 = vmatpush1.msra.mxu0 %v2088_v19  ;;  %2253 = vmatprep.subr.mxu1 %v2236_v20  ;;  %v2219_v10 = vld [vmem:[#allocation17 + $0x30] sm:$0xff]  ;;  %v2218_v12 = vld [vmem:[#allocation17 + $0x28] sm:$0xff]  ;;  %v2217_v14 = vld [vmem:[#allocation17 + $0x20] sm:$0xff] }
 0x4ed   :  { %2144 = vmatprep.subr.mxu0 %v2087_v21  ;;  %2254 = vmatpush1.msra.mxu1 %v2235_v22  ;;  %v2070_v11 = vld [vmem:[#allocation15 + $0x410] sm:$0xff]  ;;  %v2069_v13 = vld [vmem:[#allocation15 + $0x408] sm:$0xff]  ;;  %v2068_v15 = vld [vmem:[#allocation15 + $0x400] sm:$0xff] }
 0x4ee   :  { %2145 = vmatpush1.msra.mxu0 %v2086_v23  ;;  %2255 = vmatprep.subr.mxu1 %v2234_v24  ;;  %v2216_v16 = vld [vmem:[#allocation17 + $0x18] sm:$0xff]  ;;  %v2215_v18 = vld [vmem:[#allocation17 + $0x10] sm:$0xff]  ;;  %v2214_v20 = vld [vmem:[#allocation17 + $0x8] sm:$0xff] }
 0x4ef   :  { %2146 = vmatprep.subr.mxu0 %v2085_v27  ;;  %2256 = vmatpush1.msra.mxu1 %v2233_v28  ;;  %v2131_v17 = vld [vmem:[#allocation15 + $0x5f8] sm:$0xff]  ;;  %v2130_v19 = vld [vmem:[#allocation15 + $0x5f0] sm:$0xff]  ;;  %v2129_v21 = vld [vmem:[#allocation15 + $0x5e8] sm:$0xff] }
 0x4f0   :  { %2147 = vmatpush1.msra.mxu0 %v2084_v63  ;;  %2257 = vmatprep.subr.mxu1 %v2232_v29  ;;  %v2213_v22 = vld [vmem:[#allocation17] sm:$0xff]  ;;  %v2127_v24 = vld [vmem:[#allocation15 + $0x5d8] sm:$0xff]  ;;  %v2126_v27 = vld [vmem:[#allocation15 + $0x5d0] sm:$0xff] }
 0x4f1   :  { %2148 = vmatprep.subr.mxu0 %v2083_v30  ;;  %2258 = vmatpush1.msra.mxu1 %v2231_v31  ;;  %v2128_v23 = vld [vmem:[#allocation15 + $0x5e0] sm:$0xff]  ;;  %v2125_v63 = vld [vmem:[#allocation15 + $0x5c8] sm:$0xff]  ;;  %v2123_v30 = vld [vmem:[#allocation15 + $0x5b8] sm:$0xff] }
 0x4f2   :  { %2149 = vmatpush1.msra.mxu0 %v2082_v34  ;;  %2259 = vmatprep.subr.mxu1 %v2230_v35  ;;  %v3411_v28 = vld [vmem:[#allocation4 + $0x1] sm:$0xff]  ;;  %v2122_v31 = vld [vmem:[#allocation15 + $0x5b0] sm:$0xff] }
 0x4f3   :  { %2150 = vmatprep.subr.mxu0 %v2081_v36  ;;  %2260 = vmatpush1.msra.mxu1 %v2229_v37  ;;  %v2124_v29 = vld [vmem:[#allocation15 + $0x5c0] sm:$0xff]  ;;  %v3412_v34 = vld [vmem:[#allocation4 + $0x11] sm:$0xff]  ;;  %v2121_v35 = vld [vmem:[#allocation15 + $0x5a8] sm:$0xff] }
 0x4f4   :  { %2151 = vmatpush1.msra.mxu0 %v2080_v38  ;;  %2261 = vmatprep.subr.mxu1 %v2228_v39  ;;  %v2120_v36 = vld [vmem:[#allocation15 + $0x5a0] sm:$0xff]  ;;  %v2119_v37 = vld [vmem:[#allocation15 + $0x598] sm:$0xff]  ;;  %v2118_v38 = vld [vmem:[#allocation15 + $0x590] sm:$0xff] }
 0x4f5   :  { %2152 = vmatprep.subr.mxu0 %v2079_v40  ;;  %2262 = vmatpush1.msra.mxu1 %v2227_v41  ;;  %v2117_v39 = vld [vmem:[#allocation15 + $0x588] sm:$0xff]  ;;  %v2116_v40 = vld [vmem:[#allocation15 + $0x580] sm:$0xff]  ;;  %v2115_v41 = vld [vmem:[#allocation15 + $0x578] sm:$0xff] }
 0x4f6   :  { %2153 = vmatpush1.msra.mxu0 %v2078_v3  ;;  %2263 = vmatprep.subr.mxu1 %v2226_v42  ;;  %v2114_v3 = vld [vmem:[#allocation15 + $0x570] sm:$0xff]  ;;  %v2113_v42 = vld [vmem:[#allocation15 + $0x568] sm:$0xff] }
 0x4f7   :  { %2154 = vmatprep.subr.mxu0 %v2077_v43  ;;  %2264 = vmatpush1.msra.mxu1 %v2225_v4  ;;  %v2112_v43 = vld [vmem:[#allocation15 + $0x560] sm:$0xff]  ;;  %v2111_v4 = vld [vmem:[#allocation15 + $0x558] sm:$0xff] }
 0x4f8   :  { %2155 = vmatpush1.msra.mxu0 %v2076_v33  ;;  %2265 = vmatprep.subr.mxu1 %v2224_v5  ;;  %v2110_v33 = vld [vmem:[#allocation15 + $0x550] sm:$0xff]  ;;  %v2109_v5 = vld [vmem:[#allocation15 + $0x548] sm:$0xff] }
 0x4f9   :  { %2156 = vmatprep.subr.mxu0 %v2075_v45  ;;  %2266 = vmatpush1.msra.mxu1 %v2223_v32  ;;  %v2108_v45 = vld [vmem:[#allocation15 + $0x540] sm:$0xff]  ;;  %v2107_v32 = vld [vmem:[#allocation15 + $0x538] sm:$0xff] }
 0x4fa   :  { %2157 = vmatpush1.msra.mxu0 %v2074_v46  ;;  %2267 = vmatprep.subr.mxu1 %v2222_v57  ;;  %v2106_v46 = vld [vmem:[#allocation15 + $0x530] sm:$0xff]  ;;  %v2105_v57 = vld [vmem:[#allocation15 + $0x528] sm:$0xff] }
 0x4fb   :  { %2158 = vmatprep.subr.mxu0 %v2073_v48  ;;  %2268 = vmatpush1.msra.mxu1 %v2221_v2  ;;  %v2104_v48 = vld [vmem:[#allocation15 + $0x520] sm:$0xff] }
 0x4fc   :  { %2159 = vmatpush1.msra.mxu0 %v2072_v7  ;;  %2269 = vmatprep.subr.mxu1 %v2220_v8  ;;  %v2034_v2 = vld [vmem:[#allocation5] sm:$0xfc]  ;;  %v2036_v7 = vld [vmem:[#allocation5 + $0x10] sm:$0x3]  ;;  %v2103_v8 = vld [vmem:[#allocation15 + $0x518] sm:$0xff] }
 0x4fd   :  { %2160 = vmatprep.subr.mxu0 %v2071_v9  ;;  %2270 = vmatpush1.msra.mxu1 %v2219_v10  ;;  %v2039_v9 = vld [vmem:[#allocation5 + $0x28] sm:$0xfc]  ;;  %v2041_v10 = vld [vmem:[#allocation5 + $0x38] sm:$0x3] }
 0x4fe   :  { %2161 = vmatpush1.msra.mxu0 %v2070_v11  ;;  %2271 = vmatprep.subr.mxu1 %v2218_v12  ;;  %v2102_v11 = vld [vmem:[#allocation15 + $0x510] sm:$0xff]  ;;  %v2101_v12 = vld [vmem:[#allocation15 + $0x508] sm:$0xff] }
 0x4ff   :  { %2162 = vmatprep.subr.mxu0 %v2069_v13  ;;  %2272 = vmatpush1.msra.mxu1 %v2217_v14  ;;  %v2100_v13 = vld [vmem:[#allocation15 + $0x500] sm:$0xff]  ;;  %v2051_v14 = vrot.slane %v2034_v2, 2 }
 0x500   :  { %2163 = vmatpush1.msra.mxu0 %v2068_v15  ;;  %2273 = vmatprep.subr.mxu1 %v2216_v16  ;;  %v2052_v15 = vrot.slane %v2036_v7, 2  ;;  %v2060_v16 = vrot.slane %v2039_v9, 2 }
 0x501   :  { %2164 = vmatprep.subr.mxu0 %v2131_v17  ;;  %2274 = vmatpush1.msra.mxu1 %v2215_v18  ;;  %v2061_v17 = vrot.slane %v2041_v10, 2  ;;  %v2038_v18 = vld [vmem:[#allocation5 + $0x20] sm:$0xfc] }
 0x502   :  { %2165 = vmatpush2.msra.mxu0 %v2130_v19  ;;  %2275 = vmatprep.subr.mxu1 %v2214_v20  ;;  %v2040_v19 = vld [vmem:[#allocation5 + $0x30] sm:$0x3]  ;;  %v2053_v20 = vsel %vm2050_vm6, %v2051_v14, %v2052_v15 }
 0x503   :  { %2166 = vmatprep.subr.mxu0 %v2129_v21  ;;  %2276 = vmatpush1.msra.mxu1 %v2213_v22  ;;  %v2057_v21 = vrot.slane %v2038_v18, 2  ;;  %v2058_v22 = vrot.slane %v2040_v19, 2 }
 0x504   :  { %2309 = vmatprep.mubr.f32.mxu1 %v3639_v0  ;;  %2167 = vmatpush2.msra.mxu0 %v2128_v23  ;;  %v2062_v23 = vsel %vm2050_vm6, %v2060_v16, %v2061_v17 }
 0x505   :  { %2310 = vmatmul.mubr.f32.vlgmr.msra.gmra.mxu1 %v3411_v28  ;;  %2168 = vmatprep.subr.mxu0 %v2127_v24  ;;  %v2059_v24 = vsel %vm2050_vm6, %v2057_v21, %v2058_v22  ;;  %v3974_v21 = vadd.s32 32, %v3804_v55 }
 0x506   :  { %2315 = vmatprep.mubr.f32.mxu1 %v3639_v0  ;;  %2169 = vmatpush2.msra.mxu0 %v2126_v27 }
 0x507   :  { %2170 = vmatprep.subr.mxu0 %v2125_v63  ;;  %vm2535_vm11 = vcmp.eq.s32.totalorder %v3834_v47, %v3974_v21  ;;  %vm2533_vm12 = vcmp.eq.s32.totalorder %v3838_v6, %v3974_v21  ;;  %vm2531_vm13 = vcmp.eq.s32.totalorder %v3844_v49, %v3974_v21  ;;  %vm2529_vm14 = vcmp.eq.s32.totalorder %v3849_v50, %v3974_v21 }
 0x508   :  { %2171 = vmatpush2.msra.mxu0 %v2124_v29  ;;  %v1700_v29 = vsub.s32 3, %v3787_v59  ;;  %vm2525_vm15 = vcmp.eq.s32.totalorder %v3864_v53, %v3974_v21  ;;  %vm2523_vm0 = vcmp.eq.s32.totalorder %v3871_v54, %v3974_v21  ;;  %vm2521_vm2 = vcmp.eq.s32.totalorder %v3878_v56, %v3974_v21 }
 0x509   :  { %2316 = vmatmul.mubr.f32.gmra.mxu1 %v3412_v34  ;;  %2172 = vmatprep.subr.mxu0 %v2123_v30  ;;  %vm2519_vm3 = vcmp.eq.s32.totalorder %v3885_v60, %v3974_v21  ;;  %vm2517_vm4 = vcmp.eq.s32.totalorder %v3900_v61, %v3974_v21  ;;  %vm2515_vm5 = vcmp.eq.s32.totalorder %v3905_v62, %v3974_v21  ;;  %v2501_v47 = vadd.s32 248, %v3787_v59 }
 0x50a   :  { %2404 = vmatprep.mubr.f32.mxu1 %v3639_v0  ;;  %2173 = vmatpush2.msra.mxu0 %v2122_v31  ;;  %v1705_v34 = vrot.slane %v3953_v25, %v1700_v29  ;;  %vm2513_vm6 = vcmp.eq.s32.totalorder %v3912_v1, %v3974_v21  ;;  %v2500_v6 = vadd.s32 240, %v3787_v59  ;;  %v2498_v49 = vadd.s32 224, %v3787_v59 }
 0x50b   :  { %2174 = vmatprep.subr.mxu0 %v2121_v35  ;;  %v1701_v35 = vrot.slane %v3955_v26, %v1700_v29  ;;  %v2497_v50 = vadd.s32 216, %v3787_v59  ;;  %v2495_v53 = vadd.s32 200, %v3787_v59  ;;  %v2494_v54 = vadd.s32 192, %v3787_v59  ;;  %v2800_v29 = vld [vmem:[#allocation18 + $0xf0] sm:$0xff] }
 0x50c   :  { %2175 = vmatpush2.msra.mxu0 %v2120_v36  ;;  %v2493_v56 = vadd.s32 184, %v3787_v59  ;;  %v2492_v60 = vadd.s32 176, %v3787_v59  ;;  %v2491_v61 = vadd.s32 168, %v3787_v59  ;;  %v2490_v62 = vadd.s32 160, %v3787_v59 }
 0x50d   :  { %2176 = vmatprep.subr.mxu0 %v2119_v37  ;;  %v2489_v1 = vadd.s32 152, %v3787_v59 }
 0x50e   :  { %2177 = vmatpush2.msra.mxu0 %v2118_v38 }
 0x50f   :  { %2178 = vmatprep.subr.mxu0 %v2117_v39 }
 0x510   :  { %2179 = vmatpush2.msra.mxu0 %v2116_v40 }
 0x511   :  { %2180 = vmatprep.subr.mxu0 %v2115_v41 }
 0x512   :  { %2181 = vmatpush2.msra.mxu0 %v2114_v3 }
 0x513   :  { %2182 = vmatprep.subr.mxu0 %v2113_v42 }
 0x514   :  { %2183 = vmatpush2.msra.mxu0 %v2112_v43 }
 0x515   :  { %2184 = vmatprep.subr.mxu0 %v2111_v4 }
 0x516   :  { %2185 = vmatpush2.msra.mxu0 %v2110_v33 }
 0x517   :  { %2186 = vmatprep.subr.mxu0 %v2109_v5 }
 0x518   :  { %2187 = vmatpush2.msra.mxu0 %v2108_v45 }
 0x519   :  { %2188 = vmatprep.subr.mxu0 %v2107_v32 }
 0x51a   :  { %2189 = vmatpush2.msra.mxu0 %v2106_v46 }
 0x51b   :  { %2190 = vmatprep.subr.mxu0 %v2105_v57 }
 0x51c   :  { %2191 = vmatpush2.msra.mxu0 %v2104_v48 }
 0x51d   :  { %2192 = vmatprep.subr.mxu0 %v2103_v8 }
 0x51e   :  { %2193 = vmatpush2.msra.mxu0 %v2102_v11 }
 0x51f   :  { %2194 = vmatprep.subr.mxu0 %v2101_v12 }
 0x520   :  { %2195 = vmatpush2.msra.mxu0 %v2100_v13 }
 0x521   :  { %2197 = vmatmul.mubr.f32.vlgmr.msra.gmra.mxu0 %v2053_v20 }
 0x522   :  { %2202 = vmatprep.mubr.f32.mxu0 %v2062_v23  ;;  %v2488_v23 = vadd.s32 144, %v3787_v59 }
 0x525   :  { %2203 = vmatmul.mubr.f32.gmra.mxu0 %v2059_v24  ;;  %v2487_v24 = vadd.s32 136, %v3787_v59 }
 0x59e   :  { %v1840_v28 = vpop.f32.mrf.mxu0 }
 0x59f   :  { %v1851_v40 = vadd.f32 %v1840_v28, %v1701_v35  ;;  %v2801_v28 = vld [vmem:[#allocation18 + $0xf8] sm:$0xff] }
 0x5a0   :  { %v1842_v30 = vpop.f32.mrf.mxu0  ;;  %3148 = vmatprep.subr.mxu0 %v2801_v28 }
 0x5a1   :  { %v1852_v39 = vadd.f32 %v1842_v30, %v1705_v34  ;;  %v2784_v30 = vld [vmem:[#allocation18 + $0x70] sm:$0xff] }
 0x5a2   :  { %v2019_v27 = vpop.f32.mrf.mxu1 }
 0x5a3   :  { %v2030_v5 = vadd.f32 %v2019_v27, %v1851_v40  ;;  %v2486_v27 = vadd.s32 128, %v3787_v59  ;;  %v2779_v40 = vld [vmem:[#allocation18 + $0x48] sm:$0xff] }
 0x5a4   :  { %v2021_v63 = vpop.f32.mrf.mxu1  ;;  %v1846_v36 = vpop.f32.mrf.mxu0 }
 0x5a5   :  { %v1853_v3 = vadd.f32 %v1846_v36, %v1701_v35  ;;  %v2031_v4 = vadd.f32 %v2021_v63, %v1852_v39  ;;  %v2785_v63 = vld [vmem:[#allocation18 + $0x78] sm:$0xff]  ;;  %v2798_v35 = vld [vmem:[#allocation18 + $0xe0] sm:$0xff]  ;;  %v2795_v39 = vld [vmem:[#allocation18 + $0xc8] sm:$0xff] }
 0x5a6   :  { %v1848_v41 = vpop.f32.mrf.mxu0  ;;  %3149 = vmatpush3.msra.mxu0 %v2785_v63  ;;  %v2782_v36 = vld [vmem:[#allocation18 + $0x60] sm:$0xff] }
 0x5a7   :  { %v1854_v33 = vadd.f32 %v1848_v41, %v1705_v34  ;;  %3150 = vmatprep.subr.mxu0 %v2800_v29  ;;  %v2783_v34 = vld [vmem:[#allocation18 + $0x68] sm:$0xff]  ;;  %v2794_v41 = vld [vmem:[#allocation18 + $0xc0] sm:$0xff] }
 0x5a8   :  { %v2025_v31 = vpop.f32.mrf.mxu1  ;;  %3151 = vmatpush3.msra.mxu0 %v2784_v30 }
 0x5a9   :  { %v2032_v32 = vadd.f32 %v2025_v31, %v1853_v3  ;;  %v2799_v31 = vld [vmem:[#allocation18 + $0xe8] sm:$0xff]  ;;  %v2778_v3 = vld [vmem:[#allocation18 + $0x40] sm:$0xff] }
 0x5aa   :  { %v2027_v37 = vpop.f32.mrf.mxu1  ;;  %3152 = vmatprep.subr.mxu0 %v2799_v31 }
 0x5ab   :  { %v2033_v2 = vadd.f32 %v2027_v37, %v1854_v33  ;;  %3153 = vmatpush3.msra.mxu0 %v2783_v34  ;;  %v2797_v37 = vld [vmem:[#allocation18 + $0xd8] sm:$0xff]  ;;  %v2776_v33 = vld [vmem:[#allocation18 + $0x30] sm:$0xff] }
 0x5ac   :  { %3154 = vmatprep.subr.mxu0 %v2798_v35 }
 0x5ad   :  { %3155 = vmatpush3.msra.mxu0 %v2782_v36 }
 0x5ae   :  { %3156 = vmatprep.subr.mxu0 %v2797_v37 }
 0x5c5   :  { %v2311_v38 = vpop.f32.mrf.mxu1 }
 0x5c7   :  { %v2313_v42 = vpop.f32.mrf.mxu1 }
 0x5c9   :  { %v2317_v57 = vpop.f32.mrf.mxu1 }
 0x5cb   :  { %v2319_v11 = vpop.f32.mrf.mxu1 }
 0x5e1   :  { %v2198_v43 = vpop.f32.mrf.mxu0 }
 0x5e2   :  { %v2209_v48 = vadd.f32 %v2198_v43, %v2030_v5  ;;  %v2777_v43 = vld [vmem:[#allocation18 + $0x38] sm:$0xff]  ;;  %v2791_v5 = vld [vmem:[#allocation18 + $0xa8] sm:$0xff] }
 0x5e3   :  { %v2200_v45 = vpop.f32.mrf.mxu0 }
 0x5e4   :  { %v2210_v46 = vadd.f32 %v2200_v45, %v2031_v4  ;;  %v2322_v12 = vadd.f32 %v2311_v38, %v2209_v48  ;;  %v2796_v38 = vld [vmem:[#allocation18 + $0xd0] sm:$0xff]  ;;  %v2775_v45 = vld [vmem:[#allocation18 + $0x28] sm:$0xff]  ;;  %v2773_v48 = vld [vmem:[#allocation18 + $0x18] sm:$0xff] }
 0x5e5   :  { %v2204_v25 = vpop.f32.mrf.mxu0  ;;  %v2792_v4 = vld [vmem:[#allocation18 + $0xb0] sm:$0xff] }
 0x5e6   :  { %v2211_v26 = vadd.f32 %v2204_v25, %v2032_v32  ;;  %v2323_v8 = vadd.f32 %v2313_v42, %v2210_v46  ;;  %v2330_v17 = vmul.f32 0.01, %v2322_v12  ;;  %vm2326_vm10 = vcmp.gt.f32.partialorder %v2322_v12, 0.0  ;;  %v2793_v42 = vld [vmem:[#allocation18 + $0xb8] sm:$0xff]  ;;  %v2790_v32 = vld [vmem:[#allocation18 + $0xa0] sm:$0xff] }
 0x5e7   :  { %v2206_v7 = vpop.f32.mrf.mxu0  ;;  %v2774_v46 = vld [vmem:[#allocation18 + $0x20] sm:$0xff] }
 0x5e8   :  { %v2324_v9 = vadd.f32 %v2317_v57, %v2211_v26  ;;  %v2212_v10 = vadd.f32 %v2206_v7, %v2033_v2  ;;  %v2331_v16 = vmul.f32 0.01, %v2323_v8  ;;  %vm2327_vm9 = vcmp.gt.f32.partialorder %v2323_v8, 0.0  ;;  %v2789_v57 = vld [vmem:[#allocation18 + $0x98] sm:$0xff] }
 0x5e9   :  { %v2334_v22 = vsel %vm2326_vm10, %v2322_v12, %v2330_v17  ;;  %v2787_v12 = vld [vmem:[#allocation18 + $0x88] sm:$0xff] }
 0x5ea   :  { %v2325_v13 = vadd.f32 %v2319_v11, %v2212_v10  ;;  %v2332_v14 = vmul.f32 0.01, %v2324_v9  ;;  %vm2328_vm8 = vcmp.gt.f32.partialorder %v2324_v9, 0.0  ;;  %v2335_v20 = vsel %vm2327_vm9, %v2323_v8, %v2331_v16  ;;  %v2788_v10 = vld [vmem:[#allocation18 + $0x90] sm:$0xff] }
 0x5eb   :  { %v2772_v11 = vld [vmem:[#allocation18 + $0x10] sm:$0xff] }
 0x5ec   :  { %vm2329_vm7 = vcmp.gt.f32.partialorder %v2325_v13, 0.0  ;;  %v2333_v15 = vmul.f32 0.01, %v2325_v13  ;;  %v2336_v19 = vsel %vm2328_vm8, %v2324_v9, %v2332_v14  ;;  %v2786_v14 = vld [vmem:[#allocation18 + $0x80] sm:$0xff] }
 0x5ee   :  { %v2337_v18 = vsel %vm2329_vm7, %v2325_v13, %v2333_v15  ;;  %v2771_v13 = vld [vmem:[#allocation18 + $0x8] sm:$0xff]  ;;  %v2770_v15 = vld [vmem:[#allocation18] sm:$0xff] }
 0x5ef   :  { %2368 = vmatprep.subr.mxu1 %v2337_v18 }
 0x5f0   :  { %2369 = vmatpush1.msra.mxu1 %v2336_v19 }
 0x5f1   :  { %2370 = vmatprep.subr.mxu1 %v2335_v20 }
 0x5f2   :  { %2371 = vmatpush1.msra.mxu1 %v2334_v22 }
 0x5f3   :  { %2976 = vmatmul.mubr.msk.f32.vlgmr.msra.gmra.mxu1 %vm187_vm1, %v3809_v58  ;;  %2441 = vmatprep.subr.mxu1 %v2337_v18  ;;  %v2502_v58 = vadd.s32 128, %v3804_v55  ;;  %v2499_v55 = vadd.s32 232, %v3787_v59 }
 0x5f4   :  { %2442 = vmatpush1.msra.mxu1 %v2336_v19  ;;  %2477 = vmatprep.mubr.f32.mxu1 %v3639_v0 }
 0x5f5   :  { %2443 = vmatprep.subr.mxu1 %v2335_v20 }
 0x5f6   :  { %2444 = vmatpush1.msra.mxu1 %v2334_v22 }
 0x5f7   :  { %2977 = vmatmul.mubr.msk.f32.vlgmr.msra.gmra.mxu1 %vm187_vm1, %v3825_v44  ;;  %2697 = vmatprep.subr.mxu1 %v3639_v0  ;;  %vm2527_vm1 = vcmp.eq.s32.totalorder %v3857_v52, %v3974_v21  ;;  %v2504_v44 = vadd.s32 32, %v2502_v58  ;;  %v2496_v52 = vadd.s32 208, %v3787_v59 }
 0x5f8   :  { %3006 = vmatpush1.msk.msra.mxu1 %vm2535_vm11, %v3640_v51 }
 0x5f9   :  { %2699 = vmatprep.subr.mxu1 %v3639_v0  ;;  %vm2568_vm7 = vcmp.eq.s32.totalorder %v2501_v47, %v2504_v44  ;;  %vm2566_vm8 = vcmp.eq.s32.totalorder %v2500_v6, %v2504_v44  ;;  %vm2564_vm9 = vcmp.eq.s32.totalorder %v2499_v55, %v2504_v44  ;;  %vm2562_vm10 = vcmp.eq.s32.totalorder %v2498_v49, %v2504_v44 }
 0x5fa   :  { %3007 = vmatpush1.msk.msra.mxu1 %vm2533_vm12, %v3640_v51  ;;  %vm2560_vm11 = vcmp.eq.s32.totalorder %v2497_v50, %v2504_v44  ;;  %vm2558_vm12 = vcmp.eq.s32.totalorder %v2496_v52, %v2504_v44 }
 0x5fb   :  { %2701 = vmatprep.subr.mxu1 %v3639_v0 }
 0x5fc   :  { %3008 = vmatpush1.msk.msra.mxu1 %vm2531_vm13, %v3640_v51  ;;  %vm2556_vm13 = vcmp.eq.s32.totalorder %v2495_v53, %v2504_v44 }
 0x5fd   :  { %2703 = vmatprep.subr.mxu1 %v3639_v0 }
 0x5fe   :  { %3009 = vmatpush1.msk.msra.mxu1 %vm2529_vm14, %v3640_v51  ;;  %vm2554_vm14 = vcmp.eq.s32.totalorder %v2494_v54, %v2504_v44 }
 0x5ff   :  { %2705 = vmatprep.subr.mxu1 %v3639_v0 }
 0x600   :  { %3010 = vmatpush1.msk.msra.mxu1 %vm2527_vm1, %v3640_v51  ;;  %vm2552_vm1 = vcmp.eq.s32.totalorder %v2493_v56, %v2504_v44 }
 0x601   :  { %2707 = vmatprep.subr.mxu1 %v3639_v0 }
 0x602   :  { %3011 = vmatpush1.msk.msra.mxu1 %vm2525_vm15, %v3640_v51  ;;  %vm2550_vm15 = vcmp.eq.s32.totalorder %v2492_v60, %v2504_v44 }
 0x603   :  { %2709 = vmatprep.subr.mxu1 %v3639_v0 }
 0x604   :  { %3012 = vmatpush1.msk.msra.mxu1 %vm2523_vm0, %v3640_v51  ;;  %vm2548_vm0 = vcmp.eq.s32.totalorder %v2491_v61, %v2504_v44  ;;  %v2892_v61 = vsub.s32 4, %v3787_v59 }
 0x605   :  { %2711 = vmatprep.subr.mxu1 %v3639_v0 }
 0x606   :  { %3013 = vmatpush1.msk.msra.mxu1 %vm2521_vm2, %v3640_v51  ;;  %vm2546_vm2 = vcmp.eq.s32.totalorder %v2490_v62, %v2504_v44 }
 0x607   :  { %2713 = vmatprep.subr.mxu1 %v3639_v0 }
 0x608   :  { %3014 = vmatpush1.msk.msra.mxu1 %vm2519_vm3, %v3640_v51  ;;  %vm2543_vm3 = vcmp.eq.s32.totalorder %v2489_v1, %v3974_v21 }
 0x609   :  { %2715 = vmatprep.subr.mxu1 %v3639_v0 }
 0x60a   :  { %3015 = vmatpush1.msk.msra.mxu1 %vm2517_vm4, %v3640_v51  ;;  %vm2541_vm4 = vcmp.eq.s32.totalorder %v2488_v23, %v3974_v21 }
 0x60b   :  { %2717 = vmatprep.subr.mxu1 %v3639_v0 }
 0x60c   :  { %3016 = vmatpush1.msk.msra.mxu1 %vm2515_vm5, %v3640_v51  ;;  %vm2539_vm5 = vcmp.eq.s32.totalorder %v2487_v24, %v3974_v21  ;;  %v3413_v24 = vld [vmem:[#allocation20] sm:$0xff] }
 0x60d   :  { %2719 = vmatprep.subr.mxu1 %v3639_v0 }
 0x60e   :  { %3017 = vmatpush1.msk.msra.mxu1 %vm2513_vm6, %v3640_v51  ;;  %vm2537_vm6 = vcmp.eq.s32.totalorder %v2486_v27, %v3974_v21  ;;  %v2893_v27 = vrot.slane %v3413_v24, %v2892_v61 }
 0x60f   :  { %2721 = vmatprep.subr.mxu1 %v3639_v0 }
 0x610   :  { %2722 = vmatpush1.msra.mxu1 %v3639_v0 }
 0x611   :  { %2723 = vmatprep.subr.mxu1 %v3639_v0 }
 0x612   :  { %2724 = vmatpush1.msra.mxu1 %v3639_v0 }
 0x613   :  { %2725 = vmatprep.subr.mxu1 %v3639_v0 }
 0x614   :  { %2726 = vmatpush1.msra.mxu1 %v3639_v0 }
 0x615   :  { %2727 = vmatprep.subr.mxu1 %v3639_v0 }
 0x616   :  { %2728 = vmatpush1.msra.mxu1 %v3639_v0 }
 0x617   :  { %3018 = vmatprep.subr.msk.mxu1 %vm2568_vm7, %v3640_v51  ;;  %vm2875_vm7 = vcmask 1043456  }
 0x618   :  { %2730 = vmatpush2.msra.mxu1 %v3639_v0 }
 0x619   :  { %3019 = vmatprep.subr.msk.mxu1 %vm2566_vm8, %v3640_v51  ;;  %vm2899_vm8 = vcmask 1041409  }
 0x61a   :  { %2732 = vmatpush2.msra.mxu1 %v3639_v0 }
 0x61b   :  { %3020 = vmatprep.subr.msk.mxu1 %vm2564_vm9, %v3640_v51 }
 0x61c   :  { %2734 = vmatpush2.msra.mxu1 %v3639_v0 }
 0x61d   :  { %3021 = vmatprep.subr.msk.mxu1 %vm2562_vm10, %v3640_v51 }
 0x61e   :  { %2736 = vmatpush2.msra.mxu1 %v3639_v0 }
 0x61f   :  { %3022 = vmatprep.subr.msk.mxu1 %vm2560_vm11, %v3640_v51 }
 0x620   :  { %2738 = vmatpush2.msra.mxu1 %v3639_v0 }
 0x621   :  { %3023 = vmatprep.subr.msk.mxu1 %vm2558_vm12, %v3640_v51 }
 0x622   :  { %2740 = vmatpush2.msra.mxu1 %v3639_v0 }
 0x623   :  { %3024 = vmatprep.subr.msk.mxu1 %vm2556_vm13, %v3640_v51 }
 0x624   :  { %2742 = vmatpush2.msra.mxu1 %v3639_v0 }
 0x625   :  { %3025 = vmatprep.subr.msk.mxu1 %vm2554_vm14, %v3640_v51 }
 0x626   :  { %2744 = vmatpush2.msra.mxu1 %v3639_v0 }
 0x627   :  { %3026 = vmatprep.subr.msk.mxu1 %vm2552_vm1, %v3640_v51 }
 0x628   :  { %2746 = vmatpush2.msra.mxu1 %v3639_v0 }
 0x629   :  { %3027 = vmatprep.subr.msk.mxu1 %vm2550_vm15, %v3640_v51 }
 0x62a   :  { %2748 = vmatpush2.msra.mxu1 %v3639_v0 }
 0x62b   :  { %3028 = vmatprep.subr.msk.mxu1 %vm2548_vm0, %v3640_v51 }
 0x62c   :  { %2750 = vmatpush2.msra.mxu1 %v3639_v0 }
 0x62d   :  { %3029 = vmatprep.subr.msk.mxu1 %vm2546_vm2, %v3640_v51 }
 0x62e   :  { %2752 = vmatpush2.msra.mxu1 %v3639_v0 }
 0x62f   :  { %2753 = vmatprep.subr.mxu1 %v3639_v0 }
 0x630   :  { %3030 = vmatpush2.msk.msra.mxu1 %vm2543_vm3, %v3640_v51 }
 0x631   :  { %2755 = vmatprep.subr.mxu1 %v3639_v0 }
 0x632   :  { %3031 = vmatpush2.msk.msra.mxu1 %vm2541_vm4, %v3640_v51 }
 0x633   :  { %2757 = vmatprep.subr.mxu1 %v3639_v0 }
 0x634   :  { %3032 = vmatpush2.msk.msra.mxu1 %vm2539_vm5, %v3640_v51 }
 0x635   :  { %2759 = vmatprep.subr.mxu1 %v3639_v0  ;;  %v2781_v0 = vld [vmem:[#allocation18 + $0x58] sm:$0xff] }
 0x636   :  { %3033 = vmatpush2.msk.msra.mxu1 %vm2537_vm6, %v3640_v51  ;;  %v2780_v51 = vld [vmem:[#allocation18 + $0x50] sm:$0xff]  ;;  %3157 = vmatpush3.msra.mxu0 %v2781_v0 }
 0x637   :  { %3158 = vmatprep.subr.mxu0 %v2796_v38 }
 0x638   :  { %3159 = vmatpush3.msra.mxu0 %v2780_v51 }
 0x639   :  { %3160 = vmatprep.subr.mxu0 %v2795_v39 }
 0x63a   :  { %3161 = vmatpush3.msra.mxu0 %v2779_v40 }
 0x63b   :  { %3162 = vmatprep.subr.mxu0 %v2794_v41 }
 0x63c   :  { %3163 = vmatpush3.msra.mxu0 %v2778_v3 }
 0x63d   :  { %3164 = vmatprep.subr.mxu0 %v2793_v42 }
 0x63e   :  { %3165 = vmatpush3.msra.mxu0 %v2777_v43 }
 0x63f   :  { %3166 = vmatprep.subr.mxu0 %v2792_v4 }
 0x640   :  { %3167 = vmatpush3.msra.mxu0 %v2776_v33 }
 0x641   :  { %3168 = vmatprep.subr.mxu0 %v2791_v5 }
 0x642   :  { %3169 = vmatpush3.msra.mxu0 %v2775_v45 }
 0x643   :  { %3170 = vmatprep.subr.mxu0 %v2790_v32 }
 0x644   :  { %3171 = vmatpush3.msra.mxu0 %v2774_v46 }
 0x645   :  { %3172 = vmatprep.subr.mxu0 %v2789_v57 }
 0x646   :  { %3173 = vmatpush3.msra.mxu0 %v2773_v48 }
 0x647   :  { %3174 = vmatprep.subr.mxu0 %v2788_v10 }
 0x648   :  { %3175 = vmatpush3.msra.mxu0 %v2772_v11 }
 0x649   :  { %3176 = vmatprep.subr.mxu0 %v2787_v12 }
 0x64a   :  { %3177 = vmatpush3.msra.mxu0 %v2771_v13 }
 0x64b   :  { %3178 = vmatprep.subr.mxu0 %v2786_v14 }
 0x64c   :  { %3179 = vmatpush3.msra.mxu0 %v2770_v15 }
 0x6b3   :  { %v2406_v25 = vpop.f32.mrf.mxu1 }
 0x6b5   :  { %v2408_v2 = vpop.f32.mrf.mxu1 }
 0x6b7   :  { %v2479_v26 = vpop.f32.mrf.mxu1 }
 0x6b8   :  { %v2484_v9 = vmax.f32 %v2406_v25, %v2479_v26 }
 0x6b9   :  { %v2481_v7 = vpop.f32.mrf.mxu1 }
 0x6ba   :  { %v2485_v8 = vmax.f32 %v2408_v2, %v2481_v7 }
 0x6bc   :  { %2761 = vmatprep.mubr.f32.mxu1 %v2485_v8 }
 0x6bd   :  { %2762 = vmatmul.mubr.f32.vlgmr.msra.gmra.mxu1 %v2484_v9 }
 0x77d   :  { %v2763_v16 = vpop.f32.mrf.mxu1 }
 0x77e   :  { %v2768_v19 = vmax.f32 %v2484_v9, %v2763_v16 }
 0x77f   :  { %v2765_v17 = vpop.f32.mrf.mxu1 }
 0x780   :  { %v2769_v18 = vmax.f32 %v2485_v8, %v2765_v17 }
 0x782   :  { %2866 = vmatprep.mubr.f32.mxu0 %v2769_v18 }
 0x783   :  { %2867 = vmatmul.mubr.f32.vlgmr.msra.gmra.mxu0 %v2768_v19 }
 0x843   :  { %v3180_v20 = vpop.f32.mrf.mxu0 }
 0x845   :  { %v3181_v21 = vpop.f32.mrf.mxu0 }
 0x846   :  { %v3182_v22 = vadd.f32 %v3181_v21, %v3180_v20 }
 0x848   :  { %v2873_v58 = vcombine.high %v3182_v22, %v3182_v22  ;;  %v2876_v44 = vsel %vm2875_vm7, %v3182_v22, 0.0 }
 0x849   :  { %v2877_v47 = vrot.slane %v2876_v44, 4 }
 0x84a   :  { %v2883_v6 = vsel %vm2875_vm7, %v2873_v58, 0.0 }
 0x84b   :  { %v2878_v55 = vadd.f32 %v2877_v47, %v2876_v44  ;;  %v2884_v49 = vrot.slane %v2883_v6, 4 }
 0x84d   :  { %v2879_v50 = vrot.slane %v2878_v55, 2  ;;  %v2885_v52 = vadd.f32 %v2884_v49, %v2883_v6 }
 0x84f   :  { %v2880_v53 = vadd.f32 %v2879_v50, %v2878_v55  ;;  %v2886_v54 = vrot.slane %v2885_v52, 2 }
 0x851   :  { %v2881_v56 = vrot.slane %v2880_v53, 1  ;;  %v2887_v60 = vadd.f32 %v2886_v54, %v2885_v52 }
 0x853   :  { %v2888_v62 = vrot.slane %v2887_v60, 1  ;;  %v2882_v1 = vadd.f32 %v2881_v56, %v2880_v53 }
 0x855   :  { %v2889_v23 = vadd.f32 %v2888_v62, %v2887_v60  ;;  %v2894_v63 = vadd.f32 %v2893_v27, %v2882_v1 }
 0x857   :  { %v2895_v28 = vadd.f32 %v2893_v27, %v2889_v23 }
 0x859   :  { %v2898_v29 = vrot.slane %v2895_v28, 7 }
 0x85b   :  { %v2900_v30 = vsel %vm2899_vm8, %v2898_v29, %v2894_v63 }
 0x85c   :  { %2902 = vst [vmem:[#allocation21] sm:$0x3] %v2900_v30 }
 0x85d   :  { %3605 = shalt.err (!%p3602_p7)
}
 0x85e   :  { %2912 = dma.vmem_to_hbm [thread:$0]  %s2910_s8, 32, %s4103_s9, [#allocation8]  }
 0x85f   :  { %3624 = dma.done.wait [#allocation8], 32  }
 0x860   :  { %3625 = vsyncadd [#allocation8], 4294967264 }
 0x861   :  { %2916 = vsyncpa [#allocation7], 1 }
 0x862   :  { %2917 = vsyncpa [#allocation10], 1 }
 0x863   :  { %2918 = vsyncpa [#allocation13], 1 }
 0x864   :  { %2919 = vsyncpa [#allocation16], 1 }
 0x865   :  { %2920 = vsyncpa [#allocation19], 1 }
 0x866   :  { %2921 = vsyncpa [#allocation8], 1 }

</bundles_post_ra>
